<compile_context>
chip_gen: v5e
topology: v5e:2x2
jax: 0.10.0
libtpu: 0.0.40
codegen_flags: <defaults>
</compile_context>

<pallas_src>
import functools
import math

import jax
import jax.numpy as jnp
from jax import lax
from jax.experimental import pallas as pl
from jax.experimental.pallas import tpu as pltpu

_EPS = 1e-6

# Fixed positional argument order shared by the wrapper and the kernel.
_ARG_BATCHED = ("emb_src", "emb_tgt", "kv_src", "kv_tgt")
_ARG_GLOBAL = (
    "pe_src", "pe_tgt",
    "enc_an_g", "enc_an_b", "dec_an_g", "dec_an_b",
    "enc_wqkv", "enc_bqkv", "enc_wo", "enc_bo",
    "enc_n1_g", "enc_n1_b",
    "enc_w1", "enc_b1", "enc_w2", "enc_b2",
    "enc_n2_g", "enc_n2_b",
    "dsa_wqkv", "dsa_bqkv", "dsa_wo", "dsa_bo",
    "dec_n1_g", "dec_n1_b",
    "dca_wq", "dca_bq", "dca_wkv", "dca_bkv", "dca_wo", "dca_bo",
    "dec_n2_g", "dec_n2_b",
    "dec_w1", "dec_b1", "dec_w2", "dec_b2",
    "dec_n3_g", "dec_n3_b",
    "out_w", "out_b",
)
_ARG_ORDER = _ARG_BATCHED + _ARG_GLOBAL


# ------------------------------------------------------------------ helpers

def _layer_norm(z, g, b, eps):
    mean = jnp.mean(z, axis=-1, keepdims=True)
    c = z - mean
    var = jnp.mean(c * c, axis=-1, keepdims=True)
    return c * lax.rsqrt(var + eps) * g + b


# ------------------------------------------------------------------ kernel

def _transformer_kernel(*refs, n_layers, n_head, d_qk, d_v, eps):
    """One grid step == one batch element through the whole encoder-decoder."""
    r = dict(zip(_ARG_ORDER, refs))
    logits_ref = refs[len(_ARG_ORDER)]

    bf16 = jnp.bfloat16
    Hqk = n_head * d_qk

    # ---- attention masks, built on-chip once and shared by every layer ----
    src_ok = r["kv_src"][0] > 0.0                       # (1, Ls) key-padding flags
    tgt_ok = r["kv_tgt"][0] > 0.0                       # (1, Lt)
    Ls = src_ok.shape[-1]
    Lt = tgt_ok.shape[-1]
    enc_mask = jnp.broadcast_to(src_ok, (Ls, Ls))       # encoder self-attn
    cross_mask = jnp.broadcast_to(src_ok, (Lt, Ls))     # decoder cross-attn
    rows = lax.broadcasted_iota(jnp.int32, (Lt, Lt), 0)
    cols = lax.broadcasted_iota(jnp.int32, (Lt, Lt), 1)
    dec_mask = jnp.logical_and(jnp.broadcast_to(tgt_ok, (Lt, Lt)), cols <= rows)

    def mha(q, k, v, mask, wo, bo):
        # q,k,v are bf16 with heads lane-concatenated; 1/sqrt(d_k) already in q.
        ctxs = []
        for h in range(n_head):                          # static unroll over heads
            q_h = q[:, h * d_qk:(h + 1) * d_qk]
            k_h = k[:, h * d_qk:(h + 1) * d_qk]
            v_h = v[:, h * d_v:(h + 1) * d_v]
            s = lax.dot_general(q_h, k_h, (((1,), (1,)), ((), ())),
                                preferred_element_type=jnp.float32)
            s = jnp.where(mask, s, -1e9)
            s = s - jnp.max(s, axis=-1, keepdims=True)
            p = jnp.exp(s)
            p = p * pl.reciprocal(jnp.sum(p, axis=-1, keepdims=True), approx=True)
            ctxs.append(jnp.dot(p.astype(bf16), v_h,
                                preferred_element_type=jnp.float32))
        # concat(heads) then ONE output projection (Lq, H*dv) @ (H*dv, D)
        ctx = jnp.concatenate(ctxs, axis=-1).astype(bf16)
        return jnp.dot(ctx, wo, preferred_element_type=jnp.float32) + bo

    # ---------------------------- encoder ----------------------------------
    # AddAndNorm(emb, PositionalEncoding(emb)) = LN(emb + (emb + pe)) = LN(2*emb + pe)
    x = _layer_norm(2.0 * r["emb_src"][0] + r["pe_src"][...],
                    r["enc_an_g"][...], r["enc_an_b"][...], eps)

    for l in range(n_layers):                            # static unroll over layers
        qkv = (jnp.dot(x.astype(bf16), r["enc_wqkv"][l],
                       preferred_element_type=jnp.float32)
               + r["enc_bqkv"][l]).astype(bf16)
        a = mha(qkv[:, :Hqk], qkv[:, Hqk:2 * Hqk], qkv[:, 2 * Hqk:],
                enc_mask, r["enc_wo"][l], r["enc_bo"][l])
        x = _layer_norm(x + a, r["enc_n1_g"][l], r["enc_n1_b"][l], eps)

        hid = jnp.maximum(jnp.dot(x.astype(bf16), r["enc_w1"][l],
                                  preferred_element_type=jnp.float32)
                          + r["enc_b1"][l], 0.0)
        ffo = jnp.dot(hid.astype(bf16), r["enc_w2"][l],
                      preferred_element_type=jnp.float32) + r["enc_b2"][l]
        x = _layer_norm(x + ffo, r["enc_n2_g"][l], r["enc_n2_b"][l], eps)

    enc_out_b = x.astype(bf16)                           # stays resident in VMEM

    # ---------------------------- decoder ----------------------------------
    y = _layer_norm(2.0 * r["emb_tgt"][0] + r["pe_tgt"][...],
                    r["dec_an_g"][...], r["dec_an_b"][...], eps)

    for l in range(n_layers):
        # masked self-attention
        qkv = (jnp.dot(y.astype(bf16), r["dsa_wqkv"][l],
                       preferred_element_type=jnp.float32)
               + r["dsa_bqkv"][l]).astype(bf16)
        a = mha(qkv[:, :Hqk], qkv[:, Hqk:2 * Hqk], qkv[:, 2 * Hqk:],
                dec_mask, r["dsa_wo"][l], r["dsa_bo"][l])
        y = _layer_norm(y + a, r["dec_n1_g"][l], r["dec_n1_b"][l], eps)

        # cross-attention (Q from decoder stream, K/V from encoder output)
        q = (jnp.dot(y.astype(bf16), r["dca_wq"][l],
                     preferred_element_type=jnp.float32)
             + r["dca_bq"][l]).astype(bf16)
        kv = (jnp.dot(enc_out_b, r["dca_wkv"][l],
                      preferred_element_type=jnp.float32)
              + r["dca_bkv"][l]).astype(bf16)
        a = mha(q, kv[:, :Hqk], kv[:, Hqk:],
                cross_mask, r["dca_wo"][l], r["dca_bo"][l])
        y = _layer_norm(y + a, r["dec_n2_g"][l], r["dec_n2_b"][l], eps)

        # feed-forward
        hid = jnp.maximum(jnp.dot(y.astype(bf16), r["dec_w1"][l],
                                  preferred_element_type=jnp.float32)
                          + r["dec_b1"][l], 0.0)
        ffo = jnp.dot(hid.astype(bf16), r["dec_w2"][l],
                      preferred_element_type=jnp.float32) + r["dec_b2"][l]
        y = _layer_norm(y + ffo, r["dec_n3_g"][l], r["dec_n3_b"][l], eps)

    # ---------------------------- logits ------------------------------------
    logits_ref[0] = jnp.dot(y.astype(bf16), r["out_w"][...],
                            preferred_element_type=jnp.float32) + r["out_b"][...]


# ------------------------------------------------------------------ wrapper

def transformer_forward(params, src, tgt, cfg):
    B, Ls = src.shape
    Lt = tgt.shape[1]
    V = cfg["vocab_size"]

    # TODO(synk): embedding gather stays in glue JAX (tiny table); a
    #             scalar-prefetch gather kernel is not worth it at this size.
    tensors = dict(params)
    tensors["emb_src"] = jnp.take(params["enc_emb"], src, axis=0)        # (B, Ls, D)
    tensors["emb_tgt"] = jnp.take(params["dec_emb"], tgt, axis=0)        # (B, Lt, D)
    tensors["kv_src"] = (src != 0).astype(jnp.float32).reshape(B, 1, Ls)  # enc key mask
    tensors["kv_tgt"] = (tgt != 0).astype(jnp.float32).reshape(B, 1, Lt)  # dec key mask
    tensors["pe_src"] = params["pe"][:Ls]
    tensors["pe_tgt"] = params["pe"][:Lt]

    args = [tensors[n] for n in _ARG_ORDER]
    in_specs = []
    for n in _ARG_ORDER:
        a = tensors[n]
        if n in _ARG_BATCHED:
            in_specs.append(pl.BlockSpec((1,) + a.shape[1:], lambda b: (b, 0, 0)))
        else:  # full-array block, replicated across the batch grid axis
            in_specs.append(pl.BlockSpec(a.shape, lambda b, _z=(0,) * a.ndim: _z))

    kern = functools.partial(
        _transformer_kernel,
        n_layers=cfg["n_layers"], n_head=cfg["n_head"],
        d_qk=cfg["d_k"], d_v=cfg["d_v"], eps=_EPS)

    return pl.pallas_call(
        kern,
        out_shape=jax.ShapeDtypeStruct((B, Lt, V), jnp.float32),
        grid=(B,),
        in_specs=in_specs,
        out_specs=pl.BlockSpec((1, Lt, V), lambda b: (b, 0, 0)),
        compiler_params=pltpu.CompilerParams(
            dimension_semantics=("parallel",)),
    )(*args)


# ------------------------------------------------------------------ params

def _sinusoidal_pe(max_len, d_model):
    pos = jnp.arange(max_len, dtype=jnp.float32)[:, None]
    i = jnp.arange(0, d_model, 2, dtype=jnp.float32)[None, :]
    angle = pos / jnp.power(10000.0, i / d_model)
    pe = jnp.zeros((max_len, d_model), jnp.float32)
    pe = pe.at[:, 0::2].set(jnp.sin(angle))
    pe = pe.at[:, 1::2].set(jnp.cos(angle))
    return pe


def init_params(key, cfg):
    D, V, H = cfg["d_model"], cfg["vocab_size"], cfg["n_head"]
    NL = cfg["n_layers"]
    dqk, dv, dff = cfg["d_k"], cfg["d_v"], cfg["d_inner"]
    scale = 1.0 / math.sqrt(dqk)          # folded into Wq / bq at init time
    keys = iter(jax.random.split(key, 64))

    def rnd(shape):
        return 0.02 * jax.random.normal(next(keys), shape, jnp.float32)

    def qkv():
        # heads lane-concatenated: (NL, D, H*dq | H*dk | H*dv); scale folded into Q
        wq = rnd((NL, D, H * dqk)) * scale
        wk = rnd((NL, D, H * dqk))
        wv = rnd((NL, D, H * dv))
        w = jnp.concatenate([wq, wk, wv], axis=-1).astype(jnp.bfloat16)
        b = jnp.zeros((NL, 1, H * (2 * dqk + dv)), jnp.float32)
        return w, b

    def out_proj():
        return (rnd((NL, H * dv, D)).astype(jnp.bfloat16),
                jnp.zeros((NL, 1, D), jnp.float32))

    def norm():
        return (jnp.ones((NL, 1, D), jnp.float32),
                jnp.zeros((NL, 1, D), jnp.float32))

    def ffn():
        return (rnd((NL, D, dff)).astype(jnp.bfloat16),
                jnp.zeros((NL, 1, dff), jnp.float32),
                rnd((NL, dff, D)).astype(jnp.bfloat16),
                jnp.zeros((NL, 1, D), jnp.float32))

    p = {}
    p["enc_emb"] = rnd((V, D))
    p["dec_emb"] = rnd((V, D))
    p["pe"] = _sinusoidal_pe(cfg["max_len"], D)
    p["enc_an_g"] = jnp.ones((1, D), jnp.float32)
    p["enc_an_b"] = jnp.zeros((1, D), jnp.float32)
    p["dec_an_g"] = jnp.ones((1, D), jnp.float32)
    p["dec_an_b"] = jnp.zeros((1, D), jnp.float32)

    # encoder layers (stacked along leading layer dim)
    p["enc_wqkv"], p["enc_bqkv"] = qkv()
    p["enc_wo"], p["enc_bo"] = out_proj()
    p["enc_n1_g"], p["enc_n1_b"] = norm()
    p["enc_w1"], p["enc_b1"], p["enc_w2"], p["enc_b2"] = ffn()
    p["enc_n2_g"], p["enc_n2_b"] = norm()

    # decoder layers
    p["dsa_wqkv"], p["dsa_bqkv"] = qkv()
    p["dsa_wo"], p["dsa_bo"] = out_proj()
    p["dec_n1_g"], p["dec_n1_b"] = norm()
    p["dca_wq"] = (rnd((NL, D, H * dqk)) * scale).astype(jnp.bfloat16)
    p["dca_bq"] = jnp.zeros((NL, 1, H * dqk), jnp.float32)
    wkv = jnp.concatenate([rnd((NL, D, H * dqk)), rnd((NL, D, H * dv))], axis=-1)
    p["dca_wkv"] = wkv.astype(jnp.bfloat16)
    p["dca_bkv"] = jnp.zeros((NL, 1, H * (dqk + dv)), jnp.float32)
    p["dca_wo"], p["dca_bo"] = out_proj()
    p["dec_n2_g"], p["dec_n2_b"] = norm()
    p["dec_w1"], p["dec_b1"], p["dec_w2"], p["dec_b2"] = ffn()
    p["dec_n3_g"], p["dec_n3_b"] = norm()

    p["out_w"] = rnd((D, V)).astype(jnp.bfloat16)
    p["out_b"] = jnp.zeros((1, V), jnp.float32)
    return p


# ------------------------------------------------------------------ main

if __name__ == "__main__":
    cfg = dict(d_model=32, vocab_size=16, max_len=16, n_layers=2,
               n_head=4, d_q=8, d_k=8, d_v=8, d_inner=64, P_drop=0.1)
    assert cfg["d_q"] == cfg["d_k"], "q/k head dims must match for q@k^T"

    key = jax.random.PRNGKey(0)
    k_src, k_tgt, k_par = jax.random.split(key, 3)
    B, Ls, Lt = 2, 8, 8
    src = jax.random.randint(k_src, (B, Ls), 0, cfg["vocab_size"], dtype=jnp.int32)
    tgt = jax.random.randint(k_tgt, (B, Lt), 0, cfg["vocab_size"], dtype=jnp.int32)

    params = init_params(k_par, cfg)

    fwd = jax.jit(functools.partial(transformer_forward, cfg=cfg))
    logits = fwd(params, src, tgt)
    jax.block_until_ready(logits)

    assert logits.shape == (B, Lt, cfg["vocab_size"])
    assert logits.dtype == jnp.float32
    assert bool(jnp.all(jnp.isfinite(logits)))
    print("KERNEL_OK")
</pallas_src>

<mosaic_0001>
module attributes {stable_mosaic.version = 11 : i64} {
  func.func @_transformer_kernel(%arg0: i32, %arg1: memref<1x8x32xf32, #tpu.memory_space<vmem>>, %arg2: memref<1x8x32xf32, #tpu.memory_space<vmem>>, %arg3: memref<1x1x8xf32, #tpu.memory_space<vmem>>, %arg4: memref<1x1x8xf32, #tpu.memory_space<vmem>>, %arg5: memref<8x32xf32, #tpu.memory_space<vmem>>, %arg6: memref<8x32xf32, #tpu.memory_space<vmem>>, %arg7: memref<1x32xf32, #tpu.memory_space<vmem>>, %arg8: memref<1x32xf32, #tpu.memory_space<vmem>>, %arg9: memref<1x32xf32, #tpu.memory_space<vmem>>, %arg10: memref<1x32xf32, #tpu.memory_space<vmem>>, %arg11: memref<2x32x96xbf16, #tpu.memory_space<vmem>>, %arg12: memref<2x1x96xf32, #tpu.memory_space<vmem>>, %arg13: memref<2x32x32xbf16, #tpu.memory_space<vmem>>, %arg14: memref<2x1x32xf32, #tpu.memory_space<vmem>>, %arg15: memref<2x1x32xf32, #tpu.memory_space<vmem>>, %arg16: memref<2x1x32xf32, #tpu.memory_space<vmem>>, %arg17: memref<2x32x64xbf16, #tpu.memory_space<vmem>>, %arg18: memref<2x1x64xf32, #tpu.memory_space<vmem>>, %arg19: memref<2x64x32xbf16, #tpu.memory_space<vmem>>, %arg20: memref<2x1x32xf32, #tpu.memory_space<vmem>>, %arg21: memref<2x1x32xf32, #tpu.memory_space<vmem>>, %arg22: memref<2x1x32xf32, #tpu.memory_space<vmem>>, %arg23: memref<2x32x96xbf16, #tpu.memory_space<vmem>>, %arg24: memref<2x1x96xf32, #tpu.memory_space<vmem>>, %arg25: memref<2x32x32xbf16, #tpu.memory_space<vmem>>, %arg26: memref<2x1x32xf32, #tpu.memory_space<vmem>>, %arg27: memref<2x1x32xf32, #tpu.memory_space<vmem>>, %arg28: memref<2x1x32xf32, #tpu.memory_space<vmem>>, %arg29: memref<2x32x32xbf16, #tpu.memory_space<vmem>>, %arg30: memref<2x1x32xf32, #tpu.memory_space<vmem>>, %arg31: memref<2x32x64xbf16, #tpu.memory_space<vmem>>, %arg32: memref<2x1x64xf32, #tpu.memory_space<vmem>>, %arg33: memref<2x32x32xbf16, #tpu.memory_space<vmem>>, %arg34: memref<2x1x32xf32, #tpu.memory_space<vmem>>, %arg35: memref<2x1x32xf32, #tpu.memory_space<vmem>>, %arg36: memref<2x1x32xf32, #tpu.memory_space<vmem>>, %arg37: memref<2x32x64xbf16, #tpu.memory_space<vmem>>, %arg38: memref<2x1x64xf32, #tpu.memory_space<vmem>>, %arg39: memref<2x64x32xbf16, #tpu.memory_space<vmem>>, %arg40: memref<2x1x32xf32, #tpu.memory_space<vmem>>, %arg41: memref<2x1x32xf32, #tpu.memory_space<vmem>>, %arg42: memref<2x1x32xf32, #tpu.memory_space<vmem>>, %arg43: memref<32x16xbf16, #tpu.memory_space<vmem>>, %arg44: memref<1x16xf32, #tpu.memory_space<vmem>>, %arg45: memref<1x8x16xf32, #tpu.memory_space<vmem>>) attributes {dimension_semantics = [#tpu.dimension_semantics<parallel>], iteration_bounds = array<i64: 2>, scalar_prefetch = 0 : i64, scratch_operands = 0 : i64, tpu.core_type = #tpu.core_type<tc>, window_params = [{transform_indices = @transform_0, window_bounds = array<i64: 1, 8, 32>}, {transform_indices = @transform_1, window_bounds = array<i64: 1, 8, 32>}, {transform_indices = @transform_2, window_bounds = array<i64: 1, 1, 8>}, {transform_indices = @transform_3, window_bounds = array<i64: 1, 1, 8>}, {pipeline_mode = #tpu.pipeline_mode<synchronous>, transform_indices = @transform_4, window_bounds = array<i64: 8, 32>}, {pipeline_mode = #tpu.pipeline_mode<synchronous>, transform_indices = @transform_5, window_bounds = array<i64: 8, 32>}, {pipeline_mode = #tpu.pipeline_mode<synchronous>, transform_indices = @transform_6, window_bounds = array<i64: 1, 32>}, {pipeline_mode = #tpu.pipeline_mode<synchronous>, transform_indices = @transform_7, window_bounds = array<i64: 1, 32>}, {pipeline_mode = #tpu.pipeline_mode<synchronous>, transform_indices = @transform_8, window_bounds = array<i64: 1, 32>}, {pipeline_mode = #tpu.pipeline_mode<synchronous>, transform_indices = @transform_9, window_bounds = array<i64: 1, 32>}, {pipeline_mode = #tpu.pipeline_mode<synchronous>, transform_indices = @transform_10, window_bounds = array<i64: 2, 32, 96>}, {pipeline_mode = #tpu.pipeline_mode<synchronous>, transform_indices = @transform_11, window_bounds = array<i64: 2, 1, 96>}, {pipeline_mode = #tpu.pipeline_mode<synchronous>, transform_indices = @transform_12, window_bounds = array<i64: 2, 32, 32>}, {pipeline_mode = #tpu.pipeline_mode<synchronous>, transform_indices = @transform_13, window_bounds = array<i64: 2, 1, 32>}, {pipeline_mode = #tpu.pipeline_mode<synchronous>, transform_indices = @transform_14, window_bounds = array<i64: 2, 1, 32>}, {pipeline_mode = #tpu.pipeline_mode<synchronous>, transform_indices = @transform_15, window_bounds = array<i64: 2, 1, 32>}, {pipeline_mode = #tpu.pipeline_mode<synchronous>, transform_indices = @transform_16, window_bounds = array<i64: 2, 32, 64>}, {pipeline_mode = #tpu.pipeline_mode<synchronous>, transform_indices = @transform_17, window_bounds = array<i64: 2, 1, 64>}, {pipeline_mode = #tpu.pipeline_mode<synchronous>, transform_indices = @transform_18, window_bounds = array<i64: 2, 64, 32>}, {pipeline_mode = #tpu.pipeline_mode<synchronous>, transform_indices = @transform_19, window_bounds = array<i64: 2, 1, 32>}, {pipeline_mode = #tpu.pipeline_mode<synchronous>, transform_indices = @transform_20, window_bounds = array<i64: 2, 1, 32>}, {pipeline_mode = #tpu.pipeline_mode<synchronous>, transform_indices = @transform_21, window_bounds = array<i64: 2, 1, 32>}, {pipeline_mode = #tpu.pipeline_mode<synchronous>, transform_indices = @transform_22, window_bounds = array<i64: 2, 32, 96>}, {pipeline_mode = #tpu.pipeline_mode<synchronous>, transform_indices = @transform_23, window_bounds = array<i64: 2, 1, 96>}, {pipeline_mode = #tpu.pipeline_mode<synchronous>, transform_indices = @transform_24, window_bounds = array<i64: 2, 32, 32>}, {pipeline_mode = #tpu.pipeline_mode<synchronous>, transform_indices = @transform_25, window_bounds = array<i64: 2, 1, 32>}, {pipeline_mode = #tpu.pipeline_mode<synchronous>, transform_indices = @transform_26, window_bounds = array<i64: 2, 1, 32>}, {pipeline_mode = #tpu.pipeline_mode<synchronous>, transform_indices = @transform_27, window_bounds = array<i64: 2, 1, 32>}, {pipeline_mode = #tpu.pipeline_mode<synchronous>, transform_indices = @transform_28, window_bounds = array<i64: 2, 32, 32>}, {pipeline_mode = #tpu.pipeline_mode<synchronous>, transform_indices = @transform_29, window_bounds = array<i64: 2, 1, 32>}, {pipeline_mode = #tpu.pipeline_mode<synchronous>, transform_indices = @transform_30, window_bounds = array<i64: 2, 32, 64>}, {pipeline_mode = #tpu.pipeline_mode<synchronous>, transform_indices = @transform_31, window_bounds = array<i64: 2, 1, 64>}, {pipeline_mode = #tpu.pipeline_mode<synchronous>, transform_indices = @transform_32, window_bounds = array<i64: 2, 32, 32>}, {pipeline_mode = #tpu.pipeline_mode<synchronous>, transform_indices = @transform_33, window_bounds = array<i64: 2, 1, 32>}, {pipeline_mode = #tpu.pipeline_mode<synchronous>, transform_indices = @transform_34, window_bounds = array<i64: 2, 1, 32>}, {pipeline_mode = #tpu.pipeline_mode<synchronous>, transform_indices = @transform_35, window_bounds = array<i64: 2, 1, 32>}, {pipeline_mode = #tpu.pipeline_mode<synchronous>, transform_indices = @transform_36, window_bounds = array<i64: 2, 32, 64>}, {pipeline_mode = #tpu.pipeline_mode<synchronous>, transform_indices = @transform_37, window_bounds = array<i64: 2, 1, 64>}, {pipeline_mode = #tpu.pipeline_mode<synchronous>, transform_indices = @transform_38, window_bounds = array<i64: 2, 64, 32>}, {pipeline_mode = #tpu.pipeline_mode<synchronous>, transform_indices = @transform_39, window_bounds = array<i64: 2, 1, 32>}, {pipeline_mode = #tpu.pipeline_mode<synchronous>, transform_indices = @transform_40, window_bounds = array<i64: 2, 1, 32>}, {pipeline_mode = #tpu.pipeline_mode<synchronous>, transform_indices = @transform_41, window_bounds = array<i64: 2, 1, 32>}, {pipeline_mode = #tpu.pipeline_mode<synchronous>, transform_indices = @transform_42, window_bounds = array<i64: 32, 16>}, {pipeline_mode = #tpu.pipeline_mode<synchronous>, transform_indices = @transform_43, window_bounds = array<i64: 1, 16>}, {transform_indices = @transform_44, window_bounds = array<i64: 1, 8, 16>}]} {
    %c0 = arith.constant 0 : index
    %c0_0 = arith.constant 0 : index
    %c0_1 = arith.constant 0 : index
    %0 = vector.load %arg3[%c0, %c0_0, %c0_1] : memref<1x1x8xf32, #tpu.memory_space<vmem>>, vector<1x1x8xf32>
    %1 = vector.shape_cast %0 : vector<1x1x8xf32> to vector<1x8xf32>
    %cst = arith.constant 0.000000e+00 : f32
    %2 = vector.broadcast %cst : f32 to vector<1x8xf32>
    %3 = arith.cmpf ogt, %1, %2 : vector<1x8xf32>
    %c0_2 = arith.constant 0 : index
    %c0_3 = arith.constant 0 : index
    %c0_4 = arith.constant 0 : index
    %4 = vector.load %arg4[%c0_2, %c0_3, %c0_4] : memref<1x1x8xf32, #tpu.memory_space<vmem>>, vector<1x1x8xf32>
    %5 = vector.shape_cast %4 : vector<1x1x8xf32> to vector<1x8xf32>
    %cst_5 = arith.constant 0.000000e+00 : f32
    %6 = vector.broadcast %cst_5 : f32 to vector<1x8xf32>
    %7 = arith.cmpf ogt, %5, %6 : vector<1x8xf32>
    %8 = vector.shape_cast %3 : vector<1x8xi1> to vector<1x8xi1>
    %9 = vector.broadcast %8 : vector<1x8xi1> to vector<8x8xi1>
    %10 = vector.shape_cast %3 : vector<1x8xi1> to vector<1x8xi1>
    %11 = vector.broadcast %10 : vector<1x8xi1> to vector<8x8xi1>
    %12 = tpu.iota {dimensions = array<i32: 0>} : vector<8x8xi32>
    %13 = tpu.iota {dimensions = array<i32: 1>} : vector<8x8xi32>
    %14 = vector.shape_cast %7 : vector<1x8xi1> to vector<1x8xi1>
    %15 = vector.broadcast %14 : vector<1x8xi1> to vector<8x8xi1>
    %16 = arith.cmpi sle, %13, %12 : vector<8x8xi32>
    %17 = arith.andi %15, %16 : vector<8x8xi1>
    %c0_6 = arith.constant 0 : index
    %c0_7 = arith.constant 0 : index
    %c0_8 = arith.constant 0 : index
    %18 = vector.load %arg1[%c0_6, %c0_7, %c0_8] : memref<1x8x32xf32, #tpu.memory_space<vmem>>, vector<1x8x32xf32>
    %19 = vector.shape_cast %18 : vector<1x8x32xf32> to vector<8x32xf32>
    %cst_9 = arith.constant 2.000000e+00 : f32
    %20 = vector.broadcast %cst_9 : f32 to vector<8x32xf32>
    %21 = arith.mulf %20, %19 : vector<8x32xf32>
    %c0_10 = arith.constant 0 : index
    %c0_11 = arith.constant 0 : index
    %22 = vector.load %arg5[%c0_10, %c0_11] : memref<8x32xf32, #tpu.memory_space<vmem>>, vector<8x32xf32>
    %23 = arith.addf %21, %22 : vector<8x32xf32>
    %c0_12 = arith.constant 0 : index
    %c0_13 = arith.constant 0 : index
    %24 = vector.load %arg7[%c0_12, %c0_13] : memref<1x32xf32, #tpu.memory_space<vmem>>, vector<1x32xf32>
    %c0_14 = arith.constant 0 : index
    %c0_15 = arith.constant 0 : index
    %25 = vector.load %arg8[%c0_14, %c0_15] : memref<1x32xf32, #tpu.memory_space<vmem>>, vector<1x32xf32>
    %cst_16 = arith.constant dense<0.000000e+00> : vector<8xf32>
    %26 = vector.multi_reduction <add>, %23, %cst_16 [1] : vector<8x32xf32> to vector<8xf32>
    %27 = vector.shape_cast %26 : vector<8xf32> to vector<8x1xf32>
    %cst_17 = arith.constant 3.200000e+01 : f32
    %28 = vector.broadcast %cst_17 : f32 to vector<8x1xf32>
    %29 = arith.divf %27, %28 : vector<8x1xf32>
    %30 = vector.broadcast %29 : vector<8x1xf32> to vector<8x32xf32>
    %31 = arith.subf %23, %30 : vector<8x32xf32>
    %32 = arith.mulf %31, %31 : vector<8x32xf32>
    %cst_18 = arith.constant dense<0.000000e+00> : vector<8xf32>
    %33 = vector.multi_reduction <add>, %32, %cst_18 [1] : vector<8x32xf32> to vector<8xf32>
    %34 = vector.shape_cast %33 : vector<8xf32> to vector<8x1xf32>
    %cst_19 = arith.constant 3.200000e+01 : f32
    %35 = vector.broadcast %cst_19 : f32 to vector<8x1xf32>
    %36 = arith.divf %34, %35 : vector<8x1xf32>
    %cst_20 = arith.constant 9.99999997E-7 : f32
    %37 = vector.broadcast %cst_20 : f32 to vector<8x1xf32>
    %38 = arith.addf %36, %37 : vector<8x1xf32>
    %39 = math.rsqrt %38 : vector<8x1xf32>
    %40 = vector.broadcast %39 : vector<8x1xf32> to vector<8x32xf32>
    %41 = arith.mulf %31, %40 : vector<8x32xf32>
    %42 = vector.broadcast %24 : vector<1x32xf32> to vector<8x32xf32>
    %43 = arith.mulf %41, %42 : vector<8x32xf32>
    %44 = vector.broadcast %25 : vector<1x32xf32> to vector<8x32xf32>
    %45 = arith.addf %43, %44 : vector<8x32xf32>
    %46 = arith.truncf %45 : vector<8x32xf32> to vector<8x32xbf16>
    %c0_21 = arith.constant 0 : index
    %c0_22 = arith.constant 0 : index
    %c0_23 = arith.constant 0 : index
    %47 = vector.load %arg11[%c0_21, %c0_22, %c0_23] : memref<2x32x96xbf16, #tpu.memory_space<vmem>>, vector<1x32x96xbf16>
    %48 = vector.shape_cast %47 : vector<1x32x96xbf16> to vector<32x96xbf16>
    %cst_24 = arith.constant dense<0.000000e+00> : vector<8x96xf32>
    %49 = tpu.matmul %46, %48, %cst_24 {dimension_numbers = #tpu.dot_dimension_numbers<[1], [0], [0], [1], [0, 0, 1, 1], [], []>} : vector<8x32xbf16>, vector<32x96xbf16>, vector<8x96xf32> -> vector<8x96xf32>
    %c0_25 = arith.constant 0 : index
    %c0_26 = arith.constant 0 : index
    %c0_27 = arith.constant 0 : index
    %50 = vector.load %arg12[%c0_25, %c0_26, %c0_27] : memref<2x1x96xf32, #tpu.memory_space<vmem>>, vector<1x1x96xf32>
    %51 = vector.shape_cast %50 : vector<1x1x96xf32> to vector<1x96xf32>
    %52 = vector.broadcast %51 : vector<1x96xf32> to vector<8x96xf32>
    %53 = arith.addf %49, %52 : vector<8x96xf32>
    %54 = arith.truncf %53 : vector<8x96xf32> to vector<8x96xbf16>
    %55 = vector.extract_strided_slice %54 {offsets = [0, 0], sizes = [8, 32], strides = [1, 1]} : vector<8x96xbf16> to vector<8x32xbf16>
    %56 = vector.extract_strided_slice %54 {offsets = [0, 32], sizes = [8, 32], strides = [1, 1]} : vector<8x96xbf16> to vector<8x32xbf16>
    %57 = vector.extract_strided_slice %54 {offsets = [0, 64], sizes = [8, 32], strides = [1, 1]} : vector<8x96xbf16> to vector<8x32xbf16>
    %c0_28 = arith.constant 0 : index
    %c0_29 = arith.constant 0 : index
    %c0_30 = arith.constant 0 : index
    %58 = vector.load %arg13[%c0_28, %c0_29, %c0_30] : memref<2x32x32xbf16, #tpu.memory_space<vmem>>, vector<1x32x32xbf16>
    %59 = vector.shape_cast %58 : vector<1x32x32xbf16> to vector<32x32xbf16>
    %c0_31 = arith.constant 0 : index
    %c0_32 = arith.constant 0 : index
    %c0_33 = arith.constant 0 : index
    %60 = vector.load %arg14[%c0_31, %c0_32, %c0_33] : memref<2x1x32xf32, #tpu.memory_space<vmem>>, vector<1x1x32xf32>
    %61 = vector.shape_cast %60 : vector<1x1x32xf32> to vector<1x32xf32>
    %62 = vector.extract_strided_slice %55 {offsets = [0, 0], sizes = [8, 8], strides = [1, 1]} : vector<8x32xbf16> to vector<8x8xbf16>
    %63 = vector.extract_strided_slice %56 {offsets = [0, 0], sizes = [8, 8], strides = [1, 1]} : vector<8x32xbf16> to vector<8x8xbf16>
    %64 = vector.extract_strided_slice %57 {offsets = [0, 0], sizes = [8, 8], strides = [1, 1]} : vector<8x32xbf16> to vector<8x8xbf16>
    %cst_34 = arith.constant dense<0.000000e+00> : vector<8x8xf32>
    %65 = tpu.matmul %62, %63, %cst_34 {dimension_numbers = #tpu.dot_dimension_numbers<[1], [1], [0], [0], [0, 0, 1, 0], [], []>} : vector<8x8xbf16>, vector<8x8xbf16>, vector<8x8xf32> -> vector<8x8xf32>
    %cst_35 = arith.constant -1.000000e+09 : f32
    %66 = vector.broadcast %cst_35 : f32 to vector<8x8xf32>
    %67 = arith.select %9, %65, %66 : vector<8x8xi1>, vector<8x8xf32>
    %cst_36 = arith.constant dense<0xFF800000> : vector<8xf32>
    %68 = vector.multi_reduction <maximumf>, %67, %cst_36 [1] : vector<8x8xf32> to vector<8xf32>
    %69 = vector.shape_cast %68 : vector<8xf32> to vector<8x1xf32>
    %70 = vector.broadcast %69 : vector<8x1xf32> to vector<8x8xf32>
    %71 = arith.subf %67, %70 : vector<8x8xf32>
    %72 = math.exp %71 : vector<8x8xf32>
    %cst_37 = arith.constant dense<0.000000e+00> : vector<8xf32>
    %73 = vector.multi_reduction <add>, %72, %cst_37 [1] : vector<8x8xf32> to vector<8xf32>
    %74 = vector.shape_cast %73 : vector<8xf32> to vector<8x1xf32>
    %75 = tpu.reciprocal %74 {approx = true} : vector<8x1xf32> -> vector<8x1xf32>
    %76 = vector.broadcast %75 : vector<8x1xf32> to vector<8x8xf32>
    %77 = arith.mulf %72, %76 : vector<8x8xf32>
    %78 = arith.truncf %77 : vector<8x8xf32> to vector<8x8xbf16>
    %cst_38 = arith.constant dense<0.000000e+00> : vector<8x8xf32>
    %79 = tpu.matmul %78, %64, %cst_38 {dimension_numbers = #tpu.dot_dimension_numbers<[1], [0], [0], [1], [0, 0, 1, 1], [], []>} : vector<8x8xbf16>, vector<8x8xbf16>, vector<8x8xf32> -> vector<8x8xf32>
    %80 = vector.extract_strided_slice %55 {offsets = [0, 8], sizes = [8, 8], strides = [1, 1]} : vector<8x32xbf16> to vector<8x8xbf16>
    %81 = vector.extract_strided_slice %56 {offsets = [0, 8], sizes = [8, 8], strides = [1, 1]} : vector<8x32xbf16> to vector<8x8xbf16>
    %82 = vector.extract_strided_slice %57 {offsets = [0, 8], sizes = [8, 8], strides = [1, 1]} : vector<8x32xbf16> to vector<8x8xbf16>
    %cst_39 = arith.constant dense<0.000000e+00> : vector<8x8xf32>
    %83 = tpu.matmul %80, %81, %cst_39 {dimension_numbers = #tpu.dot_dimension_numbers<[1], [1], [0], [0], [0, 0, 1, 0], [], []>} : vector<8x8xbf16>, vector<8x8xbf16>, vector<8x8xf32> -> vector<8x8xf32>
    %cst_40 = arith.constant -1.000000e+09 : f32
    %84 = vector.broadcast %cst_40 : f32 to vector<8x8xf32>
    %85 = arith.select %9, %83, %84 : vector<8x8xi1>, vector<8x8xf32>
    %cst_41 = arith.constant dense<0xFF800000> : vector<8xf32>
    %86 = vector.multi_reduction <maximumf>, %85, %cst_41 [1] : vector<8x8xf32> to vector<8xf32>
    %87 = vector.shape_cast %86 : vector<8xf32> to vector<8x1xf32>
    %88 = vector.broadcast %87 : vector<8x1xf32> to vector<8x8xf32>
    %89 = arith.subf %85, %88 : vector<8x8xf32>
    %90 = math.exp %89 : vector<8x8xf32>
    %cst_42 = arith.constant dense<0.000000e+00> : vector<8xf32>
    %91 = vector.multi_reduction <add>, %90, %cst_42 [1] : vector<8x8xf32> to vector<8xf32>
    %92 = vector.shape_cast %91 : vector<8xf32> to vector<8x1xf32>
    %93 = tpu.reciprocal %92 {approx = true} : vector<8x1xf32> -> vector<8x1xf32>
    %94 = vector.broadcast %93 : vector<8x1xf32> to vector<8x8xf32>
    %95 = arith.mulf %90, %94 : vector<8x8xf32>
    %96 = arith.truncf %95 : vector<8x8xf32> to vector<8x8xbf16>
    %cst_43 = arith.constant dense<0.000000e+00> : vector<8x8xf32>
    %97 = tpu.matmul %96, %82, %cst_43 {dimension_numbers = #tpu.dot_dimension_numbers<[1], [0], [0], [1], [0, 0, 1, 1], [], []>} : vector<8x8xbf16>, vector<8x8xbf16>, vector<8x8xf32> -> vector<8x8xf32>
    %98 = vector.extract_strided_slice %55 {offsets = [0, 16], sizes = [8, 8], strides = [1, 1]} : vector<8x32xbf16> to vector<8x8xbf16>
    %99 = vector.extract_strided_slice %56 {offsets = [0, 16], sizes = [8, 8], strides = [1, 1]} : vector<8x32xbf16> to vector<8x8xbf16>
    %100 = vector.extract_strided_slice %57 {offsets = [0, 16], sizes = [8, 8], strides = [1, 1]} : vector<8x32xbf16> to vector<8x8xbf16>
    %cst_44 = arith.constant dense<0.000000e+00> : vector<8x8xf32>
    %101 = tpu.matmul %98, %99, %cst_44 {dimension_numbers = #tpu.dot_dimension_numbers<[1], [1], [0], [0], [0, 0, 1, 0], [], []>} : vector<8x8xbf16>, vector<8x8xbf16>, vector<8x8xf32> -> vector<8x8xf32>
    %cst_45 = arith.constant -1.000000e+09 : f32
    %102 = vector.broadcast %cst_45 : f32 to vector<8x8xf32>
    %103 = arith.select %9, %101, %102 : vector<8x8xi1>, vector<8x8xf32>
    %cst_46 = arith.constant dense<0xFF800000> : vector<8xf32>
    %104 = vector.multi_reduction <maximumf>, %103, %cst_46 [1] : vector<8x8xf32> to vector<8xf32>
    %105 = vector.shape_cast %104 : vector<8xf32> to vector<8x1xf32>
    %106 = vector.broadcast %105 : vector<8x1xf32> to vector<8x8xf32>
    %107 = arith.subf %103, %106 : vector<8x8xf32>
    %108 = math.exp %107 : vector<8x8xf32>
    %cst_47 = arith.constant dense<0.000000e+00> : vector<8xf32>
    %109 = vector.multi_reduction <add>, %108, %cst_47 [1] : vector<8x8xf32> to vector<8xf32>
    %110 = vector.shape_cast %109 : vector<8xf32> to vector<8x1xf32>
    %111 = tpu.reciprocal %110 {approx = true} : vector<8x1xf32> -> vector<8x1xf32>
    %112 = vector.broadcast %111 : vector<8x1xf32> to vector<8x8xf32>
    %113 = arith.mulf %108, %112 : vector<8x8xf32>
    %114 = arith.truncf %113 : vector<8x8xf32> to vector<8x8xbf16>
    %cst_48 = arith.constant dense<0.000000e+00> : vector<8x8xf32>
    %115 = tpu.matmul %114, %100, %cst_48 {dimension_numbers = #tpu.dot_dimension_numbers<[1], [0], [0], [1], [0, 0, 1, 1], [], []>} : vector<8x8xbf16>, vector<8x8xbf16>, vector<8x8xf32> -> vector<8x8xf32>
    %116 = vector.extract_strided_slice %55 {offsets = [0, 24], sizes = [8, 8], strides = [1, 1]} : vector<8x32xbf16> to vector<8x8xbf16>
    %117 = vector.extract_strided_slice %56 {offsets = [0, 24], sizes = [8, 8], strides = [1, 1]} : vector<8x32xbf16> to vector<8x8xbf16>
    %118 = vector.extract_strided_slice %57 {offsets = [0, 24], sizes = [8, 8], strides = [1, 1]} : vector<8x32xbf16> to vector<8x8xbf16>
    %cst_49 = arith.constant dense<0.000000e+00> : vector<8x8xf32>
    %119 = tpu.matmul %116, %117, %cst_49 {dimension_numbers = #tpu.dot_dimension_numbers<[1], [1], [0], [0], [0, 0, 1, 0], [], []>} : vector<8x8xbf16>, vector<8x8xbf16>, vector<8x8xf32> -> vector<8x8xf32>
    %cst_50 = arith.constant -1.000000e+09 : f32
    %120 = vector.broadcast %cst_50 : f32 to vector<8x8xf32>
    %121 = arith.select %9, %119, %120 : vector<8x8xi1>, vector<8x8xf32>
    %cst_51 = arith.constant dense<0xFF800000> : vector<8xf32>
    %122 = vector.multi_reduction <maximumf>, %121, %cst_51 [1] : vector<8x8xf32> to vector<8xf32>
    %123 = vector.shape_cast %122 : vector<8xf32> to vector<8x1xf32>
    %124 = vector.broadcast %123 : vector<8x1xf32> to vector<8x8xf32>
    %125 = arith.subf %121, %124 : vector<8x8xf32>
    %126 = math.exp %125 : vector<8x8xf32>
    %cst_52 = arith.constant dense<0.000000e+00> : vector<8xf32>
    %127 = vector.multi_reduction <add>, %126, %cst_52 [1] : vector<8x8xf32> to vector<8xf32>
    %128 = vector.shape_cast %127 : vector<8xf32> to vector<8x1xf32>
    %129 = tpu.reciprocal %128 {approx = true} : vector<8x1xf32> -> vector<8x1xf32>
    %130 = vector.broadcast %129 : vector<8x1xf32> to vector<8x8xf32>
    %131 = arith.mulf %126, %130 : vector<8x8xf32>
    %132 = arith.truncf %131 : vector<8x8xf32> to vector<8x8xbf16>
    %cst_53 = arith.constant dense<0.000000e+00> : vector<8x8xf32>
    %133 = tpu.matmul %132, %118, %cst_53 {dimension_numbers = #tpu.dot_dimension_numbers<[1], [0], [0], [1], [0, 0, 1, 1], [], []>} : vector<8x8xbf16>, vector<8x8xbf16>, vector<8x8xf32> -> vector<8x8xf32>
    %134 = tpu.concatenate %79, %97, %115, %133 in 1 : vector<8x8xf32>, vector<8x8xf32>, vector<8x8xf32>, vector<8x8xf32> -> vector<8x32xf32>
    %135 = arith.truncf %134 : vector<8x32xf32> to vector<8x32xbf16>
    %cst_54 = arith.constant dense<0.000000e+00> : vector<8x32xf32>
    %136 = tpu.matmul %135, %59, %cst_54 {dimension_numbers = #tpu.dot_dimension_numbers<[1], [0], [0], [1], [0, 0, 1, 1], [], []>} : vector<8x32xbf16>, vector<32x32xbf16>, vector<8x32xf32> -> vector<8x32xf32>
    %137 = vector.broadcast %61 : vector<1x32xf32> to vector<8x32xf32>
    %138 = arith.addf %136, %137 : vector<8x32xf32>
    %139 = arith.addf %45, %138 : vector<8x32xf32>
    %c0_55 = arith.constant 0 : index
    %c0_56 = arith.constant 0 : index
    %c0_57 = arith.constant 0 : index
    %140 = vector.load %arg15[%c0_55, %c0_56, %c0_57] : memref<2x1x32xf32, #tpu.memory_space<vmem>>, vector<1x1x32xf32>
    %141 = vector.shape_cast %140 : vector<1x1x32xf32> to vector<1x32xf32>
    %c0_58 = arith.constant 0 : index
    %c0_59 = arith.constant 0 : index
    %c0_60 = arith.constant 0 : index
    %142 = vector.load %arg16[%c0_58, %c0_59, %c0_60] : memref<2x1x32xf32, #tpu.memory_space<vmem>>, vector<1x1x32xf32>
    %143 = vector.shape_cast %142 : vector<1x1x32xf32> to vector<1x32xf32>
    %cst_61 = arith.constant dense<0.000000e+00> : vector<8xf32>
    %144 = vector.multi_reduction <add>, %139, %cst_61 [1] : vector<8x32xf32> to vector<8xf32>
    %145 = vector.shape_cast %144 : vector<8xf32> to vector<8x1xf32>
    %cst_62 = arith.constant 3.200000e+01 : f32
    %146 = vector.broadcast %cst_62 : f32 to vector<8x1xf32>
    %147 = arith.divf %145, %146 : vector<8x1xf32>
    %148 = vector.broadcast %147 : vector<8x1xf32> to vector<8x32xf32>
    %149 = arith.subf %139, %148 : vector<8x32xf32>
    %150 = arith.mulf %149, %149 : vector<8x32xf32>
    %cst_63 = arith.constant dense<0.000000e+00> : vector<8xf32>
    %151 = vector.multi_reduction <add>, %150, %cst_63 [1] : vector<8x32xf32> to vector<8xf32>
    %152 = vector.shape_cast %151 : vector<8xf32> to vector<8x1xf32>
    %cst_64 = arith.constant 3.200000e+01 : f32
    %153 = vector.broadcast %cst_64 : f32 to vector<8x1xf32>
    %154 = arith.divf %152, %153 : vector<8x1xf32>
    %cst_65 = arith.constant 9.99999997E-7 : f32
    %155 = vector.broadcast %cst_65 : f32 to vector<8x1xf32>
    %156 = arith.addf %154, %155 : vector<8x1xf32>
    %157 = math.rsqrt %156 : vector<8x1xf32>
    %158 = vector.broadcast %157 : vector<8x1xf32> to vector<8x32xf32>
    %159 = arith.mulf %149, %158 : vector<8x32xf32>
    %160 = vector.broadcast %141 : vector<1x32xf32> to vector<8x32xf32>
    %161 = arith.mulf %159, %160 : vector<8x32xf32>
    %162 = vector.broadcast %143 : vector<1x32xf32> to vector<8x32xf32>
    %163 = arith.addf %161, %162 : vector<8x32xf32>
    %164 = arith.truncf %163 : vector<8x32xf32> to vector<8x32xbf16>
    %c0_66 = arith.constant 0 : index
    %c0_67 = arith.constant 0 : index
    %c0_68 = arith.constant 0 : index
    %165 = vector.load %arg17[%c0_66, %c0_67, %c0_68] : memref<2x32x64xbf16, #tpu.memory_space<vmem>>, vector<1x32x64xbf16>
    %166 = vector.shape_cast %165 : vector<1x32x64xbf16> to vector<32x64xbf16>
    %cst_69 = arith.constant dense<0.000000e+00> : vector<8x64xf32>
    %167 = tpu.matmul %164, %166, %cst_69 {dimension_numbers = #tpu.dot_dimension_numbers<[1], [0], [0], [1], [0, 0, 1, 1], [], []>} : vector<8x32xbf16>, vector<32x64xbf16>, vector<8x64xf32> -> vector<8x64xf32>
    %c0_70 = arith.constant 0 : index
    %c0_71 = arith.constant 0 : index
    %c0_72 = arith.constant 0 : index
    %168 = vector.load %arg18[%c0_70, %c0_71, %c0_72] : memref<2x1x64xf32, #tpu.memory_space<vmem>>, vector<1x1x64xf32>
    %169 = vector.shape_cast %168 : vector<1x1x64xf32> to vector<1x64xf32>
    %170 = vector.broadcast %169 : vector<1x64xf32> to vector<8x64xf32>
    %171 = arith.addf %167, %170 : vector<8x64xf32>
    %cst_73 = arith.constant 0.000000e+00 : f32
    %172 = vector.broadcast %cst_73 : f32 to vector<8x64xf32>
    %173 = arith.maximumf %171, %172 : vector<8x64xf32>
    %174 = arith.truncf %173 : vector<8x64xf32> to vector<8x64xbf16>
    %c0_74 = arith.constant 0 : index
    %c0_75 = arith.constant 0 : index
    %c0_76 = arith.constant 0 : index
    %175 = vector.load %arg19[%c0_74, %c0_75, %c0_76] : memref<2x64x32xbf16, #tpu.memory_space<vmem>>, vector<1x64x32xbf16>
    %176 = vector.shape_cast %175 : vector<1x64x32xbf16> to vector<64x32xbf16>
    %cst_77 = arith.constant dense<0.000000e+00> : vector<8x32xf32>
    %177 = tpu.matmul %174, %176, %cst_77 {dimension_numbers = #tpu.dot_dimension_numbers<[1], [0], [0], [1], [0, 0, 1, 1], [], []>} : vector<8x64xbf16>, vector<64x32xbf16>, vector<8x32xf32> -> vector<8x32xf32>
    %c0_78 = arith.constant 0 : index
    %c0_79 = arith.constant 0 : index
    %c0_80 = arith.constant 0 : index
    %178 = vector.load %arg20[%c0_78, %c0_79, %c0_80] : memref<2x1x32xf32, #tpu.memory_space<vmem>>, vector<1x1x32xf32>
    %179 = vector.shape_cast %178 : vector<1x1x32xf32> to vector<1x32xf32>
    %180 = vector.broadcast %179 : vector<1x32xf32> to vector<8x32xf32>
    %181 = arith.addf %177, %180 : vector<8x32xf32>
    %182 = arith.addf %163, %181 : vector<8x32xf32>
    %c0_81 = arith.constant 0 : index
    %c0_82 = arith.constant 0 : index
    %c0_83 = arith.constant 0 : index
    %183 = vector.load %arg21[%c0_81, %c0_82, %c0_83] : memref<2x1x32xf32, #tpu.memory_space<vmem>>, vector<1x1x32xf32>
    %184 = vector.shape_cast %183 : vector<1x1x32xf32> to vector<1x32xf32>
    %c0_84 = arith.constant 0 : index
    %c0_85 = arith.constant 0 : index
    %c0_86 = arith.constant 0 : index
    %185 = vector.load %arg22[%c0_84, %c0_85, %c0_86] : memref<2x1x32xf32, #tpu.memory_space<vmem>>, vector<1x1x32xf32>
    %186 = vector.shape_cast %185 : vector<1x1x32xf32> to vector<1x32xf32>
    %cst_87 = arith.constant dense<0.000000e+00> : vector<8xf32>
    %187 = vector.multi_reduction <add>, %182, %cst_87 [1] : vector<8x32xf32> to vector<8xf32>
    %188 = vector.shape_cast %187 : vector<8xf32> to vector<8x1xf32>
    %cst_88 = arith.constant 3.200000e+01 : f32
    %189 = vector.broadcast %cst_88 : f32 to vector<8x1xf32>
    %190 = arith.divf %188, %189 : vector<8x1xf32>
    %191 = vector.broadcast %190 : vector<8x1xf32> to vector<8x32xf32>
    %192 = arith.subf %182, %191 : vector<8x32xf32>
    %193 = arith.mulf %192, %192 : vector<8x32xf32>
    %cst_89 = arith.constant dense<0.000000e+00> : vector<8xf32>
    %194 = vector.multi_reduction <add>, %193, %cst_89 [1] : vector<8x32xf32> to vector<8xf32>
    %195 = vector.shape_cast %194 : vector<8xf32> to vector<8x1xf32>
    %cst_90 = arith.constant 3.200000e+01 : f32
    %196 = vector.broadcast %cst_90 : f32 to vector<8x1xf32>
    %197 = arith.divf %195, %196 : vector<8x1xf32>
    %cst_91 = arith.constant 9.99999997E-7 : f32
    %198 = vector.broadcast %cst_91 : f32 to vector<8x1xf32>
    %199 = arith.addf %197, %198 : vector<8x1xf32>
    %200 = math.rsqrt %199 : vector<8x1xf32>
    %201 = vector.broadcast %200 : vector<8x1xf32> to vector<8x32xf32>
    %202 = arith.mulf %192, %201 : vector<8x32xf32>
    %203 = vector.broadcast %184 : vector<1x32xf32> to vector<8x32xf32>
    %204 = arith.mulf %202, %203 : vector<8x32xf32>
    %205 = vector.broadcast %186 : vector<1x32xf32> to vector<8x32xf32>
    %206 = arith.addf %204, %205 : vector<8x32xf32>
    %207 = arith.truncf %206 : vector<8x32xf32> to vector<8x32xbf16>
    %c1 = arith.constant 1 : index
    %c0_92 = arith.constant 0 : index
    %c0_93 = arith.constant 0 : index
    %208 = vector.load %arg11[%c1, %c0_92, %c0_93] : memref<2x32x96xbf16, #tpu.memory_space<vmem>>, vector<1x32x96xbf16>
    %209 = vector.shape_cast %208 : vector<1x32x96xbf16> to vector<32x96xbf16>
    %cst_94 = arith.constant dense<0.000000e+00> : vector<8x96xf32>
    %210 = tpu.matmul %207, %209, %cst_94 {dimension_numbers = #tpu.dot_dimension_numbers<[1], [0], [0], [1], [0, 0, 1, 1], [], []>} : vector<8x32xbf16>, vector<32x96xbf16>, vector<8x96xf32> -> vector<8x96xf32>
    %c1_95 = arith.constant 1 : index
    %c0_96 = arith.constant 0 : index
    %c0_97 = arith.constant 0 : index
    %211 = vector.load %arg12[%c1_95, %c0_96, %c0_97] : memref<2x1x96xf32, #tpu.memory_space<vmem>>, vector<1x1x96xf32>
    %212 = vector.shape_cast %211 : vector<1x1x96xf32> to vector<1x96xf32>
    %213 = vector.broadcast %212 : vector<1x96xf32> to vector<8x96xf32>
    %214 = arith.addf %210, %213 : vector<8x96xf32>
    %215 = arith.truncf %214 : vector<8x96xf32> to vector<8x96xbf16>
    %216 = vector.extract_strided_slice %215 {offsets = [0, 0], sizes = [8, 32], strides = [1, 1]} : vector<8x96xbf16> to vector<8x32xbf16>
    %217 = vector.extract_strided_slice %215 {offsets = [0, 32], sizes = [8, 32], strides = [1, 1]} : vector<8x96xbf16> to vector<8x32xbf16>
    %218 = vector.extract_strided_slice %215 {offsets = [0, 64], sizes = [8, 32], strides = [1, 1]} : vector<8x96xbf16> to vector<8x32xbf16>
    %c1_98 = arith.constant 1 : index
    %c0_99 = arith.constant 0 : index
    %c0_100 = arith.constant 0 : index
    %219 = vector.load %arg13[%c1_98, %c0_99, %c0_100] : memref<2x32x32xbf16, #tpu.memory_space<vmem>>, vector<1x32x32xbf16>
    %220 = vector.shape_cast %219 : vector<1x32x32xbf16> to vector<32x32xbf16>
    %c1_101 = arith.constant 1 : index
    %c0_102 = arith.constant 0 : index
    %c0_103 = arith.constant 0 : index
    %221 = vector.load %arg14[%c1_101, %c0_102, %c0_103] : memref<2x1x32xf32, #tpu.memory_space<vmem>>, vector<1x1x32xf32>
    %222 = vector.shape_cast %221 : vector<1x1x32xf32> to vector<1x32xf32>
    %223 = vector.extract_strided_slice %216 {offsets = [0, 0], sizes = [8, 8], strides = [1, 1]} : vector<8x32xbf16> to vector<8x8xbf16>
    %224 = vector.extract_strided_slice %217 {offsets = [0, 0], sizes = [8, 8], strides = [1, 1]} : vector<8x32xbf16> to vector<8x8xbf16>
    %225 = vector.extract_strided_slice %218 {offsets = [0, 0], sizes = [8, 8], strides = [1, 1]} : vector<8x32xbf16> to vector<8x8xbf16>
    %cst_104 = arith.constant dense<0.000000e+00> : vector<8x8xf32>
    %226 = tpu.matmul %223, %224, %cst_104 {dimension_numbers = #tpu.dot_dimension_numbers<[1], [1], [0], [0], [0, 0, 1, 0], [], []>} : vector<8x8xbf16>, vector<8x8xbf16>, vector<8x8xf32> -> vector<8x8xf32>
    %cst_105 = arith.constant -1.000000e+09 : f32
    %227 = vector.broadcast %cst_105 : f32 to vector<8x8xf32>
    %228 = arith.select %9, %226, %227 : vector<8x8xi1>, vector<8x8xf32>
    %cst_106 = arith.constant dense<0xFF800000> : vector<8xf32>
    %229 = vector.multi_reduction <maximumf>, %228, %cst_106 [1] : vector<8x8xf32> to vector<8xf32>
    %230 = vector.shape_cast %229 : vector<8xf32> to vector<8x1xf32>
    %231 = vector.broadcast %230 : vector<8x1xf32> to vector<8x8xf32>
    %232 = arith.subf %228, %231 : vector<8x8xf32>
    %233 = math.exp %232 : vector<8x8xf32>
    %cst_107 = arith.constant dense<0.000000e+00> : vector<8xf32>
    %234 = vector.multi_reduction <add>, %233, %cst_107 [1] : vector<8x8xf32> to vector<8xf32>
    %235 = vector.shape_cast %234 : vector<8xf32> to vector<8x1xf32>
    %236 = tpu.reciprocal %235 {approx = true} : vector<8x1xf32> -> vector<8x1xf32>
    %237 = vector.broadcast %236 : vector<8x1xf32> to vector<8x8xf32>
    %238 = arith.mulf %233, %237 : vector<8x8xf32>
    %239 = arith.truncf %238 : vector<8x8xf32> to vector<8x8xbf16>
    %cst_108 = arith.constant dense<0.000000e+00> : vector<8x8xf32>
    %240 = tpu.matmul %239, %225, %cst_108 {dimension_numbers = #tpu.dot_dimension_numbers<[1], [0], [0], [1], [0, 0, 1, 1], [], []>} : vector<8x8xbf16>, vector<8x8xbf16>, vector<8x8xf32> -> vector<8x8xf32>
    %241 = vector.extract_strided_slice %216 {offsets = [0, 8], sizes = [8, 8], strides = [1, 1]} : vector<8x32xbf16> to vector<8x8xbf16>
    %242 = vector.extract_strided_slice %217 {offsets = [0, 8], sizes = [8, 8], strides = [1, 1]} : vector<8x32xbf16> to vector<8x8xbf16>
    %243 = vector.extract_strided_slice %218 {offsets = [0, 8], sizes = [8, 8], strides = [1, 1]} : vector<8x32xbf16> to vector<8x8xbf16>
    %cst_109 = arith.constant dense<0.000000e+00> : vector<8x8xf32>
    %244 = tpu.matmul %241, %242, %cst_109 {dimension_numbers = #tpu.dot_dimension_numbers<[1], [1], [0], [0], [0, 0, 1, 0], [], []>} : vector<8x8xbf16>, vector<8x8xbf16>, vector<8x8xf32> -> vector<8x8xf32>
    %cst_110 = arith.constant -1.000000e+09 : f32
    %245 = vector.broadcast %cst_110 : f32 to vector<8x8xf32>
    %246 = arith.select %9, %244, %245 : vector<8x8xi1>, vector<8x8xf32>
    %cst_111 = arith.constant dense<0xFF800000> : vector<8xf32>
    %247 = vector.multi_reduction <maximumf>, %246, %cst_111 [1] : vector<8x8xf32> to vector<8xf32>
    %248 = vector.shape_cast %247 : vector<8xf32> to vector<8x1xf32>
    %249 = vector.broadcast %248 : vector<8x1xf32> to vector<8x8xf32>
    %250 = arith.subf %246, %249 : vector<8x8xf32>
    %251 = math.exp %250 : vector<8x8xf32>
    %cst_112 = arith.constant dense<0.000000e+00> : vector<8xf32>
    %252 = vector.multi_reduction <add>, %251, %cst_112 [1] : vector<8x8xf32> to vector<8xf32>
    %253 = vector.shape_cast %252 : vector<8xf32> to vector<8x1xf32>
    %254 = tpu.reciprocal %253 {approx = true} : vector<8x1xf32> -> vector<8x1xf32>
    %255 = vector.broadcast %254 : vector<8x1xf32> to vector<8x8xf32>
    %256 = arith.mulf %251, %255 : vector<8x8xf32>
    %257 = arith.truncf %256 : vector<8x8xf32> to vector<8x8xbf16>
    %cst_113 = arith.constant dense<0.000000e+00> : vector<8x8xf32>
    %258 = tpu.matmul %257, %243, %cst_113 {dimension_numbers = #tpu.dot_dimension_numbers<[1], [0], [0], [1], [0, 0, 1, 1], [], []>} : vector<8x8xbf16>, vector<8x8xbf16>, vector<8x8xf32> -> vector<8x8xf32>
    %259 = vector.extract_strided_slice %216 {offsets = [0, 16], sizes = [8, 8], strides = [1, 1]} : vector<8x32xbf16> to vector<8x8xbf16>
    %260 = vector.extract_strided_slice %217 {offsets = [0, 16], sizes = [8, 8], strides = [1, 1]} : vector<8x32xbf16> to vector<8x8xbf16>
    %261 = vector.extract_strided_slice %218 {offsets = [0, 16], sizes = [8, 8], strides = [1, 1]} : vector<8x32xbf16> to vector<8x8xbf16>
    %cst_114 = arith.constant dense<0.000000e+00> : vector<8x8xf32>
    %262 = tpu.matmul %259, %260, %cst_114 {dimension_numbers = #tpu.dot_dimension_numbers<[1], [1], [0], [0], [0, 0, 1, 0], [], []>} : vector<8x8xbf16>, vector<8x8xbf16>, vector<8x8xf32> -> vector<8x8xf32>
    %cst_115 = arith.constant -1.000000e+09 : f32
    %263 = vector.broadcast %cst_115 : f32 to vector<8x8xf32>
    %264 = arith.select %9, %262, %263 : vector<8x8xi1>, vector<8x8xf32>
    %cst_116 = arith.constant dense<0xFF800000> : vector<8xf32>
    %265 = vector.multi_reduction <maximumf>, %264, %cst_116 [1] : vector<8x8xf32> to vector<8xf32>
    %266 = vector.shape_cast %265 : vector<8xf32> to vector<8x1xf32>
    %267 = vector.broadcast %266 : vector<8x1xf32> to vector<8x8xf32>
    %268 = arith.subf %264, %267 : vector<8x8xf32>
    %269 = math.exp %268 : vector<8x8xf32>
    %cst_117 = arith.constant dense<0.000000e+00> : vector<8xf32>
    %270 = vector.multi_reduction <add>, %269, %cst_117 [1] : vector<8x8xf32> to vector<8xf32>
    %271 = vector.shape_cast %270 : vector<8xf32> to vector<8x1xf32>
    %272 = tpu.reciprocal %271 {approx = true} : vector<8x1xf32> -> vector<8x1xf32>
    %273 = vector.broadcast %272 : vector<8x1xf32> to vector<8x8xf32>
    %274 = arith.mulf %269, %273 : vector<8x8xf32>
    %275 = arith.truncf %274 : vector<8x8xf32> to vector<8x8xbf16>
    %cst_118 = arith.constant dense<0.000000e+00> : vector<8x8xf32>
    %276 = tpu.matmul %275, %261, %cst_118 {dimension_numbers = #tpu.dot_dimension_numbers<[1], [0], [0], [1], [0, 0, 1, 1], [], []>} : vector<8x8xbf16>, vector<8x8xbf16>, vector<8x8xf32> -> vector<8x8xf32>
    %277 = vector.extract_strided_slice %216 {offsets = [0, 24], sizes = [8, 8], strides = [1, 1]} : vector<8x32xbf16> to vector<8x8xbf16>
    %278 = vector.extract_strided_slice %217 {offsets = [0, 24], sizes = [8, 8], strides = [1, 1]} : vector<8x32xbf16> to vector<8x8xbf16>
    %279 = vector.extract_strided_slice %218 {offsets = [0, 24], sizes = [8, 8], strides = [1, 1]} : vector<8x32xbf16> to vector<8x8xbf16>
    %cst_119 = arith.constant dense<0.000000e+00> : vector<8x8xf32>
    %280 = tpu.matmul %277, %278, %cst_119 {dimension_numbers = #tpu.dot_dimension_numbers<[1], [1], [0], [0], [0, 0, 1, 0], [], []>} : vector<8x8xbf16>, vector<8x8xbf16>, vector<8x8xf32> -> vector<8x8xf32>
    %cst_120 = arith.constant -1.000000e+09 : f32
    %281 = vector.broadcast %cst_120 : f32 to vector<8x8xf32>
    %282 = arith.select %9, %280, %281 : vector<8x8xi1>, vector<8x8xf32>
    %cst_121 = arith.constant dense<0xFF800000> : vector<8xf32>
    %283 = vector.multi_reduction <maximumf>, %282, %cst_121 [1] : vector<8x8xf32> to vector<8xf32>
    %284 = vector.shape_cast %283 : vector<8xf32> to vector<8x1xf32>
    %285 = vector.broadcast %284 : vector<8x1xf32> to vector<8x8xf32>
    %286 = arith.subf %282, %285 : vector<8x8xf32>
    %287 = math.exp %286 : vector<8x8xf32>
    %cst_122 = arith.constant dense<0.000000e+00> : vector<8xf32>
    %288 = vector.multi_reduction <add>, %287, %cst_122 [1] : vector<8x8xf32> to vector<8xf32>
    %289 = vector.shape_cast %288 : vector<8xf32> to vector<8x1xf32>
    %290 = tpu.reciprocal %289 {approx = true} : vector<8x1xf32> -> vector<8x1xf32>
    %291 = vector.broadcast %290 : vector<8x1xf32> to vector<8x8xf32>
    %292 = arith.mulf %287, %291 : vector<8x8xf32>
    %293 = arith.truncf %292 : vector<8x8xf32> to vector<8x8xbf16>
    %cst_123 = arith.constant dense<0.000000e+00> : vector<8x8xf32>
    %294 = tpu.matmul %293, %279, %cst_123 {dimension_numbers = #tpu.dot_dimension_numbers<[1], [0], [0], [1], [0, 0, 1, 1], [], []>} : vector<8x8xbf16>, vector<8x8xbf16>, vector<8x8xf32> -> vector<8x8xf32>
    %295 = tpu.concatenate %240, %258, %276, %294 in 1 : vector<8x8xf32>, vector<8x8xf32>, vector<8x8xf32>, vector<8x8xf32> -> vector<8x32xf32>
    %296 = arith.truncf %295 : vector<8x32xf32> to vector<8x32xbf16>
    %cst_124 = arith.constant dense<0.000000e+00> : vector<8x32xf32>
    %297 = tpu.matmul %296, %220, %cst_124 {dimension_numbers = #tpu.dot_dimension_numbers<[1], [0], [0], [1], [0, 0, 1, 1], [], []>} : vector<8x32xbf16>, vector<32x32xbf16>, vector<8x32xf32> -> vector<8x32xf32>
    %298 = vector.broadcast %222 : vector<1x32xf32> to vector<8x32xf32>
    %299 = arith.addf %297, %298 : vector<8x32xf32>
    %300 = arith.addf %206, %299 : vector<8x32xf32>
    %c1_125 = arith.constant 1 : index
    %c0_126 = arith.constant 0 : index
    %c0_127 = arith.constant 0 : index
    %301 = vector.load %arg15[%c1_125, %c0_126, %c0_127] : memref<2x1x32xf32, #tpu.memory_space<vmem>>, vector<1x1x32xf32>
    %302 = vector.shape_cast %301 : vector<1x1x32xf32> to vector<1x32xf32>
    %c1_128 = arith.constant 1 : index
    %c0_129 = arith.constant 0 : index
    %c0_130 = arith.constant 0 : index
    %303 = vector.load %arg16[%c1_128, %c0_129, %c0_130] : memref<2x1x32xf32, #tpu.memory_space<vmem>>, vector<1x1x32xf32>
    %304 = vector.shape_cast %303 : vector<1x1x32xf32> to vector<1x32xf32>
    %cst_131 = arith.constant dense<0.000000e+00> : vector<8xf32>
    %305 = vector.multi_reduction <add>, %300, %cst_131 [1] : vector<8x32xf32> to vector<8xf32>
    %306 = vector.shape_cast %305 : vector<8xf32> to vector<8x1xf32>
    %cst_132 = arith.constant 3.200000e+01 : f32
    %307 = vector.broadcast %cst_132 : f32 to vector<8x1xf32>
    %308 = arith.divf %306, %307 : vector<8x1xf32>
    %309 = vector.broadcast %308 : vector<8x1xf32> to vector<8x32xf32>
    %310 = arith.subf %300, %309 : vector<8x32xf32>
    %311 = arith.mulf %310, %310 : vector<8x32xf32>
    %cst_133 = arith.constant dense<0.000000e+00> : vector<8xf32>
    %312 = vector.multi_reduction <add>, %311, %cst_133 [1] : vector<8x32xf32> to vector<8xf32>
    %313 = vector.shape_cast %312 : vector<8xf32> to vector<8x1xf32>
    %cst_134 = arith.constant 3.200000e+01 : f32
    %314 = vector.broadcast %cst_134 : f32 to vector<8x1xf32>
    %315 = arith.divf %313, %314 : vector<8x1xf32>
    %cst_135 = arith.constant 9.99999997E-7 : f32
    %316 = vector.broadcast %cst_135 : f32 to vector<8x1xf32>
    %317 = arith.addf %315, %316 : vector<8x1xf32>
    %318 = math.rsqrt %317 : vector<8x1xf32>
    %319 = vector.broadcast %318 : vector<8x1xf32> to vector<8x32xf32>
    %320 = arith.mulf %310, %319 : vector<8x32xf32>
    %321 = vector.broadcast %302 : vector<1x32xf32> to vector<8x32xf32>
    %322 = arith.mulf %320, %321 : vector<8x32xf32>
    %323 = vector.broadcast %304 : vector<1x32xf32> to vector<8x32xf32>
    %324 = arith.addf %322, %323 : vector<8x32xf32>
    %325 = arith.truncf %324 : vector<8x32xf32> to vector<8x32xbf16>
    %c1_136 = arith.constant 1 : index
    %c0_137 = arith.constant 0 : index
    %c0_138 = arith.constant 0 : index
    %326 = vector.load %arg17[%c1_136, %c0_137, %c0_138] : memref<2x32x64xbf16, #tpu.memory_space<vmem>>, vector<1x32x64xbf16>
    %327 = vector.shape_cast %326 : vector<1x32x64xbf16> to vector<32x64xbf16>
    %cst_139 = arith.constant dense<0.000000e+00> : vector<8x64xf32>
    %328 = tpu.matmul %325, %327, %cst_139 {dimension_numbers = #tpu.dot_dimension_numbers<[1], [0], [0], [1], [0, 0, 1, 1], [], []>} : vector<8x32xbf16>, vector<32x64xbf16>, vector<8x64xf32> -> vector<8x64xf32>
    %c1_140 = arith.constant 1 : index
    %c0_141 = arith.constant 0 : index
    %c0_142 = arith.constant 0 : index
    %329 = vector.load %arg18[%c1_140, %c0_141, %c0_142] : memref<2x1x64xf32, #tpu.memory_space<vmem>>, vector<1x1x64xf32>
    %330 = vector.shape_cast %329 : vector<1x1x64xf32> to vector<1x64xf32>
    %331 = vector.broadcast %330 : vector<1x64xf32> to vector<8x64xf32>
    %332 = arith.addf %328, %331 : vector<8x64xf32>
    %cst_143 = arith.constant 0.000000e+00 : f32
    %333 = vector.broadcast %cst_143 : f32 to vector<8x64xf32>
    %334 = arith.maximumf %332, %333 : vector<8x64xf32>
    %335 = arith.truncf %334 : vector<8x64xf32> to vector<8x64xbf16>
    %c1_144 = arith.constant 1 : index
    %c0_145 = arith.constant 0 : index
    %c0_146 = arith.constant 0 : index
    %336 = vector.load %arg19[%c1_144, %c0_145, %c0_146] : memref<2x64x32xbf16, #tpu.memory_space<vmem>>, vector<1x64x32xbf16>
    %337 = vector.shape_cast %336 : vector<1x64x32xbf16> to vector<64x32xbf16>
    %cst_147 = arith.constant dense<0.000000e+00> : vector<8x32xf32>
    %338 = tpu.matmul %335, %337, %cst_147 {dimension_numbers = #tpu.dot_dimension_numbers<[1], [0], [0], [1], [0, 0, 1, 1], [], []>} : vector<8x64xbf16>, vector<64x32xbf16>, vector<8x32xf32> -> vector<8x32xf32>
    %c1_148 = arith.constant 1 : index
    %c0_149 = arith.constant 0 : index
    %c0_150 = arith.constant 0 : index
    %339 = vector.load %arg20[%c1_148, %c0_149, %c0_150] : memref<2x1x32xf32, #tpu.memory_space<vmem>>, vector<1x1x32xf32>
    %340 = vector.shape_cast %339 : vector<1x1x32xf32> to vector<1x32xf32>
    %341 = vector.broadcast %340 : vector<1x32xf32> to vector<8x32xf32>
    %342 = arith.addf %338, %341 : vector<8x32xf32>
    %343 = arith.addf %324, %342 : vector<8x32xf32>
    %c1_151 = arith.constant 1 : index
    %c0_152 = arith.constant 0 : index
    %c0_153 = arith.constant 0 : index
    %344 = vector.load %arg21[%c1_151, %c0_152, %c0_153] : memref<2x1x32xf32, #tpu.memory_space<vmem>>, vector<1x1x32xf32>
    %345 = vector.shape_cast %344 : vector<1x1x32xf32> to vector<1x32xf32>
    %c1_154 = arith.constant 1 : index
    %c0_155 = arith.constant 0 : index
    %c0_156 = arith.constant 0 : index
    %346 = vector.load %arg22[%c1_154, %c0_155, %c0_156] : memref<2x1x32xf32, #tpu.memory_space<vmem>>, vector<1x1x32xf32>
    %347 = vector.shape_cast %346 : vector<1x1x32xf32> to vector<1x32xf32>
    %cst_157 = arith.constant dense<0.000000e+00> : vector<8xf32>
    %348 = vector.multi_reduction <add>, %343, %cst_157 [1] : vector<8x32xf32> to vector<8xf32>
    %349 = vector.shape_cast %348 : vector<8xf32> to vector<8x1xf32>
    %cst_158 = arith.constant 3.200000e+01 : f32
    %350 = vector.broadcast %cst_158 : f32 to vector<8x1xf32>
    %351 = arith.divf %349, %350 : vector<8x1xf32>
    %352 = vector.broadcast %351 : vector<8x1xf32> to vector<8x32xf32>
    %353 = arith.subf %343, %352 : vector<8x32xf32>
    %354 = arith.mulf %353, %353 : vector<8x32xf32>
    %cst_159 = arith.constant dense<0.000000e+00> : vector<8xf32>
    %355 = vector.multi_reduction <add>, %354, %cst_159 [1] : vector<8x32xf32> to vector<8xf32>
    %356 = vector.shape_cast %355 : vector<8xf32> to vector<8x1xf32>
    %cst_160 = arith.constant 3.200000e+01 : f32
    %357 = vector.broadcast %cst_160 : f32 to vector<8x1xf32>
    %358 = arith.divf %356, %357 : vector<8x1xf32>
    %cst_161 = arith.constant 9.99999997E-7 : f32
    %359 = vector.broadcast %cst_161 : f32 to vector<8x1xf32>
    %360 = arith.addf %358, %359 : vector<8x1xf32>
    %361 = math.rsqrt %360 : vector<8x1xf32>
    %362 = vector.broadcast %361 : vector<8x1xf32> to vector<8x32xf32>
    %363 = arith.mulf %353, %362 : vector<8x32xf32>
    %364 = vector.broadcast %345 : vector<1x32xf32> to vector<8x32xf32>
    %365 = arith.mulf %363, %364 : vector<8x32xf32>
    %366 = vector.broadcast %347 : vector<1x32xf32> to vector<8x32xf32>
    %367 = arith.addf %365, %366 : vector<8x32xf32>
    %368 = arith.truncf %367 : vector<8x32xf32> to vector<8x32xbf16>
    %c0_162 = arith.constant 0 : index
    %c0_163 = arith.constant 0 : index
    %c0_164 = arith.constant 0 : index
    %369 = vector.load %arg2[%c0_162, %c0_163, %c0_164] : memref<1x8x32xf32, #tpu.memory_space<vmem>>, vector<1x8x32xf32>
    %370 = vector.shape_cast %369 : vector<1x8x32xf32> to vector<8x32xf32>
    %cst_165 = arith.constant 2.000000e+00 : f32
    %371 = vector.broadcast %cst_165 : f32 to vector<8x32xf32>
    %372 = arith.mulf %371, %370 : vector<8x32xf32>
    %c0_166 = arith.constant 0 : index
    %c0_167 = arith.constant 0 : index
    %373 = vector.load %arg6[%c0_166, %c0_167] : memref<8x32xf32, #tpu.memory_space<vmem>>, vector<8x32xf32>
    %374 = arith.addf %372, %373 : vector<8x32xf32>
    %c0_168 = arith.constant 0 : index
    %c0_169 = arith.constant 0 : index
    %375 = vector.load %arg9[%c0_168, %c0_169] : memref<1x32xf32, #tpu.memory_space<vmem>>, vector<1x32xf32>
    %c0_170 = arith.constant 0 : index
    %c0_171 = arith.constant 0 : index
    %376 = vector.load %arg10[%c0_170, %c0_171] : memref<1x32xf32, #tpu.memory_space<vmem>>, vector<1x32xf32>
    %cst_172 = arith.constant dense<0.000000e+00> : vector<8xf32>
    %377 = vector.multi_reduction <add>, %374, %cst_172 [1] : vector<8x32xf32> to vector<8xf32>
    %378 = vector.shape_cast %377 : vector<8xf32> to vector<8x1xf32>
    %cst_173 = arith.constant 3.200000e+01 : f32
    %379 = vector.broadcast %cst_173 : f32 to vector<8x1xf32>
    %380 = arith.divf %378, %379 : vector<8x1xf32>
    %381 = vector.broadcast %380 : vector<8x1xf32> to vector<8x32xf32>
    %382 = arith.subf %374, %381 : vector<8x32xf32>
    %383 = arith.mulf %382, %382 : vector<8x32xf32>
    %cst_174 = arith.constant dense<0.000000e+00> : vector<8xf32>
    %384 = vector.multi_reduction <add>, %383, %cst_174 [1] : vector<8x32xf32> to vector<8xf32>
    %385 = vector.shape_cast %384 : vector<8xf32> to vector<8x1xf32>
    %cst_175 = arith.constant 3.200000e+01 : f32
    %386 = vector.broadcast %cst_175 : f32 to vector<8x1xf32>
    %387 = arith.divf %385, %386 : vector<8x1xf32>
    %cst_176 = arith.constant 9.99999997E-7 : f32
    %388 = vector.broadcast %cst_176 : f32 to vector<8x1xf32>
    %389 = arith.addf %387, %388 : vector<8x1xf32>
    %390 = math.rsqrt %389 : vector<8x1xf32>
    %391 = vector.broadcast %390 : vector<8x1xf32> to vector<8x32xf32>
    %392 = arith.mulf %382, %391 : vector<8x32xf32>
    %393 = vector.broadcast %375 : vector<1x32xf32> to vector<8x32xf32>
    %394 = arith.mulf %392, %393 : vector<8x32xf32>
    %395 = vector.broadcast %376 : vector<1x32xf32> to vector<8x32xf32>
    %396 = arith.addf %394, %395 : vector<8x32xf32>
    %397 = arith.truncf %396 : vector<8x32xf32> to vector<8x32xbf16>
    %c0_177 = arith.constant 0 : index
    %c0_178 = arith.constant 0 : index
    %c0_179 = arith.constant 0 : index
    %398 = vector.load %arg23[%c0_177, %c0_178, %c0_179] : memref<2x32x96xbf16, #tpu.memory_space<vmem>>, vector<1x32x96xbf16>
    %399 = vector.shape_cast %398 : vector<1x32x96xbf16> to vector<32x96xbf16>
    %cst_180 = arith.constant dense<0.000000e+00> : vector<8x96xf32>
    %400 = tpu.matmul %397, %399, %cst_180 {dimension_numbers = #tpu.dot_dimension_numbers<[1], [0], [0], [1], [0, 0, 1, 1], [], []>} : vector<8x32xbf16>, vector<32x96xbf16>, vector<8x96xf32> -> vector<8x96xf32>
    %c0_181 = arith.constant 0 : index
    %c0_182 = arith.constant 0 : index
    %c0_183 = arith.constant 0 : index
    %401 = vector.load %arg24[%c0_181, %c0_182, %c0_183] : memref<2x1x96xf32, #tpu.memory_space<vmem>>, vector<1x1x96xf32>
    %402 = vector.shape_cast %401 : vector<1x1x96xf32> to vector<1x96xf32>
    %403 = vector.broadcast %402 : vector<1x96xf32> to vector<8x96xf32>
    %404 = arith.addf %400, %403 : vector<8x96xf32>
    %405 = arith.truncf %404 : vector<8x96xf32> to vector<8x96xbf16>
    %406 = vector.extract_strided_slice %405 {offsets = [0, 0], sizes = [8, 32], strides = [1, 1]} : vector<8x96xbf16> to vector<8x32xbf16>
    %407 = vector.extract_strided_slice %405 {offsets = [0, 32], sizes = [8, 32], strides = [1, 1]} : vector<8x96xbf16> to vector<8x32xbf16>
    %408 = vector.extract_strided_slice %405 {offsets = [0, 64], sizes = [8, 32], strides = [1, 1]} : vector<8x96xbf16> to vector<8x32xbf16>
    %c0_184 = arith.constant 0 : index
    %c0_185 = arith.constant 0 : index
    %c0_186 = arith.constant 0 : index
    %409 = vector.load %arg25[%c0_184, %c0_185, %c0_186] : memref<2x32x32xbf16, #tpu.memory_space<vmem>>, vector<1x32x32xbf16>
    %410 = vector.shape_cast %409 : vector<1x32x32xbf16> to vector<32x32xbf16>
    %c0_187 = arith.constant 0 : index
    %c0_188 = arith.constant 0 : index
    %c0_189 = arith.constant 0 : index
    %411 = vector.load %arg26[%c0_187, %c0_188, %c0_189] : memref<2x1x32xf32, #tpu.memory_space<vmem>>, vector<1x1x32xf32>
    %412 = vector.shape_cast %411 : vector<1x1x32xf32> to vector<1x32xf32>
    %413 = vector.extract_strided_slice %406 {offsets = [0, 0], sizes = [8, 8], strides = [1, 1]} : vector<8x32xbf16> to vector<8x8xbf16>
    %414 = vector.extract_strided_slice %407 {offsets = [0, 0], sizes = [8, 8], strides = [1, 1]} : vector<8x32xbf16> to vector<8x8xbf16>
    %415 = vector.extract_strided_slice %408 {offsets = [0, 0], sizes = [8, 8], strides = [1, 1]} : vector<8x32xbf16> to vector<8x8xbf16>
    %cst_190 = arith.constant dense<0.000000e+00> : vector<8x8xf32>
    %416 = tpu.matmul %413, %414, %cst_190 {dimension_numbers = #tpu.dot_dimension_numbers<[1], [1], [0], [0], [0, 0, 1, 0], [], []>} : vector<8x8xbf16>, vector<8x8xbf16>, vector<8x8xf32> -> vector<8x8xf32>
    %cst_191 = arith.constant -1.000000e+09 : f32
    %417 = vector.broadcast %cst_191 : f32 to vector<8x8xf32>
    %418 = arith.select %17, %416, %417 : vector<8x8xi1>, vector<8x8xf32>
    %cst_192 = arith.constant dense<0xFF800000> : vector<8xf32>
    %419 = vector.multi_reduction <maximumf>, %418, %cst_192 [1] : vector<8x8xf32> to vector<8xf32>
    %420 = vector.shape_cast %419 : vector<8xf32> to vector<8x1xf32>
    %421 = vector.broadcast %420 : vector<8x1xf32> to vector<8x8xf32>
    %422 = arith.subf %418, %421 : vector<8x8xf32>
    %423 = math.exp %422 : vector<8x8xf32>
    %cst_193 = arith.constant dense<0.000000e+00> : vector<8xf32>
    %424 = vector.multi_reduction <add>, %423, %cst_193 [1] : vector<8x8xf32> to vector<8xf32>
    %425 = vector.shape_cast %424 : vector<8xf32> to vector<8x1xf32>
    %426 = tpu.reciprocal %425 {approx = true} : vector<8x1xf32> -> vector<8x1xf32>
    %427 = vector.broadcast %426 : vector<8x1xf32> to vector<8x8xf32>
    %428 = arith.mulf %423, %427 : vector<8x8xf32>
    %429 = arith.truncf %428 : vector<8x8xf32> to vector<8x8xbf16>
    %cst_194 = arith.constant dense<0.000000e+00> : vector<8x8xf32>
    %430 = tpu.matmul %429, %415, %cst_194 {dimension_numbers = #tpu.dot_dimension_numbers<[1], [0], [0], [1], [0, 0, 1, 1], [], []>} : vector<8x8xbf16>, vector<8x8xbf16>, vector<8x8xf32> -> vector<8x8xf32>
    %431 = vector.extract_strided_slice %406 {offsets = [0, 8], sizes = [8, 8], strides = [1, 1]} : vector<8x32xbf16> to vector<8x8xbf16>
    %432 = vector.extract_strided_slice %407 {offsets = [0, 8], sizes = [8, 8], strides = [1, 1]} : vector<8x32xbf16> to vector<8x8xbf16>
    %433 = vector.extract_strided_slice %408 {offsets = [0, 8], sizes = [8, 8], strides = [1, 1]} : vector<8x32xbf16> to vector<8x8xbf16>
    %cst_195 = arith.constant dense<0.000000e+00> : vector<8x8xf32>
    %434 = tpu.matmul %431, %432, %cst_195 {dimension_numbers = #tpu.dot_dimension_numbers<[1], [1], [0], [0], [0, 0, 1, 0], [], []>} : vector<8x8xbf16>, vector<8x8xbf16>, vector<8x8xf32> -> vector<8x8xf32>
    %cst_196 = arith.constant -1.000000e+09 : f32
    %435 = vector.broadcast %cst_196 : f32 to vector<8x8xf32>
    %436 = arith.select %17, %434, %435 : vector<8x8xi1>, vector<8x8xf32>
    %cst_197 = arith.constant dense<0xFF800000> : vector<8xf32>
    %437 = vector.multi_reduction <maximumf>, %436, %cst_197 [1] : vector<8x8xf32> to vector<8xf32>
    %438 = vector.shape_cast %437 : vector<8xf32> to vector<8x1xf32>
    %439 = vector.broadcast %438 : vector<8x1xf32> to vector<8x8xf32>
    %440 = arith.subf %436, %439 : vector<8x8xf32>
    %441 = math.exp %440 : vector<8x8xf32>
    %cst_198 = arith.constant dense<0.000000e+00> : vector<8xf32>
    %442 = vector.multi_reduction <add>, %441, %cst_198 [1] : vector<8x8xf32> to vector<8xf32>
    %443 = vector.shape_cast %442 : vector<8xf32> to vector<8x1xf32>
    %444 = tpu.reciprocal %443 {approx = true} : vector<8x1xf32> -> vector<8x1xf32>
    %445 = vector.broadcast %444 : vector<8x1xf32> to vector<8x8xf32>
    %446 = arith.mulf %441, %445 : vector<8x8xf32>
    %447 = arith.truncf %446 : vector<8x8xf32> to vector<8x8xbf16>
    %cst_199 = arith.constant dense<0.000000e+00> : vector<8x8xf32>
    %448 = tpu.matmul %447, %433, %cst_199 {dimension_numbers = #tpu.dot_dimension_numbers<[1], [0], [0], [1], [0, 0, 1, 1], [], []>} : vector<8x8xbf16>, vector<8x8xbf16>, vector<8x8xf32> -> vector<8x8xf32>
    %449 = vector.extract_strided_slice %406 {offsets = [0, 16], sizes = [8, 8], strides = [1, 1]} : vector<8x32xbf16> to vector<8x8xbf16>
    %450 = vector.extract_strided_slice %407 {offsets = [0, 16], sizes = [8, 8], strides = [1, 1]} : vector<8x32xbf16> to vector<8x8xbf16>
    %451 = vector.extract_strided_slice %408 {offsets = [0, 16], sizes = [8, 8], strides = [1, 1]} : vector<8x32xbf16> to vector<8x8xbf16>
    %cst_200 = arith.constant dense<0.000000e+00> : vector<8x8xf32>
    %452 = tpu.matmul %449, %450, %cst_200 {dimension_numbers = #tpu.dot_dimension_numbers<[1], [1], [0], [0], [0, 0, 1, 0], [], []>} : vector<8x8xbf16>, vector<8x8xbf16>, vector<8x8xf32> -> vector<8x8xf32>
    %cst_201 = arith.constant -1.000000e+09 : f32
    %453 = vector.broadcast %cst_201 : f32 to vector<8x8xf32>
    %454 = arith.select %17, %452, %453 : vector<8x8xi1>, vector<8x8xf32>
    %cst_202 = arith.constant dense<0xFF800000> : vector<8xf32>
    %455 = vector.multi_reduction <maximumf>, %454, %cst_202 [1] : vector<8x8xf32> to vector<8xf32>
    %456 = vector.shape_cast %455 : vector<8xf32> to vector<8x1xf32>
    %457 = vector.broadcast %456 : vector<8x1xf32> to vector<8x8xf32>
    %458 = arith.subf %454, %457 : vector<8x8xf32>
    %459 = math.exp %458 : vector<8x8xf32>
    %cst_203 = arith.constant dense<0.000000e+00> : vector<8xf32>
    %460 = vector.multi_reduction <add>, %459, %cst_203 [1] : vector<8x8xf32> to vector<8xf32>
    %461 = vector.shape_cast %460 : vector<8xf32> to vector<8x1xf32>
    %462 = tpu.reciprocal %461 {approx = true} : vector<8x1xf32> -> vector<8x1xf32>
    %463 = vector.broadcast %462 : vector<8x1xf32> to vector<8x8xf32>
    %464 = arith.mulf %459, %463 : vector<8x8xf32>
    %465 = arith.truncf %464 : vector<8x8xf32> to vector<8x8xbf16>
    %cst_204 = arith.constant dense<0.000000e+00> : vector<8x8xf32>
    %466 = tpu.matmul %465, %451, %cst_204 {dimension_numbers = #tpu.dot_dimension_numbers<[1], [0], [0], [1], [0, 0, 1, 1], [], []>} : vector<8x8xbf16>, vector<8x8xbf16>, vector<8x8xf32> -> vector<8x8xf32>
    %467 = vector.extract_strided_slice %406 {offsets = [0, 24], sizes = [8, 8], strides = [1, 1]} : vector<8x32xbf16> to vector<8x8xbf16>
    %468 = vector.extract_strided_slice %407 {offsets = [0, 24], sizes = [8, 8], strides = [1, 1]} : vector<8x32xbf16> to vector<8x8xbf16>
    %469 = vector.extract_strided_slice %408 {offsets = [0, 24], sizes = [8, 8], strides = [1, 1]} : vector<8x32xbf16> to vector<8x8xbf16>
    %cst_205 = arith.constant dense<0.000000e+00> : vector<8x8xf32>
    %470 = tpu.matmul %467, %468, %cst_205 {dimension_numbers = #tpu.dot_dimension_numbers<[1], [1], [0], [0], [0, 0, 1, 0], [], []>} : vector<8x8xbf16>, vector<8x8xbf16>, vector<8x8xf32> -> vector<8x8xf32>
    %cst_206 = arith.constant -1.000000e+09 : f32
    %471 = vector.broadcast %cst_206 : f32 to vector<8x8xf32>
    %472 = arith.select %17, %470, %471 : vector<8x8xi1>, vector<8x8xf32>
    %cst_207 = arith.constant dense<0xFF800000> : vector<8xf32>
    %473 = vector.multi_reduction <maximumf>, %472, %cst_207 [1] : vector<8x8xf32> to vector<8xf32>
    %474 = vector.shape_cast %473 : vector<8xf32> to vector<8x1xf32>
    %475 = vector.broadcast %474 : vector<8x1xf32> to vector<8x8xf32>
    %476 = arith.subf %472, %475 : vector<8x8xf32>
    %477 = math.exp %476 : vector<8x8xf32>
    %cst_208 = arith.constant dense<0.000000e+00> : vector<8xf32>
    %478 = vector.multi_reduction <add>, %477, %cst_208 [1] : vector<8x8xf32> to vector<8xf32>
    %479 = vector.shape_cast %478 : vector<8xf32> to vector<8x1xf32>
    %480 = tpu.reciprocal %479 {approx = true} : vector<8x1xf32> -> vector<8x1xf32>
    %481 = vector.broadcast %480 : vector<8x1xf32> to vector<8x8xf32>
    %482 = arith.mulf %477, %481 : vector<8x8xf32>
    %483 = arith.truncf %482 : vector<8x8xf32> to vector<8x8xbf16>
    %cst_209 = arith.constant dense<0.000000e+00> : vector<8x8xf32>
    %484 = tpu.matmul %483, %469, %cst_209 {dimension_numbers = #tpu.dot_dimension_numbers<[1], [0], [0], [1], [0, 0, 1, 1], [], []>} : vector<8x8xbf16>, vector<8x8xbf16>, vector<8x8xf32> -> vector<8x8xf32>
    %485 = tpu.concatenate %430, %448, %466, %484 in 1 : vector<8x8xf32>, vector<8x8xf32>, vector<8x8xf32>, vector<8x8xf32> -> vector<8x32xf32>
    %486 = arith.truncf %485 : vector<8x32xf32> to vector<8x32xbf16>
    %cst_210 = arith.constant dense<0.000000e+00> : vector<8x32xf32>
    %487 = tpu.matmul %486, %410, %cst_210 {dimension_numbers = #tpu.dot_dimension_numbers<[1], [0], [0], [1], [0, 0, 1, 1], [], []>} : vector<8x32xbf16>, vector<32x32xbf16>, vector<8x32xf32> -> vector<8x32xf32>
    %488 = vector.broadcast %412 : vector<1x32xf32> to vector<8x32xf32>
    %489 = arith.addf %487, %488 : vector<8x32xf32>
    %490 = arith.addf %396, %489 : vector<8x32xf32>
    %c0_211 = arith.constant 0 : index
    %c0_212 = arith.constant 0 : index
    %c0_213 = arith.constant 0 : index
    %491 = vector.load %arg27[%c0_211, %c0_212, %c0_213] : memref<2x1x32xf32, #tpu.memory_space<vmem>>, vector<1x1x32xf32>
    %492 = vector.shape_cast %491 : vector<1x1x32xf32> to vector<1x32xf32>
    %c0_214 = arith.constant 0 : index
    %c0_215 = arith.constant 0 : index
    %c0_216 = arith.constant 0 : index
    %493 = vector.load %arg28[%c0_214, %c0_215, %c0_216] : memref<2x1x32xf32, #tpu.memory_space<vmem>>, vector<1x1x32xf32>
    %494 = vector.shape_cast %493 : vector<1x1x32xf32> to vector<1x32xf32>
    %cst_217 = arith.constant dense<0.000000e+00> : vector<8xf32>
    %495 = vector.multi_reduction <add>, %490, %cst_217 [1] : vector<8x32xf32> to vector<8xf32>
    %496 = vector.shape_cast %495 : vector<8xf32> to vector<8x1xf32>
    %cst_218 = arith.constant 3.200000e+01 : f32
    %497 = vector.broadcast %cst_218 : f32 to vector<8x1xf32>
    %498 = arith.divf %496, %497 : vector<8x1xf32>
    %499 = vector.broadcast %498 : vector<8x1xf32> to vector<8x32xf32>
    %500 = arith.subf %490, %499 : vector<8x32xf32>
    %501 = arith.mulf %500, %500 : vector<8x32xf32>
    %cst_219 = arith.constant dense<0.000000e+00> : vector<8xf32>
    %502 = vector.multi_reduction <add>, %501, %cst_219 [1] : vector<8x32xf32> to vector<8xf32>
    %503 = vector.shape_cast %502 : vector<8xf32> to vector<8x1xf32>
    %cst_220 = arith.constant 3.200000e+01 : f32
    %504 = vector.broadcast %cst_220 : f32 to vector<8x1xf32>
    %505 = arith.divf %503, %504 : vector<8x1xf32>
    %cst_221 = arith.constant 9.99999997E-7 : f32
    %506 = vector.broadcast %cst_221 : f32 to vector<8x1xf32>
    %507 = arith.addf %505, %506 : vector<8x1xf32>
    %508 = math.rsqrt %507 : vector<8x1xf32>
    %509 = vector.broadcast %508 : vector<8x1xf32> to vector<8x32xf32>
    %510 = arith.mulf %500, %509 : vector<8x32xf32>
    %511 = vector.broadcast %492 : vector<1x32xf32> to vector<8x32xf32>
    %512 = arith.mulf %510, %511 : vector<8x32xf32>
    %513 = vector.broadcast %494 : vector<1x32xf32> to vector<8x32xf32>
    %514 = arith.addf %512, %513 : vector<8x32xf32>
    %515 = arith.truncf %514 : vector<8x32xf32> to vector<8x32xbf16>
    %c0_222 = arith.constant 0 : index
    %c0_223 = arith.constant 0 : index
    %c0_224 = arith.constant 0 : index
    %516 = vector.load %arg29[%c0_222, %c0_223, %c0_224] : memref<2x32x32xbf16, #tpu.memory_space<vmem>>, vector<1x32x32xbf16>
    %517 = vector.shape_cast %516 : vector<1x32x32xbf16> to vector<32x32xbf16>
    %cst_225 = arith.constant dense<0.000000e+00> : vector<8x32xf32>
    %518 = tpu.matmul %515, %517, %cst_225 {dimension_numbers = #tpu.dot_dimension_numbers<[1], [0], [0], [1], [0, 0, 1, 1], [], []>} : vector<8x32xbf16>, vector<32x32xbf16>, vector<8x32xf32> -> vector<8x32xf32>
    %c0_226 = arith.constant 0 : index
    %c0_227 = arith.constant 0 : index
    %c0_228 = arith.constant 0 : index
    %519 = vector.load %arg30[%c0_226, %c0_227, %c0_228] : memref<2x1x32xf32, #tpu.memory_space<vmem>>, vector<1x1x32xf32>
    %520 = vector.shape_cast %519 : vector<1x1x32xf32> to vector<1x32xf32>
    %521 = vector.broadcast %520 : vector<1x32xf32> to vector<8x32xf32>
    %522 = arith.addf %518, %521 : vector<8x32xf32>
    %523 = arith.truncf %522 : vector<8x32xf32> to vector<8x32xbf16>
    %c0_229 = arith.constant 0 : index
    %c0_230 = arith.constant 0 : index
    %c0_231 = arith.constant 0 : index
    %524 = vector.load %arg31[%c0_229, %c0_230, %c0_231] : memref<2x32x64xbf16, #tpu.memory_space<vmem>>, vector<1x32x64xbf16>
    %525 = vector.shape_cast %524 : vector<1x32x64xbf16> to vector<32x64xbf16>
    %cst_232 = arith.constant dense<0.000000e+00> : vector<8x64xf32>
    %526 = tpu.matmul %368, %525, %cst_232 {dimension_numbers = #tpu.dot_dimension_numbers<[1], [0], [0], [1], [0, 0, 1, 1], [], []>} : vector<8x32xbf16>, vector<32x64xbf16>, vector<8x64xf32> -> vector<8x64xf32>
    %c0_233 = arith.constant 0 : index
    %c0_234 = arith.constant 0 : index
    %c0_235 = arith.constant 0 : index
    %527 = vector.load %arg32[%c0_233, %c0_234, %c0_235] : memref<2x1x64xf32, #tpu.memory_space<vmem>>, vector<1x1x64xf32>
    %528 = vector.shape_cast %527 : vector<1x1x64xf32> to vector<1x64xf32>
    %529 = vector.broadcast %528 : vector<1x64xf32> to vector<8x64xf32>
    %530 = arith.addf %526, %529 : vector<8x64xf32>
    %531 = arith.truncf %530 : vector<8x64xf32> to vector<8x64xbf16>
    %532 = vector.extract_strided_slice %531 {offsets = [0, 0], sizes = [8, 32], strides = [1, 1]} : vector<8x64xbf16> to vector<8x32xbf16>
    %533 = vector.extract_strided_slice %531 {offsets = [0, 32], sizes = [8, 32], strides = [1, 1]} : vector<8x64xbf16> to vector<8x32xbf16>
    %c0_236 = arith.constant 0 : index
    %c0_237 = arith.constant 0 : index
    %c0_238 = arith.constant 0 : index
    %534 = vector.load %arg33[%c0_236, %c0_237, %c0_238] : memref<2x32x32xbf16, #tpu.memory_space<vmem>>, vector<1x32x32xbf16>
    %535 = vector.shape_cast %534 : vector<1x32x32xbf16> to vector<32x32xbf16>
    %c0_239 = arith.constant 0 : index
    %c0_240 = arith.constant 0 : index
    %c0_241 = arith.constant 0 : index
    %536 = vector.load %arg34[%c0_239, %c0_240, %c0_241] : memref<2x1x32xf32, #tpu.memory_space<vmem>>, vector<1x1x32xf32>
    %537 = vector.shape_cast %536 : vector<1x1x32xf32> to vector<1x32xf32>
    %538 = vector.extract_strided_slice %523 {offsets = [0, 0], sizes = [8, 8], strides = [1, 1]} : vector<8x32xbf16> to vector<8x8xbf16>
    %539 = vector.extract_strided_slice %532 {offsets = [0, 0], sizes = [8, 8], strides = [1, 1]} : vector<8x32xbf16> to vector<8x8xbf16>
    %540 = vector.extract_strided_slice %533 {offsets = [0, 0], sizes = [8, 8], strides = [1, 1]} : vector<8x32xbf16> to vector<8x8xbf16>
    %cst_242 = arith.constant dense<0.000000e+00> : vector<8x8xf32>
    %541 = tpu.matmul %538, %539, %cst_242 {dimension_numbers = #tpu.dot_dimension_numbers<[1], [1], [0], [0], [0, 0, 1, 0], [], []>} : vector<8x8xbf16>, vector<8x8xbf16>, vector<8x8xf32> -> vector<8x8xf32>
    %cst_243 = arith.constant -1.000000e+09 : f32
    %542 = vector.broadcast %cst_243 : f32 to vector<8x8xf32>
    %543 = arith.select %11, %541, %542 : vector<8x8xi1>, vector<8x8xf32>
    %cst_244 = arith.constant dense<0xFF800000> : vector<8xf32>
    %544 = vector.multi_reduction <maximumf>, %543, %cst_244 [1] : vector<8x8xf32> to vector<8xf32>
    %545 = vector.shape_cast %544 : vector<8xf32> to vector<8x1xf32>
    %546 = vector.broadcast %545 : vector<8x1xf32> to vector<8x8xf32>
    %547 = arith.subf %543, %546 : vector<8x8xf32>
    %548 = math.exp %547 : vector<8x8xf32>
    %cst_245 = arith.constant dense<0.000000e+00> : vector<8xf32>
    %549 = vector.multi_reduction <add>, %548, %cst_245 [1] : vector<8x8xf32> to vector<8xf32>
    %550 = vector.shape_cast %549 : vector<8xf32> to vector<8x1xf32>
    %551 = tpu.reciprocal %550 {approx = true} : vector<8x1xf32> -> vector<8x1xf32>
    %552 = vector.broadcast %551 : vector<8x1xf32> to vector<8x8xf32>
    %553 = arith.mulf %548, %552 : vector<8x8xf32>
    %554 = arith.truncf %553 : vector<8x8xf32> to vector<8x8xbf16>
    %cst_246 = arith.constant dense<0.000000e+00> : vector<8x8xf32>
    %555 = tpu.matmul %554, %540, %cst_246 {dimension_numbers = #tpu.dot_dimension_numbers<[1], [0], [0], [1], [0, 0, 1, 1], [], []>} : vector<8x8xbf16>, vector<8x8xbf16>, vector<8x8xf32> -> vector<8x8xf32>
    %556 = vector.extract_strided_slice %523 {offsets = [0, 8], sizes = [8, 8], strides = [1, 1]} : vector<8x32xbf16> to vector<8x8xbf16>
    %557 = vector.extract_strided_slice %532 {offsets = [0, 8], sizes = [8, 8], strides = [1, 1]} : vector<8x32xbf16> to vector<8x8xbf16>
    %558 = vector.extract_strided_slice %533 {offsets = [0, 8], sizes = [8, 8], strides = [1, 1]} : vector<8x32xbf16> to vector<8x8xbf16>
    %cst_247 = arith.constant dense<0.000000e+00> : vector<8x8xf32>
    %559 = tpu.matmul %556, %557, %cst_247 {dimension_numbers = #tpu.dot_dimension_numbers<[1], [1], [0], [0], [0, 0, 1, 0], [], []>} : vector<8x8xbf16>, vector<8x8xbf16>, vector<8x8xf32> -> vector<8x8xf32>
    %cst_248 = arith.constant -1.000000e+09 : f32
    %560 = vector.broadcast %cst_248 : f32 to vector<8x8xf32>
    %561 = arith.select %11, %559, %560 : vector<8x8xi1>, vector<8x8xf32>
    %cst_249 = arith.constant dense<0xFF800000> : vector<8xf32>
    %562 = vector.multi_reduction <maximumf>, %561, %cst_249 [1] : vector<8x8xf32> to vector<8xf32>
    %563 = vector.shape_cast %562 : vector<8xf32> to vector<8x1xf32>
    %564 = vector.broadcast %563 : vector<8x1xf32> to vector<8x8xf32>
    %565 = arith.subf %561, %564 : vector<8x8xf32>
    %566 = math.exp %565 : vector<8x8xf32>
    %cst_250 = arith.constant dense<0.000000e+00> : vector<8xf32>
    %567 = vector.multi_reduction <add>, %566, %cst_250 [1] : vector<8x8xf32> to vector<8xf32>
    %568 = vector.shape_cast %567 : vector<8xf32> to vector<8x1xf32>
    %569 = tpu.reciprocal %568 {approx = true} : vector<8x1xf32> -> vector<8x1xf32>
    %570 = vector.broadcast %569 : vector<8x1xf32> to vector<8x8xf32>
    %571 = arith.mulf %566, %570 : vector<8x8xf32>
    %572 = arith.truncf %571 : vector<8x8xf32> to vector<8x8xbf16>
    %cst_251 = arith.constant dense<0.000000e+00> : vector<8x8xf32>
    %573 = tpu.matmul %572, %558, %cst_251 {dimension_numbers = #tpu.dot_dimension_numbers<[1], [0], [0], [1], [0, 0, 1, 1], [], []>} : vector<8x8xbf16>, vector<8x8xbf16>, vector<8x8xf32> -> vector<8x8xf32>
    %574 = vector.extract_strided_slice %523 {offsets = [0, 16], sizes = [8, 8], strides = [1, 1]} : vector<8x32xbf16> to vector<8x8xbf16>
    %575 = vector.extract_strided_slice %532 {offsets = [0, 16], sizes = [8, 8], strides = [1, 1]} : vector<8x32xbf16> to vector<8x8xbf16>
    %576 = vector.extract_strided_slice %533 {offsets = [0, 16], sizes = [8, 8], strides = [1, 1]} : vector<8x32xbf16> to vector<8x8xbf16>
    %cst_252 = arith.constant dense<0.000000e+00> : vector<8x8xf32>
    %577 = tpu.matmul %574, %575, %cst_252 {dimension_numbers = #tpu.dot_dimension_numbers<[1], [1], [0], [0], [0, 0, 1, 0], [], []>} : vector<8x8xbf16>, vector<8x8xbf16>, vector<8x8xf32> -> vector<8x8xf32>
    %cst_253 = arith.constant -1.000000e+09 : f32
    %578 = vector.broadcast %cst_253 : f32 to vector<8x8xf32>
    %579 = arith.select %11, %577, %578 : vector<8x8xi1>, vector<8x8xf32>
    %cst_254 = arith.constant dense<0xFF800000> : vector<8xf32>
    %580 = vector.multi_reduction <maximumf>, %579, %cst_254 [1] : vector<8x8xf32> to vector<8xf32>
    %581 = vector.shape_cast %580 : vector<8xf32> to vector<8x1xf32>
    %582 = vector.broadcast %581 : vector<8x1xf32> to vector<8x8xf32>
    %583 = arith.subf %579, %582 : vector<8x8xf32>
    %584 = math.exp %583 : vector<8x8xf32>
    %cst_255 = arith.constant dense<0.000000e+00> : vector<8xf32>
    %585 = vector.multi_reduction <add>, %584, %cst_255 [1] : vector<8x8xf32> to vector<8xf32>
    %586 = vector.shape_cast %585 : vector<8xf32> to vector<8x1xf32>
    %587 = tpu.reciprocal %586 {approx = true} : vector<8x1xf32> -> vector<8x1xf32>
    %588 = vector.broadcast %587 : vector<8x1xf32> to vector<8x8xf32>
    %589 = arith.mulf %584, %588 : vector<8x8xf32>
    %590 = arith.truncf %589 : vector<8x8xf32> to vector<8x8xbf16>
    %cst_256 = arith.constant dense<0.000000e+00> : vector<8x8xf32>
    %591 = tpu.matmul %590, %576, %cst_256 {dimension_numbers = #tpu.dot_dimension_numbers<[1], [0], [0], [1], [0, 0, 1, 1], [], []>} : vector<8x8xbf16>, vector<8x8xbf16>, vector<8x8xf32> -> vector<8x8xf32>
    %592 = vector.extract_strided_slice %523 {offsets = [0, 24], sizes = [8, 8], strides = [1, 1]} : vector<8x32xbf16> to vector<8x8xbf16>
    %593 = vector.extract_strided_slice %532 {offsets = [0, 24], sizes = [8, 8], strides = [1, 1]} : vector<8x32xbf16> to vector<8x8xbf16>
    %594 = vector.extract_strided_slice %533 {offsets = [0, 24], sizes = [8, 8], strides = [1, 1]} : vector<8x32xbf16> to vector<8x8xbf16>
    %cst_257 = arith.constant dense<0.000000e+00> : vector<8x8xf32>
    %595 = tpu.matmul %592, %593, %cst_257 {dimension_numbers = #tpu.dot_dimension_numbers<[1], [1], [0], [0], [0, 0, 1, 0], [], []>} : vector<8x8xbf16>, vector<8x8xbf16>, vector<8x8xf32> -> vector<8x8xf32>
    %cst_258 = arith.constant -1.000000e+09 : f32
    %596 = vector.broadcast %cst_258 : f32 to vector<8x8xf32>
    %597 = arith.select %11, %595, %596 : vector<8x8xi1>, vector<8x8xf32>
    %cst_259 = arith.constant dense<0xFF800000> : vector<8xf32>
    %598 = vector.multi_reduction <maximumf>, %597, %cst_259 [1] : vector<8x8xf32> to vector<8xf32>
    %599 = vector.shape_cast %598 : vector<8xf32> to vector<8x1xf32>
    %600 = vector.broadcast %599 : vector<8x1xf32> to vector<8x8xf32>
    %601 = arith.subf %597, %600 : vector<8x8xf32>
    %602 = math.exp %601 : vector<8x8xf32>
    %cst_260 = arith.constant dense<0.000000e+00> : vector<8xf32>
    %603 = vector.multi_reduction <add>, %602, %cst_260 [1] : vector<8x8xf32> to vector<8xf32>
    %604 = vector.shape_cast %603 : vector<8xf32> to vector<8x1xf32>
    %605 = tpu.reciprocal %604 {approx = true} : vector<8x1xf32> -> vector<8x1xf32>
    %606 = vector.broadcast %605 : vector<8x1xf32> to vector<8x8xf32>
    %607 = arith.mulf %602, %606 : vector<8x8xf32>
    %608 = arith.truncf %607 : vector<8x8xf32> to vector<8x8xbf16>
    %cst_261 = arith.constant dense<0.000000e+00> : vector<8x8xf32>
    %609 = tpu.matmul %608, %594, %cst_261 {dimension_numbers = #tpu.dot_dimension_numbers<[1], [0], [0], [1], [0, 0, 1, 1], [], []>} : vector<8x8xbf16>, vector<8x8xbf16>, vector<8x8xf32> -> vector<8x8xf32>
    %610 = tpu.concatenate %555, %573, %591, %609 in 1 : vector<8x8xf32>, vector<8x8xf32>, vector<8x8xf32>, vector<8x8xf32> -> vector<8x32xf32>
    %611 = arith.truncf %610 : vector<8x32xf32> to vector<8x32xbf16>
    %cst_262 = arith.constant dense<0.000000e+00> : vector<8x32xf32>
    %612 = tpu.matmul %611, %535, %cst_262 {dimension_numbers = #tpu.dot_dimension_numbers<[1], [0], [0], [1], [0, 0, 1, 1], [], []>} : vector<8x32xbf16>, vector<32x32xbf16>, vector<8x32xf32> -> vector<8x32xf32>
    %613 = vector.broadcast %537 : vector<1x32xf32> to vector<8x32xf32>
    %614 = arith.addf %612, %613 : vector<8x32xf32>
    %615 = arith.addf %514, %614 : vector<8x32xf32>
    %c0_263 = arith.constant 0 : index
    %c0_264 = arith.constant 0 : index
    %c0_265 = arith.constant 0 : index
    %616 = vector.load %arg35[%c0_263, %c0_264, %c0_265] : memref<2x1x32xf32, #tpu.memory_space<vmem>>, vector<1x1x32xf32>
    %617 = vector.shape_cast %616 : vector<1x1x32xf32> to vector<1x32xf32>
    %c0_266 = arith.constant 0 : index
    %c0_267 = arith.constant 0 : index
    %c0_268 = arith.constant 0 : index
    %618 = vector.load %arg36[%c0_266, %c0_267, %c0_268] : memref<2x1x32xf32, #tpu.memory_space<vmem>>, vector<1x1x32xf32>
    %619 = vector.shape_cast %618 : vector<1x1x32xf32> to vector<1x32xf32>
    %cst_269 = arith.constant dense<0.000000e+00> : vector<8xf32>
    %620 = vector.multi_reduction <add>, %615, %cst_269 [1] : vector<8x32xf32> to vector<8xf32>
    %621 = vector.shape_cast %620 : vector<8xf32> to vector<8x1xf32>
    %cst_270 = arith.constant 3.200000e+01 : f32
    %622 = vector.broadcast %cst_270 : f32 to vector<8x1xf32>
    %623 = arith.divf %621, %622 : vector<8x1xf32>
    %624 = vector.broadcast %623 : vector<8x1xf32> to vector<8x32xf32>
    %625 = arith.subf %615, %624 : vector<8x32xf32>
    %626 = arith.mulf %625, %625 : vector<8x32xf32>
    %cst_271 = arith.constant dense<0.000000e+00> : vector<8xf32>
    %627 = vector.multi_reduction <add>, %626, %cst_271 [1] : vector<8x32xf32> to vector<8xf32>
    %628 = vector.shape_cast %627 : vector<8xf32> to vector<8x1xf32>
    %cst_272 = arith.constant 3.200000e+01 : f32
    %629 = vector.broadcast %cst_272 : f32 to vector<8x1xf32>
    %630 = arith.divf %628, %629 : vector<8x1xf32>
    %cst_273 = arith.constant 9.99999997E-7 : f32
    %631 = vector.broadcast %cst_273 : f32 to vector<8x1xf32>
    %632 = arith.addf %630, %631 : vector<8x1xf32>
    %633 = math.rsqrt %632 : vector<8x1xf32>
    %634 = vector.broadcast %633 : vector<8x1xf32> to vector<8x32xf32>
    %635 = arith.mulf %625, %634 : vector<8x32xf32>
    %636 = vector.broadcast %617 : vector<1x32xf32> to vector<8x32xf32>
    %637 = arith.mulf %635, %636 : vector<8x32xf32>
    %638 = vector.broadcast %619 : vector<1x32xf32> to vector<8x32xf32>
    %639 = arith.addf %637, %638 : vector<8x32xf32>
    %640 = arith.truncf %639 : vector<8x32xf32> to vector<8x32xbf16>
    %c0_274 = arith.constant 0 : index
    %c0_275 = arith.constant 0 : index
    %c0_276 = arith.constant 0 : index
    %641 = vector.load %arg37[%c0_274, %c0_275, %c0_276] : memref<2x32x64xbf16, #tpu.memory_space<vmem>>, vector<1x32x64xbf16>
    %642 = vector.shape_cast %641 : vector<1x32x64xbf16> to vector<32x64xbf16>
    %cst_277 = arith.constant dense<0.000000e+00> : vector<8x64xf32>
    %643 = tpu.matmul %640, %642, %cst_277 {dimension_numbers = #tpu.dot_dimension_numbers<[1], [0], [0], [1], [0, 0, 1, 1], [], []>} : vector<8x32xbf16>, vector<32x64xbf16>, vector<8x64xf32> -> vector<8x64xf32>
    %c0_278 = arith.constant 0 : index
    %c0_279 = arith.constant 0 : index
    %c0_280 = arith.constant 0 : index
    %644 = vector.load %arg38[%c0_278, %c0_279, %c0_280] : memref<2x1x64xf32, #tpu.memory_space<vmem>>, vector<1x1x64xf32>
    %645 = vector.shape_cast %644 : vector<1x1x64xf32> to vector<1x64xf32>
    %646 = vector.broadcast %645 : vector<1x64xf32> to vector<8x64xf32>
    %647 = arith.addf %643, %646 : vector<8x64xf32>
    %cst_281 = arith.constant 0.000000e+00 : f32
    %648 = vector.broadcast %cst_281 : f32 to vector<8x64xf32>
    %649 = arith.maximumf %647, %648 : vector<8x64xf32>
    %650 = arith.truncf %649 : vector<8x64xf32> to vector<8x64xbf16>
    %c0_282 = arith.constant 0 : index
    %c0_283 = arith.constant 0 : index
    %c0_284 = arith.constant 0 : index
    %651 = vector.load %arg39[%c0_282, %c0_283, %c0_284] : memref<2x64x32xbf16, #tpu.memory_space<vmem>>, vector<1x64x32xbf16>
    %652 = vector.shape_cast %651 : vector<1x64x32xbf16> to vector<64x32xbf16>
    %cst_285 = arith.constant dense<0.000000e+00> : vector<8x32xf32>
    %653 = tpu.matmul %650, %652, %cst_285 {dimension_numbers = #tpu.dot_dimension_numbers<[1], [0], [0], [1], [0, 0, 1, 1], [], []>} : vector<8x64xbf16>, vector<64x32xbf16>, vector<8x32xf32> -> vector<8x32xf32>
    %c0_286 = arith.constant 0 : index
    %c0_287 = arith.constant 0 : index
    %c0_288 = arith.constant 0 : index
    %654 = vector.load %arg40[%c0_286, %c0_287, %c0_288] : memref<2x1x32xf32, #tpu.memory_space<vmem>>, vector<1x1x32xf32>
    %655 = vector.shape_cast %654 : vector<1x1x32xf32> to vector<1x32xf32>
    %656 = vector.broadcast %655 : vector<1x32xf32> to vector<8x32xf32>
    %657 = arith.addf %653, %656 : vector<8x32xf32>
    %658 = arith.addf %639, %657 : vector<8x32xf32>
    %c0_289 = arith.constant 0 : index
    %c0_290 = arith.constant 0 : index
    %c0_291 = arith.constant 0 : index
    %659 = vector.load %arg41[%c0_289, %c0_290, %c0_291] : memref<2x1x32xf32, #tpu.memory_space<vmem>>, vector<1x1x32xf32>
    %660 = vector.shape_cast %659 : vector<1x1x32xf32> to vector<1x32xf32>
    %c0_292 = arith.constant 0 : index
    %c0_293 = arith.constant 0 : index
    %c0_294 = arith.constant 0 : index
    %661 = vector.load %arg42[%c0_292, %c0_293, %c0_294] : memref<2x1x32xf32, #tpu.memory_space<vmem>>, vector<1x1x32xf32>
    %662 = vector.shape_cast %661 : vector<1x1x32xf32> to vector<1x32xf32>
    %cst_295 = arith.constant dense<0.000000e+00> : vector<8xf32>
    %663 = vector.multi_reduction <add>, %658, %cst_295 [1] : vector<8x32xf32> to vector<8xf32>
    %664 = vector.shape_cast %663 : vector<8xf32> to vector<8x1xf32>
    %cst_296 = arith.constant 3.200000e+01 : f32
    %665 = vector.broadcast %cst_296 : f32 to vector<8x1xf32>
    %666 = arith.divf %664, %665 : vector<8x1xf32>
    %667 = vector.broadcast %666 : vector<8x1xf32> to vector<8x32xf32>
    %668 = arith.subf %658, %667 : vector<8x32xf32>
    %669 = arith.mulf %668, %668 : vector<8x32xf32>
    %cst_297 = arith.constant dense<0.000000e+00> : vector<8xf32>
    %670 = vector.multi_reduction <add>, %669, %cst_297 [1] : vector<8x32xf32> to vector<8xf32>
    %671 = vector.shape_cast %670 : vector<8xf32> to vector<8x1xf32>
    %cst_298 = arith.constant 3.200000e+01 : f32
    %672 = vector.broadcast %cst_298 : f32 to vector<8x1xf32>
    %673 = arith.divf %671, %672 : vector<8x1xf32>
    %cst_299 = arith.constant 9.99999997E-7 : f32
    %674 = vector.broadcast %cst_299 : f32 to vector<8x1xf32>
    %675 = arith.addf %673, %674 : vector<8x1xf32>
    %676 = math.rsqrt %675 : vector<8x1xf32>
    %677 = vector.broadcast %676 : vector<8x1xf32> to vector<8x32xf32>
    %678 = arith.mulf %668, %677 : vector<8x32xf32>
    %679 = vector.broadcast %660 : vector<1x32xf32> to vector<8x32xf32>
    %680 = arith.mulf %678, %679 : vector<8x32xf32>
    %681 = vector.broadcast %662 : vector<1x32xf32> to vector<8x32xf32>
    %682 = arith.addf %680, %681 : vector<8x32xf32>
    %683 = arith.truncf %682 : vector<8x32xf32> to vector<8x32xbf16>
    %c1_300 = arith.constant 1 : index
    %c0_301 = arith.constant 0 : index
    %c0_302 = arith.constant 0 : index
    %684 = vector.load %arg23[%c1_300, %c0_301, %c0_302] : memref<2x32x96xbf16, #tpu.memory_space<vmem>>, vector<1x32x96xbf16>
    %685 = vector.shape_cast %684 : vector<1x32x96xbf16> to vector<32x96xbf16>
    %cst_303 = arith.constant dense<0.000000e+00> : vector<8x96xf32>
    %686 = tpu.matmul %683, %685, %cst_303 {dimension_numbers = #tpu.dot_dimension_numbers<[1], [0], [0], [1], [0, 0, 1, 1], [], []>} : vector<8x32xbf16>, vector<32x96xbf16>, vector<8x96xf32> -> vector<8x96xf32>
    %c1_304 = arith.constant 1 : index
    %c0_305 = arith.constant 0 : index
    %c0_306 = arith.constant 0 : index
    %687 = vector.load %arg24[%c1_304, %c0_305, %c0_306] : memref<2x1x96xf32, #tpu.memory_space<vmem>>, vector<1x1x96xf32>
    %688 = vector.shape_cast %687 : vector<1x1x96xf32> to vector<1x96xf32>
    %689 = vector.broadcast %688 : vector<1x96xf32> to vector<8x96xf32>
    %690 = arith.addf %686, %689 : vector<8x96xf32>
    %691 = arith.truncf %690 : vector<8x96xf32> to vector<8x96xbf16>
    %692 = vector.extract_strided_slice %691 {offsets = [0, 0], sizes = [8, 32], strides = [1, 1]} : vector<8x96xbf16> to vector<8x32xbf16>
    %693 = vector.extract_strided_slice %691 {offsets = [0, 32], sizes = [8, 32], strides = [1, 1]} : vector<8x96xbf16> to vector<8x32xbf16>
    %694 = vector.extract_strided_slice %691 {offsets = [0, 64], sizes = [8, 32], strides = [1, 1]} : vector<8x96xbf16> to vector<8x32xbf16>
    %c1_307 = arith.constant 1 : index
    %c0_308 = arith.constant 0 : index
    %c0_309 = arith.constant 0 : index
    %695 = vector.load %arg25[%c1_307, %c0_308, %c0_309] : memref<2x32x32xbf16, #tpu.memory_space<vmem>>, vector<1x32x32xbf16>
    %696 = vector.shape_cast %695 : vector<1x32x32xbf16> to vector<32x32xbf16>
    %c1_310 = arith.constant 1 : index
    %c0_311 = arith.constant 0 : index
    %c0_312 = arith.constant 0 : index
    %697 = vector.load %arg26[%c1_310, %c0_311, %c0_312] : memref<2x1x32xf32, #tpu.memory_space<vmem>>, vector<1x1x32xf32>
    %698 = vector.shape_cast %697 : vector<1x1x32xf32> to vector<1x32xf32>
    %699 = vector.extract_strided_slice %692 {offsets = [0, 0], sizes = [8, 8], strides = [1, 1]} : vector<8x32xbf16> to vector<8x8xbf16>
    %700 = vector.extract_strided_slice %693 {offsets = [0, 0], sizes = [8, 8], strides = [1, 1]} : vector<8x32xbf16> to vector<8x8xbf16>
    %701 = vector.extract_strided_slice %694 {offsets = [0, 0], sizes = [8, 8], strides = [1, 1]} : vector<8x32xbf16> to vector<8x8xbf16>
    %cst_313 = arith.constant dense<0.000000e+00> : vector<8x8xf32>
    %702 = tpu.matmul %699, %700, %cst_313 {dimension_numbers = #tpu.dot_dimension_numbers<[1], [1], [0], [0], [0, 0, 1, 0], [], []>} : vector<8x8xbf16>, vector<8x8xbf16>, vector<8x8xf32> -> vector<8x8xf32>
    %cst_314 = arith.constant -1.000000e+09 : f32
    %703 = vector.broadcast %cst_314 : f32 to vector<8x8xf32>
    %704 = arith.select %17, %702, %703 : vector<8x8xi1>, vector<8x8xf32>
    %cst_315 = arith.constant dense<0xFF800000> : vector<8xf32>
    %705 = vector.multi_reduction <maximumf>, %704, %cst_315 [1] : vector<8x8xf32> to vector<8xf32>
    %706 = vector.shape_cast %705 : vector<8xf32> to vector<8x1xf32>
    %707 = vector.broadcast %706 : vector<8x1xf32> to vector<8x8xf32>
    %708 = arith.subf %704, %707 : vector<8x8xf32>
    %709 = math.exp %708 : vector<8x8xf32>
    %cst_316 = arith.constant dense<0.000000e+00> : vector<8xf32>
    %710 = vector.multi_reduction <add>, %709, %cst_316 [1] : vector<8x8xf32> to vector<8xf32>
    %711 = vector.shape_cast %710 : vector<8xf32> to vector<8x1xf32>
    %712 = tpu.reciprocal %711 {approx = true} : vector<8x1xf32> -> vector<8x1xf32>
    %713 = vector.broadcast %712 : vector<8x1xf32> to vector<8x8xf32>
    %714 = arith.mulf %709, %713 : vector<8x8xf32>
    %715 = arith.truncf %714 : vector<8x8xf32> to vector<8x8xbf16>
    %cst_317 = arith.constant dense<0.000000e+00> : vector<8x8xf32>
    %716 = tpu.matmul %715, %701, %cst_317 {dimension_numbers = #tpu.dot_dimension_numbers<[1], [0], [0], [1], [0, 0, 1, 1], [], []>} : vector<8x8xbf16>, vector<8x8xbf16>, vector<8x8xf32> -> vector<8x8xf32>
    %717 = vector.extract_strided_slice %692 {offsets = [0, 8], sizes = [8, 8], strides = [1, 1]} : vector<8x32xbf16> to vector<8x8xbf16>
    %718 = vector.extract_strided_slice %693 {offsets = [0, 8], sizes = [8, 8], strides = [1, 1]} : vector<8x32xbf16> to vector<8x8xbf16>
    %719 = vector.extract_strided_slice %694 {offsets = [0, 8], sizes = [8, 8], strides = [1, 1]} : vector<8x32xbf16> to vector<8x8xbf16>
    %cst_318 = arith.constant dense<0.000000e+00> : vector<8x8xf32>
    %720 = tpu.matmul %717, %718, %cst_318 {dimension_numbers = #tpu.dot_dimension_numbers<[1], [1], [0], [0], [0, 0, 1, 0], [], []>} : vector<8x8xbf16>, vector<8x8xbf16>, vector<8x8xf32> -> vector<8x8xf32>
    %cst_319 = arith.constant -1.000000e+09 : f32
    %721 = vector.broadcast %cst_319 : f32 to vector<8x8xf32>
    %722 = arith.select %17, %720, %721 : vector<8x8xi1>, vector<8x8xf32>
    %cst_320 = arith.constant dense<0xFF800000> : vector<8xf32>
    %723 = vector.multi_reduction <maximumf>, %722, %cst_320 [1] : vector<8x8xf32> to vector<8xf32>
    %724 = vector.shape_cast %723 : vector<8xf32> to vector<8x1xf32>
    %725 = vector.broadcast %724 : vector<8x1xf32> to vector<8x8xf32>
    %726 = arith.subf %722, %725 : vector<8x8xf32>
    %727 = math.exp %726 : vector<8x8xf32>
    %cst_321 = arith.constant dense<0.000000e+00> : vector<8xf32>
    %728 = vector.multi_reduction <add>, %727, %cst_321 [1] : vector<8x8xf32> to vector<8xf32>
    %729 = vector.shape_cast %728 : vector<8xf32> to vector<8x1xf32>
    %730 = tpu.reciprocal %729 {approx = true} : vector<8x1xf32> -> vector<8x1xf32>
    %731 = vector.broadcast %730 : vector<8x1xf32> to vector<8x8xf32>
    %732 = arith.mulf %727, %731 : vector<8x8xf32>
    %733 = arith.truncf %732 : vector<8x8xf32> to vector<8x8xbf16>
    %cst_322 = arith.constant dense<0.000000e+00> : vector<8x8xf32>
    %734 = tpu.matmul %733, %719, %cst_322 {dimension_numbers = #tpu.dot_dimension_numbers<[1], [0], [0], [1], [0, 0, 1, 1], [], []>} : vector<8x8xbf16>, vector<8x8xbf16>, vector<8x8xf32> -> vector<8x8xf32>
    %735 = vector.extract_strided_slice %692 {offsets = [0, 16], sizes = [8, 8], strides = [1, 1]} : vector<8x32xbf16> to vector<8x8xbf16>
    %736 = vector.extract_strided_slice %693 {offsets = [0, 16], sizes = [8, 8], strides = [1, 1]} : vector<8x32xbf16> to vector<8x8xbf16>
    %737 = vector.extract_strided_slice %694 {offsets = [0, 16], sizes = [8, 8], strides = [1, 1]} : vector<8x32xbf16> to vector<8x8xbf16>
    %cst_323 = arith.constant dense<0.000000e+00> : vector<8x8xf32>
    %738 = tpu.matmul %735, %736, %cst_323 {dimension_numbers = #tpu.dot_dimension_numbers<[1], [1], [0], [0], [0, 0, 1, 0], [], []>} : vector<8x8xbf16>, vector<8x8xbf16>, vector<8x8xf32> -> vector<8x8xf32>
    %cst_324 = arith.constant -1.000000e+09 : f32
    %739 = vector.broadcast %cst_324 : f32 to vector<8x8xf32>
    %740 = arith.select %17, %738, %739 : vector<8x8xi1>, vector<8x8xf32>
    %cst_325 = arith.constant dense<0xFF800000> : vector<8xf32>
    %741 = vector.multi_reduction <maximumf>, %740, %cst_325 [1] : vector<8x8xf32> to vector<8xf32>
    %742 = vector.shape_cast %741 : vector<8xf32> to vector<8x1xf32>
    %743 = vector.broadcast %742 : vector<8x1xf32> to vector<8x8xf32>
    %744 = arith.subf %740, %743 : vector<8x8xf32>
    %745 = math.exp %744 : vector<8x8xf32>
    %cst_326 = arith.constant dense<0.000000e+00> : vector<8xf32>
    %746 = vector.multi_reduction <add>, %745, %cst_326 [1] : vector<8x8xf32> to vector<8xf32>
    %747 = vector.shape_cast %746 : vector<8xf32> to vector<8x1xf32>
    %748 = tpu.reciprocal %747 {approx = true} : vector<8x1xf32> -> vector<8x1xf32>
    %749 = vector.broadcast %748 : vector<8x1xf32> to vector<8x8xf32>
    %750 = arith.mulf %745, %749 : vector<8x8xf32>
    %751 = arith.truncf %750 : vector<8x8xf32> to vector<8x8xbf16>
    %cst_327 = arith.constant dense<0.000000e+00> : vector<8x8xf32>
    %752 = tpu.matmul %751, %737, %cst_327 {dimension_numbers = #tpu.dot_dimension_numbers<[1], [0], [0], [1], [0, 0, 1, 1], [], []>} : vector<8x8xbf16>, vector<8x8xbf16>, vector<8x8xf32> -> vector<8x8xf32>
    %753 = vector.extract_strided_slice %692 {offsets = [0, 24], sizes = [8, 8], strides = [1, 1]} : vector<8x32xbf16> to vector<8x8xbf16>
    %754 = vector.extract_strided_slice %693 {offsets = [0, 24], sizes = [8, 8], strides = [1, 1]} : vector<8x32xbf16> to vector<8x8xbf16>
    %755 = vector.extract_strided_slice %694 {offsets = [0, 24], sizes = [8, 8], strides = [1, 1]} : vector<8x32xbf16> to vector<8x8xbf16>
    %cst_328 = arith.constant dense<0.000000e+00> : vector<8x8xf32>
    %756 = tpu.matmul %753, %754, %cst_328 {dimension_numbers = #tpu.dot_dimension_numbers<[1], [1], [0], [0], [0, 0, 1, 0], [], []>} : vector<8x8xbf16>, vector<8x8xbf16>, vector<8x8xf32> -> vector<8x8xf32>
    %cst_329 = arith.constant -1.000000e+09 : f32
    %757 = vector.broadcast %cst_329 : f32 to vector<8x8xf32>
    %758 = arith.select %17, %756, %757 : vector<8x8xi1>, vector<8x8xf32>
    %cst_330 = arith.constant dense<0xFF800000> : vector<8xf32>
    %759 = vector.multi_reduction <maximumf>, %758, %cst_330 [1] : vector<8x8xf32> to vector<8xf32>
    %760 = vector.shape_cast %759 : vector<8xf32> to vector<8x1xf32>
    %761 = vector.broadcast %760 : vector<8x1xf32> to vector<8x8xf32>
    %762 = arith.subf %758, %761 : vector<8x8xf32>
    %763 = math.exp %762 : vector<8x8xf32>
    %cst_331 = arith.constant dense<0.000000e+00> : vector<8xf32>
    %764 = vector.multi_reduction <add>, %763, %cst_331 [1] : vector<8x8xf32> to vector<8xf32>
    %765 = vector.shape_cast %764 : vector<8xf32> to vector<8x1xf32>
    %766 = tpu.reciprocal %765 {approx = true} : vector<8x1xf32> -> vector<8x1xf32>
    %767 = vector.broadcast %766 : vector<8x1xf32> to vector<8x8xf32>
    %768 = arith.mulf %763, %767 : vector<8x8xf32>
    %769 = arith.truncf %768 : vector<8x8xf32> to vector<8x8xbf16>
    %cst_332 = arith.constant dense<0.000000e+00> : vector<8x8xf32>
    %770 = tpu.matmul %769, %755, %cst_332 {dimension_numbers = #tpu.dot_dimension_numbers<[1], [0], [0], [1], [0, 0, 1, 1], [], []>} : vector<8x8xbf16>, vector<8x8xbf16>, vector<8x8xf32> -> vector<8x8xf32>
    %771 = tpu.concatenate %716, %734, %752, %770 in 1 : vector<8x8xf32>, vector<8x8xf32>, vector<8x8xf32>, vector<8x8xf32> -> vector<8x32xf32>
    %772 = arith.truncf %771 : vector<8x32xf32> to vector<8x32xbf16>
    %cst_333 = arith.constant dense<0.000000e+00> : vector<8x32xf32>
    %773 = tpu.matmul %772, %696, %cst_333 {dimension_numbers = #tpu.dot_dimension_numbers<[1], [0], [0], [1], [0, 0, 1, 1], [], []>} : vector<8x32xbf16>, vector<32x32xbf16>, vector<8x32xf32> -> vector<8x32xf32>
    %774 = vector.broadcast %698 : vector<1x32xf32> to vector<8x32xf32>
    %775 = arith.addf %773, %774 : vector<8x32xf32>
    %776 = arith.addf %682, %775 : vector<8x32xf32>
    %c1_334 = arith.constant 1 : index
    %c0_335 = arith.constant 0 : index
    %c0_336 = arith.constant 0 : index
    %777 = vector.load %arg27[%c1_334, %c0_335, %c0_336] : memref<2x1x32xf32, #tpu.memory_space<vmem>>, vector<1x1x32xf32>
    %778 = vector.shape_cast %777 : vector<1x1x32xf32> to vector<1x32xf32>
    %c1_337 = arith.constant 1 : index
    %c0_338 = arith.constant 0 : index
    %c0_339 = arith.constant 0 : index
    %779 = vector.load %arg28[%c1_337, %c0_338, %c0_339] : memref<2x1x32xf32, #tpu.memory_space<vmem>>, vector<1x1x32xf32>
    %780 = vector.shape_cast %779 : vector<1x1x32xf32> to vector<1x32xf32>
    %cst_340 = arith.constant dense<0.000000e+00> : vector<8xf32>
    %781 = vector.multi_reduction <add>, %776, %cst_340 [1] : vector<8x32xf32> to vector<8xf32>
    %782 = vector.shape_cast %781 : vector<8xf32> to vector<8x1xf32>
    %cst_341 = arith.constant 3.200000e+01 : f32
    %783 = vector.broadcast %cst_341 : f32 to vector<8x1xf32>
    %784 = arith.divf %782, %783 : vector<8x1xf32>
    %785 = vector.broadcast %784 : vector<8x1xf32> to vector<8x32xf32>
    %786 = arith.subf %776, %785 : vector<8x32xf32>
    %787 = arith.mulf %786, %786 : vector<8x32xf32>
    %cst_342 = arith.constant dense<0.000000e+00> : vector<8xf32>
    %788 = vector.multi_reduction <add>, %787, %cst_342 [1] : vector<8x32xf32> to vector<8xf32>
    %789 = vector.shape_cast %788 : vector<8xf32> to vector<8x1xf32>
    %cst_343 = arith.constant 3.200000e+01 : f32
    %790 = vector.broadcast %cst_343 : f32 to vector<8x1xf32>
    %791 = arith.divf %789, %790 : vector<8x1xf32>
    %cst_344 = arith.constant 9.99999997E-7 : f32
    %792 = vector.broadcast %cst_344 : f32 to vector<8x1xf32>
    %793 = arith.addf %791, %792 : vector<8x1xf32>
    %794 = math.rsqrt %793 : vector<8x1xf32>
    %795 = vector.broadcast %794 : vector<8x1xf32> to vector<8x32xf32>
    %796 = arith.mulf %786, %795 : vector<8x32xf32>
    %797 = vector.broadcast %778 : vector<1x32xf32> to vector<8x32xf32>
    %798 = arith.mulf %796, %797 : vector<8x32xf32>
    %799 = vector.broadcast %780 : vector<1x32xf32> to vector<8x32xf32>
    %800 = arith.addf %798, %799 : vector<8x32xf32>
    %801 = arith.truncf %800 : vector<8x32xf32> to vector<8x32xbf16>
    %c1_345 = arith.constant 1 : index
    %c0_346 = arith.constant 0 : index
    %c0_347 = arith.constant 0 : index
    %802 = vector.load %arg29[%c1_345, %c0_346, %c0_347] : memref<2x32x32xbf16, #tpu.memory_space<vmem>>, vector<1x32x32xbf16>
    %803 = vector.shape_cast %802 : vector<1x32x32xbf16> to vector<32x32xbf16>
    %cst_348 = arith.constant dense<0.000000e+00> : vector<8x32xf32>
    %804 = tpu.matmul %801, %803, %cst_348 {dimension_numbers = #tpu.dot_dimension_numbers<[1], [0], [0], [1], [0, 0, 1, 1], [], []>} : vector<8x32xbf16>, vector<32x32xbf16>, vector<8x32xf32> -> vector<8x32xf32>
    %c1_349 = arith.constant 1 : index
    %c0_350 = arith.constant 0 : index
    %c0_351 = arith.constant 0 : index
    %805 = vector.load %arg30[%c1_349, %c0_350, %c0_351] : memref<2x1x32xf32, #tpu.memory_space<vmem>>, vector<1x1x32xf32>
    %806 = vector.shape_cast %805 : vector<1x1x32xf32> to vector<1x32xf32>
    %807 = vector.broadcast %806 : vector<1x32xf32> to vector<8x32xf32>
    %808 = arith.addf %804, %807 : vector<8x32xf32>
    %809 = arith.truncf %808 : vector<8x32xf32> to vector<8x32xbf16>
    %c1_352 = arith.constant 1 : index
    %c0_353 = arith.constant 0 : index
    %c0_354 = arith.constant 0 : index
    %810 = vector.load %arg31[%c1_352, %c0_353, %c0_354] : memref<2x32x64xbf16, #tpu.memory_space<vmem>>, vector<1x32x64xbf16>
    %811 = vector.shape_cast %810 : vector<1x32x64xbf16> to vector<32x64xbf16>
    %cst_355 = arith.constant dense<0.000000e+00> : vector<8x64xf32>
    %812 = tpu.matmul %368, %811, %cst_355 {dimension_numbers = #tpu.dot_dimension_numbers<[1], [0], [0], [1], [0, 0, 1, 1], [], []>} : vector<8x32xbf16>, vector<32x64xbf16>, vector<8x64xf32> -> vector<8x64xf32>
    %c1_356 = arith.constant 1 : index
    %c0_357 = arith.constant 0 : index
    %c0_358 = arith.constant 0 : index
    %813 = vector.load %arg32[%c1_356, %c0_357, %c0_358] : memref<2x1x64xf32, #tpu.memory_space<vmem>>, vector<1x1x64xf32>
    %814 = vector.shape_cast %813 : vector<1x1x64xf32> to vector<1x64xf32>
    %815 = vector.broadcast %814 : vector<1x64xf32> to vector<8x64xf32>
    %816 = arith.addf %812, %815 : vector<8x64xf32>
    %817 = arith.truncf %816 : vector<8x64xf32> to vector<8x64xbf16>
    %818 = vector.extract_strided_slice %817 {offsets = [0, 0], sizes = [8, 32], strides = [1, 1]} : vector<8x64xbf16> to vector<8x32xbf16>
    %819 = vector.extract_strided_slice %817 {offsets = [0, 32], sizes = [8, 32], strides = [1, 1]} : vector<8x64xbf16> to vector<8x32xbf16>
    %c1_359 = arith.constant 1 : index
    %c0_360 = arith.constant 0 : index
    %c0_361 = arith.constant 0 : index
    %820 = vector.load %arg33[%c1_359, %c0_360, %c0_361] : memref<2x32x32xbf16, #tpu.memory_space<vmem>>, vector<1x32x32xbf16>
    %821 = vector.shape_cast %820 : vector<1x32x32xbf16> to vector<32x32xbf16>
    %c1_362 = arith.constant 1 : index
    %c0_363 = arith.constant 0 : index
    %c0_364 = arith.constant 0 : index
    %822 = vector.load %arg34[%c1_362, %c0_363, %c0_364] : memref<2x1x32xf32, #tpu.memory_space<vmem>>, vector<1x1x32xf32>
    %823 = vector.shape_cast %822 : vector<1x1x32xf32> to vector<1x32xf32>
    %824 = vector.extract_strided_slice %809 {offsets = [0, 0], sizes = [8, 8], strides = [1, 1]} : vector<8x32xbf16> to vector<8x8xbf16>
    %825 = vector.extract_strided_slice %818 {offsets = [0, 0], sizes = [8, 8], strides = [1, 1]} : vector<8x32xbf16> to vector<8x8xbf16>
    %826 = vector.extract_strided_slice %819 {offsets = [0, 0], sizes = [8, 8], strides = [1, 1]} : vector<8x32xbf16> to vector<8x8xbf16>
    %cst_365 = arith.constant dense<0.000000e+00> : vector<8x8xf32>
    %827 = tpu.matmul %824, %825, %cst_365 {dimension_numbers = #tpu.dot_dimension_numbers<[1], [1], [0], [0], [0, 0, 1, 0], [], []>} : vector<8x8xbf16>, vector<8x8xbf16>, vector<8x8xf32> -> vector<8x8xf32>
    %cst_366 = arith.constant -1.000000e+09 : f32
    %828 = vector.broadcast %cst_366 : f32 to vector<8x8xf32>
    %829 = arith.select %11, %827, %828 : vector<8x8xi1>, vector<8x8xf32>
    %cst_367 = arith.constant dense<0xFF800000> : vector<8xf32>
    %830 = vector.multi_reduction <maximumf>, %829, %cst_367 [1] : vector<8x8xf32> to vector<8xf32>
    %831 = vector.shape_cast %830 : vector<8xf32> to vector<8x1xf32>
    %832 = vector.broadcast %831 : vector<8x1xf32> to vector<8x8xf32>
    %833 = arith.subf %829, %832 : vector<8x8xf32>
    %834 = math.exp %833 : vector<8x8xf32>
    %cst_368 = arith.constant dense<0.000000e+00> : vector<8xf32>
    %835 = vector.multi_reduction <add>, %834, %cst_368 [1] : vector<8x8xf32> to vector<8xf32>
    %836 = vector.shape_cast %835 : vector<8xf32> to vector<8x1xf32>
    %837 = tpu.reciprocal %836 {approx = true} : vector<8x1xf32> -> vector<8x1xf32>
    %838 = vector.broadcast %837 : vector<8x1xf32> to vector<8x8xf32>
    %839 = arith.mulf %834, %838 : vector<8x8xf32>
    %840 = arith.truncf %839 : vector<8x8xf32> to vector<8x8xbf16>
    %cst_369 = arith.constant dense<0.000000e+00> : vector<8x8xf32>
    %841 = tpu.matmul %840, %826, %cst_369 {dimension_numbers = #tpu.dot_dimension_numbers<[1], [0], [0], [1], [0, 0, 1, 1], [], []>} : vector<8x8xbf16>, vector<8x8xbf16>, vector<8x8xf32> -> vector<8x8xf32>
    %842 = vector.extract_strided_slice %809 {offsets = [0, 8], sizes = [8, 8], strides = [1, 1]} : vector<8x32xbf16> to vector<8x8xbf16>
    %843 = vector.extract_strided_slice %818 {offsets = [0, 8], sizes = [8, 8], strides = [1, 1]} : vector<8x32xbf16> to vector<8x8xbf16>
    %844 = vector.extract_strided_slice %819 {offsets = [0, 8], sizes = [8, 8], strides = [1, 1]} : vector<8x32xbf16> to vector<8x8xbf16>
    %cst_370 = arith.constant dense<0.000000e+00> : vector<8x8xf32>
    %845 = tpu.matmul %842, %843, %cst_370 {dimension_numbers = #tpu.dot_dimension_numbers<[1], [1], [0], [0], [0, 0, 1, 0], [], []>} : vector<8x8xbf16>, vector<8x8xbf16>, vector<8x8xf32> -> vector<8x8xf32>
    %cst_371 = arith.constant -1.000000e+09 : f32
    %846 = vector.broadcast %cst_371 : f32 to vector<8x8xf32>
    %847 = arith.select %11, %845, %846 : vector<8x8xi1>, vector<8x8xf32>
    %cst_372 = arith.constant dense<0xFF800000> : vector<8xf32>
    %848 = vector.multi_reduction <maximumf>, %847, %cst_372 [1] : vector<8x8xf32> to vector<8xf32>
    %849 = vector.shape_cast %848 : vector<8xf32> to vector<8x1xf32>
    %850 = vector.broadcast %849 : vector<8x1xf32> to vector<8x8xf32>
    %851 = arith.subf %847, %850 : vector<8x8xf32>
    %852 = math.exp %851 : vector<8x8xf32>
    %cst_373 = arith.constant dense<0.000000e+00> : vector<8xf32>
    %853 = vector.multi_reduction <add>, %852, %cst_373 [1] : vector<8x8xf32> to vector<8xf32>
    %854 = vector.shape_cast %853 : vector<8xf32> to vector<8x1xf32>
    %855 = tpu.reciprocal %854 {approx = true} : vector<8x1xf32> -> vector<8x1xf32>
    %856 = vector.broadcast %855 : vector<8x1xf32> to vector<8x8xf32>
    %857 = arith.mulf %852, %856 : vector<8x8xf32>
    %858 = arith.truncf %857 : vector<8x8xf32> to vector<8x8xbf16>
    %cst_374 = arith.constant dense<0.000000e+00> : vector<8x8xf32>
    %859 = tpu.matmul %858, %844, %cst_374 {dimension_numbers = #tpu.dot_dimension_numbers<[1], [0], [0], [1], [0, 0, 1, 1], [], []>} : vector<8x8xbf16>, vector<8x8xbf16>, vector<8x8xf32> -> vector<8x8xf32>
    %860 = vector.extract_strided_slice %809 {offsets = [0, 16], sizes = [8, 8], strides = [1, 1]} : vector<8x32xbf16> to vector<8x8xbf16>
    %861 = vector.extract_strided_slice %818 {offsets = [0, 16], sizes = [8, 8], strides = [1, 1]} : vector<8x32xbf16> to vector<8x8xbf16>
    %862 = vector.extract_strided_slice %819 {offsets = [0, 16], sizes = [8, 8], strides = [1, 1]} : vector<8x32xbf16> to vector<8x8xbf16>
    %cst_375 = arith.constant dense<0.000000e+00> : vector<8x8xf32>
    %863 = tpu.matmul %860, %861, %cst_375 {dimension_numbers = #tpu.dot_dimension_numbers<[1], [1], [0], [0], [0, 0, 1, 0], [], []>} : vector<8x8xbf16>, vector<8x8xbf16>, vector<8x8xf32> -> vector<8x8xf32>
    %cst_376 = arith.constant -1.000000e+09 : f32
    %864 = vector.broadcast %cst_376 : f32 to vector<8x8xf32>
    %865 = arith.select %11, %863, %864 : vector<8x8xi1>, vector<8x8xf32>
    %cst_377 = arith.constant dense<0xFF800000> : vector<8xf32>
    %866 = vector.multi_reduction <maximumf>, %865, %cst_377 [1] : vector<8x8xf32> to vector<8xf32>
    %867 = vector.shape_cast %866 : vector<8xf32> to vector<8x1xf32>
    %868 = vector.broadcast %867 : vector<8x1xf32> to vector<8x8xf32>
    %869 = arith.subf %865, %868 : vector<8x8xf32>
    %870 = math.exp %869 : vector<8x8xf32>
    %cst_378 = arith.constant dense<0.000000e+00> : vector<8xf32>
    %871 = vector.multi_reduction <add>, %870, %cst_378 [1] : vector<8x8xf32> to vector<8xf32>
    %872 = vector.shape_cast %871 : vector<8xf32> to vector<8x1xf32>
    %873 = tpu.reciprocal %872 {approx = true} : vector<8x1xf32> -> vector<8x1xf32>
    %874 = vector.broadcast %873 : vector<8x1xf32> to vector<8x8xf32>
    %875 = arith.mulf %870, %874 : vector<8x8xf32>
    %876 = arith.truncf %875 : vector<8x8xf32> to vector<8x8xbf16>
    %cst_379 = arith.constant dense<0.000000e+00> : vector<8x8xf32>
    %877 = tpu.matmul %876, %862, %cst_379 {dimension_numbers = #tpu.dot_dimension_numbers<[1], [0], [0], [1], [0, 0, 1, 1], [], []>} : vector<8x8xbf16>, vector<8x8xbf16>, vector<8x8xf32> -> vector<8x8xf32>
    %878 = vector.extract_strided_slice %809 {offsets = [0, 24], sizes = [8, 8], strides = [1, 1]} : vector<8x32xbf16> to vector<8x8xbf16>
    %879 = vector.extract_strided_slice %818 {offsets = [0, 24], sizes = [8, 8], strides = [1, 1]} : vector<8x32xbf16> to vector<8x8xbf16>
    %880 = vector.extract_strided_slice %819 {offsets = [0, 24], sizes = [8, 8], strides = [1, 1]} : vector<8x32xbf16> to vector<8x8xbf16>
    %cst_380 = arith.constant dense<0.000000e+00> : vector<8x8xf32>
    %881 = tpu.matmul %878, %879, %cst_380 {dimension_numbers = #tpu.dot_dimension_numbers<[1], [1], [0], [0], [0, 0, 1, 0], [], []>} : vector<8x8xbf16>, vector<8x8xbf16>, vector<8x8xf32> -> vector<8x8xf32>
    %cst_381 = arith.constant -1.000000e+09 : f32
    %882 = vector.broadcast %cst_381 : f32 to vector<8x8xf32>
    %883 = arith.select %11, %881, %882 : vector<8x8xi1>, vector<8x8xf32>
    %cst_382 = arith.constant dense<0xFF800000> : vector<8xf32>
    %884 = vector.multi_reduction <maximumf>, %883, %cst_382 [1] : vector<8x8xf32> to vector<8xf32>
    %885 = vector.shape_cast %884 : vector<8xf32> to vector<8x1xf32>
    %886 = vector.broadcast %885 : vector<8x1xf32> to vector<8x8xf32>
    %887 = arith.subf %883, %886 : vector<8x8xf32>
    %888 = math.exp %887 : vector<8x8xf32>
    %cst_383 = arith.constant dense<0.000000e+00> : vector<8xf32>
    %889 = vector.multi_reduction <add>, %888, %cst_383 [1] : vector<8x8xf32> to vector<8xf32>
    %890 = vector.shape_cast %889 : vector<8xf32> to vector<8x1xf32>
    %891 = tpu.reciprocal %890 {approx = true} : vector<8x1xf32> -> vector<8x1xf32>
    %892 = vector.broadcast %891 : vector<8x1xf32> to vector<8x8xf32>
    %893 = arith.mulf %888, %892 : vector<8x8xf32>
    %894 = arith.truncf %893 : vector<8x8xf32> to vector<8x8xbf16>
    %cst_384 = arith.constant dense<0.000000e+00> : vector<8x8xf32>
    %895 = tpu.matmul %894, %880, %cst_384 {dimension_numbers = #tpu.dot_dimension_numbers<[1], [0], [0], [1], [0, 0, 1, 1], [], []>} : vector<8x8xbf16>, vector<8x8xbf16>, vector<8x8xf32> -> vector<8x8xf32>
    %896 = tpu.concatenate %841, %859, %877, %895 in 1 : vector<8x8xf32>, vector<8x8xf32>, vector<8x8xf32>, vector<8x8xf32> -> vector<8x32xf32>
    %897 = arith.truncf %896 : vector<8x32xf32> to vector<8x32xbf16>
    %cst_385 = arith.constant dense<0.000000e+00> : vector<8x32xf32>
    %898 = tpu.matmul %897, %821, %cst_385 {dimension_numbers = #tpu.dot_dimension_numbers<[1], [0], [0], [1], [0, 0, 1, 1], [], []>} : vector<8x32xbf16>, vector<32x32xbf16>, vector<8x32xf32> -> vector<8x32xf32>
    %899 = vector.broadcast %823 : vector<1x32xf32> to vector<8x32xf32>
    %900 = arith.addf %898, %899 : vector<8x32xf32>
    %901 = arith.addf %800, %900 : vector<8x32xf32>
    %c1_386 = arith.constant 1 : index
    %c0_387 = arith.constant 0 : index
    %c0_388 = arith.constant 0 : index
    %902 = vector.load %arg35[%c1_386, %c0_387, %c0_388] : memref<2x1x32xf32, #tpu.memory_space<vmem>>, vector<1x1x32xf32>
    %903 = vector.shape_cast %902 : vector<1x1x32xf32> to vector<1x32xf32>
    %c1_389 = arith.constant 1 : index
    %c0_390 = arith.constant 0 : index
    %c0_391 = arith.constant 0 : index
    %904 = vector.load %arg36[%c1_389, %c0_390, %c0_391] : memref<2x1x32xf32, #tpu.memory_space<vmem>>, vector<1x1x32xf32>
    %905 = vector.shape_cast %904 : vector<1x1x32xf32> to vector<1x32xf32>
    %cst_392 = arith.constant dense<0.000000e+00> : vector<8xf32>
    %906 = vector.multi_reduction <add>, %901, %cst_392 [1] : vector<8x32xf32> to vector<8xf32>
    %907 = vector.shape_cast %906 : vector<8xf32> to vector<8x1xf32>
    %cst_393 = arith.constant 3.200000e+01 : f32
    %908 = vector.broadcast %cst_393 : f32 to vector<8x1xf32>
    %909 = arith.divf %907, %908 : vector<8x1xf32>
    %910 = vector.broadcast %909 : vector<8x1xf32> to vector<8x32xf32>
    %911 = arith.subf %901, %910 : vector<8x32xf32>
    %912 = arith.mulf %911, %911 : vector<8x32xf32>
    %cst_394 = arith.constant dense<0.000000e+00> : vector<8xf32>
    %913 = vector.multi_reduction <add>, %912, %cst_394 [1] : vector<8x32xf32> to vector<8xf32>
    %914 = vector.shape_cast %913 : vector<8xf32> to vector<8x1xf32>
    %cst_395 = arith.constant 3.200000e+01 : f32
    %915 = vector.broadcast %cst_395 : f32 to vector<8x1xf32>
    %916 = arith.divf %914, %915 : vector<8x1xf32>
    %cst_396 = arith.constant 9.99999997E-7 : f32
    %917 = vector.broadcast %cst_396 : f32 to vector<8x1xf32>
    %918 = arith.addf %916, %917 : vector<8x1xf32>
    %919 = math.rsqrt %918 : vector<8x1xf32>
    %920 = vector.broadcast %919 : vector<8x1xf32> to vector<8x32xf32>
    %921 = arith.mulf %911, %920 : vector<8x32xf32>
    %922 = vector.broadcast %903 : vector<1x32xf32> to vector<8x32xf32>
    %923 = arith.mulf %921, %922 : vector<8x32xf32>
    %924 = vector.broadcast %905 : vector<1x32xf32> to vector<8x32xf32>
    %925 = arith.addf %923, %924 : vector<8x32xf32>
    %926 = arith.truncf %925 : vector<8x32xf32> to vector<8x32xbf16>
    %c1_397 = arith.constant 1 : index
    %c0_398 = arith.constant 0 : index
    %c0_399 = arith.constant 0 : index
    %927 = vector.load %arg37[%c1_397, %c0_398, %c0_399] : memref<2x32x64xbf16, #tpu.memory_space<vmem>>, vector<1x32x64xbf16>
    %928 = vector.shape_cast %927 : vector<1x32x64xbf16> to vector<32x64xbf16>
    %cst_400 = arith.constant dense<0.000000e+00> : vector<8x64xf32>
    %929 = tpu.matmul %926, %928, %cst_400 {dimension_numbers = #tpu.dot_dimension_numbers<[1], [0], [0], [1], [0, 0, 1, 1], [], []>} : vector<8x32xbf16>, vector<32x64xbf16>, vector<8x64xf32> -> vector<8x64xf32>
    %c1_401 = arith.constant 1 : index
    %c0_402 = arith.constant 0 : index
    %c0_403 = arith.constant 0 : index
    %930 = vector.load %arg38[%c1_401, %c0_402, %c0_403] : memref<2x1x64xf32, #tpu.memory_space<vmem>>, vector<1x1x64xf32>
    %931 = vector.shape_cast %930 : vector<1x1x64xf32> to vector<1x64xf32>
    %932 = vector.broadcast %931 : vector<1x64xf32> to vector<8x64xf32>
    %933 = arith.addf %929, %932 : vector<8x64xf32>
    %cst_404 = arith.constant 0.000000e+00 : f32
    %934 = vector.broadcast %cst_404 : f32 to vector<8x64xf32>
    %935 = arith.maximumf %933, %934 : vector<8x64xf32>
    %936 = arith.truncf %935 : vector<8x64xf32> to vector<8x64xbf16>
    %c1_405 = arith.constant 1 : index
    %c0_406 = arith.constant 0 : index
    %c0_407 = arith.constant 0 : index
    %937 = vector.load %arg39[%c1_405, %c0_406, %c0_407] : memref<2x64x32xbf16, #tpu.memory_space<vmem>>, vector<1x64x32xbf16>
    %938 = vector.shape_cast %937 : vector<1x64x32xbf16> to vector<64x32xbf16>
    %cst_408 = arith.constant dense<0.000000e+00> : vector<8x32xf32>
    %939 = tpu.matmul %936, %938, %cst_408 {dimension_numbers = #tpu.dot_dimension_numbers<[1], [0], [0], [1], [0, 0, 1, 1], [], []>} : vector<8x64xbf16>, vector<64x32xbf16>, vector<8x32xf32> -> vector<8x32xf32>
    %c1_409 = arith.constant 1 : index
    %c0_410 = arith.constant 0 : index
    %c0_411 = arith.constant 0 : index
    %940 = vector.load %arg40[%c1_409, %c0_410, %c0_411] : memref<2x1x32xf32, #tpu.memory_space<vmem>>, vector<1x1x32xf32>
    %941 = vector.shape_cast %940 : vector<1x1x32xf32> to vector<1x32xf32>
    %942 = vector.broadcast %941 : vector<1x32xf32> to vector<8x32xf32>
    %943 = arith.addf %939, %942 : vector<8x32xf32>
    %944 = arith.addf %925, %943 : vector<8x32xf32>
    %c1_412 = arith.constant 1 : index
    %c0_413 = arith.constant 0 : index
    %c0_414 = arith.constant 0 : index
    %945 = vector.load %arg41[%c1_412, %c0_413, %c0_414] : memref<2x1x32xf32, #tpu.memory_space<vmem>>, vector<1x1x32xf32>
    %946 = vector.shape_cast %945 : vector<1x1x32xf32> to vector<1x32xf32>
    %c1_415 = arith.constant 1 : index
    %c0_416 = arith.constant 0 : index
    %c0_417 = arith.constant 0 : index
    %947 = vector.load %arg42[%c1_415, %c0_416, %c0_417] : memref<2x1x32xf32, #tpu.memory_space<vmem>>, vector<1x1x32xf32>
    %948 = vector.shape_cast %947 : vector<1x1x32xf32> to vector<1x32xf32>
    %cst_418 = arith.constant dense<0.000000e+00> : vector<8xf32>
    %949 = vector.multi_reduction <add>, %944, %cst_418 [1] : vector<8x32xf32> to vector<8xf32>
    %950 = vector.shape_cast %949 : vector<8xf32> to vector<8x1xf32>
    %cst_419 = arith.constant 3.200000e+01 : f32
    %951 = vector.broadcast %cst_419 : f32 to vector<8x1xf32>
    %952 = arith.divf %950, %951 : vector<8x1xf32>
    %953 = vector.broadcast %952 : vector<8x1xf32> to vector<8x32xf32>
    %954 = arith.subf %944, %953 : vector<8x32xf32>
    %955 = arith.mulf %954, %954 : vector<8x32xf32>
    %cst_420 = arith.constant dense<0.000000e+00> : vector<8xf32>
    %956 = vector.multi_reduction <add>, %955, %cst_420 [1] : vector<8x32xf32> to vector<8xf32>
    %957 = vector.shape_cast %956 : vector<8xf32> to vector<8x1xf32>
    %cst_421 = arith.constant 3.200000e+01 : f32
    %958 = vector.broadcast %cst_421 : f32 to vector<8x1xf32>
    %959 = arith.divf %957, %958 : vector<8x1xf32>
    %cst_422 = arith.constant 9.99999997E-7 : f32
    %960 = vector.broadcast %cst_422 : f32 to vector<8x1xf32>
    %961 = arith.addf %959, %960 : vector<8x1xf32>
    %962 = math.rsqrt %961 : vector<8x1xf32>
    %963 = vector.broadcast %962 : vector<8x1xf32> to vector<8x32xf32>
    %964 = arith.mulf %954, %963 : vector<8x32xf32>
    %965 = vector.broadcast %946 : vector<1x32xf32> to vector<8x32xf32>
    %966 = arith.mulf %964, %965 : vector<8x32xf32>
    %967 = vector.broadcast %948 : vector<1x32xf32> to vector<8x32xf32>
    %968 = arith.addf %966, %967 : vector<8x32xf32>
    %969 = arith.truncf %968 : vector<8x32xf32> to vector<8x32xbf16>
    %c0_423 = arith.constant 0 : index
    %c0_424 = arith.constant 0 : index
    %970 = vector.load %arg43[%c0_423, %c0_424] : memref<32x16xbf16, #tpu.memory_space<vmem>>, vector<32x16xbf16>
    %cst_425 = arith.constant dense<0.000000e+00> : vector<8x16xf32>
    %971 = tpu.matmul %969, %970, %cst_425 {dimension_numbers = #tpu.dot_dimension_numbers<[1], [0], [0], [1], [0, 0, 1, 1], [], []>} : vector<8x32xbf16>, vector<32x16xbf16>, vector<8x16xf32> -> vector<8x16xf32>
    %c0_426 = arith.constant 0 : index
    %c0_427 = arith.constant 0 : index
    %972 = vector.load %arg44[%c0_426, %c0_427] : memref<1x16xf32, #tpu.memory_space<vmem>>, vector<1x16xf32>
    %973 = vector.broadcast %972 : vector<1x16xf32> to vector<8x16xf32>
    %974 = arith.addf %971, %973 : vector<8x16xf32>
    %c0_428 = arith.constant 0 : index
    %c0_429 = arith.constant 0 : index
    %c0_430 = arith.constant 0 : index
    %975 = vector.load %arg45[%c0_428, %c0_429, %c0_430] : memref<1x8x16xf32, #tpu.memory_space<vmem>>, vector<1x8x16xf32>
    %976 = vector.shape_cast %975 : vector<1x8x16xf32> to vector<8x16xf32>
    %977 = vector.shape_cast %974 : vector<8x16xf32> to vector<1x8x16xf32>
    tpu.vector_store %arg45[%c0_428, %c0_429, %c0_430], %977 {strides = array<i32>} : memref<1x8x16xf32, #tpu.memory_space<vmem>>, vector<1x8x16xf32>,
    return
  }
  func.func @transform_0(%arg0: i32) -> (i32, i32, i32) {
    %c0_i32 = arith.constant 0 : i32
    %c0_i32_0 = arith.constant 0 : i32
    %c0_i32_1 = arith.constant 0 : i32
    return %arg0, %c0_i32, %c0_i32_0 : i32, i32, i32
  }
  func.func @transform_1(%arg0: i32) -> (i32, i32, i32) {
    %c0_i32 = arith.constant 0 : i32
    %c0_i32_0 = arith.constant 0 : i32
    %c0_i32_1 = arith.constant 0 : i32
    return %arg0, %c0_i32, %c0_i32_0 : i32, i32, i32
  }
  func.func @transform_2(%arg0: i32) -> (i32, i32, i32) {
    %c0_i32 = arith.constant 0 : i32
    %c0_i32_0 = arith.constant 0 : i32
    %c0_i32_1 = arith.constant 0 : i32
    return %arg0, %c0_i32, %c0_i32_0 : i32, i32, i32
  }
  func.func @transform_3(%arg0: i32) -> (i32, i32, i32) {
    %c0_i32 = arith.constant 0 : i32
    %c0_i32_0 = arith.constant 0 : i32
    %c0_i32_1 = arith.constant 0 : i32
    return %arg0, %c0_i32, %c0_i32_0 : i32, i32, i32
  }
  func.func @transform_4(%arg0: i32) -> (i32, i32) {
    %c0_i32 = arith.constant 0 : i32
    %c0_i32_0 = arith.constant 0 : i32
    %c0_i32_1 = arith.constant 0 : i32
    return %c0_i32, %c0_i32_0 : i32, i32
  }
  func.func @transform_5(%arg0: i32) -> (i32, i32) {
    %c0_i32 = arith.constant 0 : i32
    %c0_i32_0 = arith.constant 0 : i32
    %c0_i32_1 = arith.constant 0 : i32
    return %c0_i32, %c0_i32_0 : i32, i32
  }
  func.func @transform_6(%arg0: i32) -> (i32, i32) {
    %c0_i32 = arith.constant 0 : i32
    %c0_i32_0 = arith.constant 0 : i32
    %c0_i32_1 = arith.constant 0 : i32
    return %c0_i32, %c0_i32_0 : i32, i32
  }
  func.func @transform_7(%arg0: i32) -> (i32, i32) {
    %c0_i32 = arith.constant 0 : i32
    %c0_i32_0 = arith.constant 0 : i32
    %c0_i32_1 = arith.constant 0 : i32
    return %c0_i32, %c0_i32_0 : i32, i32
  }
  func.func @transform_8(%arg0: i32) -> (i32, i32) {
    %c0_i32 = arith.constant 0 : i32
    %c0_i32_0 = arith.constant 0 : i32
    %c0_i32_1 = arith.constant 0 : i32
    return %c0_i32, %c0_i32_0 : i32, i32
  }
  func.func @transform_9(%arg0: i32) -> (i32, i32) {
    %c0_i32 = arith.constant 0 : i32
    %c0_i32_0 = arith.constant 0 : i32
    %c0_i32_1 = arith.constant 0 : i32
    return %c0_i32, %c0_i32_0 : i32, i32
  }
  func.func @transform_10(%arg0: i32) -> (i32, i32, i32) {
    %c0_i32 = arith.constant 0 : i32
    %c0_i32_0 = arith.constant 0 : i32
    %c0_i32_1 = arith.constant 0 : i32
    %c0_i32_2 = arith.constant 0 : i32
    return %c0_i32, %c0_i32_0, %c0_i32_1 : i32, i32, i32
  }
  func.func @transform_11(%arg0: i32) -> (i32, i32, i32) {
    %c0_i32 = arith.constant 0 : i32
    %c0_i32_0 = arith.constant 0 : i32
    %c0_i32_1 = arith.constant 0 : i32
    %c0_i32_2 = arith.constant 0 : i32
    return %c0_i32, %c0_i32_0, %c0_i32_1 : i32, i32, i32
  }
  func.func @transform_12(%arg0: i32) -> (i32, i32, i32) {
    %c0_i32 = arith.constant 0 : i32
    %c0_i32_0 = arith.constant 0 : i32
    %c0_i32_1 = arith.constant 0 : i32
    %c0_i32_2 = arith.constant 0 : i32
    return %c0_i32, %c0_i32_0, %c0_i32_1 : i32, i32, i32
  }
  func.func @transform_13(%arg0: i32) -> (i32, i32, i32) {
    %c0_i32 = arith.constant 0 : i32
    %c0_i32_0 = arith.constant 0 : i32
    %c0_i32_1 = arith.constant 0 : i32
    %c0_i32_2 = arith.constant 0 : i32
    return %c0_i32, %c0_i32_0, %c0_i32_1 : i32, i32, i32
  }
  func.func @transform_14(%arg0: i32) -> (i32, i32, i32) {
    %c0_i32 = arith.constant 0 : i32
    %c0_i32_0 = arith.constant 0 : i32
    %c0_i32_1 = arith.constant 0 : i32
    %c0_i32_2 = arith.constant 0 : i32
    return %c0_i32, %c0_i32_0, %c0_i32_1 : i32, i32, i32
  }
  func.func @transform_15(%arg0: i32) -> (i32, i32, i32) {
    %c0_i32 = arith.constant 0 : i32
    %c0_i32_0 = arith.constant 0 : i32
    %c0_i32_1 = arith.constant 0 : i32
    %c0_i32_2 = arith.constant 0 : i32
    return %c0_i32, %c0_i32_0, %c0_i32_1 : i32, i32, i32
  }
  func.func @transform_16(%arg0: i32) -> (i32, i32, i32) {
    %c0_i32 = arith.constant 0 : i32
    %c0_i32_0 = arith.constant 0 : i32
    %c0_i32_1 = arith.constant 0 : i32
    %c0_i32_2 = arith.constant 0 : i32
    return %c0_i32, %c0_i32_0, %c0_i32_1 : i32, i32, i32
  }
  func.func @transform_17(%arg0: i32) -> (i32, i32, i32) {
    %c0_i32 = arith.constant 0 : i32
    %c0_i32_0 = arith.constant 0 : i32
    %c0_i32_1 = arith.constant 0 : i32
    %c0_i32_2 = arith.constant 0 : i32
    return %c0_i32, %c0_i32_0, %c0_i32_1 : i32, i32, i32
  }
  func.func @transform_18(%arg0: i32) -> (i32, i32, i32) {
    %c0_i32 = arith.constant 0 : i32
    %c0_i32_0 = arith.constant 0 : i32
    %c0_i32_1 = arith.constant 0 : i32
    %c0_i32_2 = arith.constant 0 : i32
    return %c0_i32, %c0_i32_0, %c0_i32_1 : i32, i32, i32
  }
  func.func @transform_19(%arg0: i32) -> (i32, i32, i32) {
    %c0_i32 = arith.constant 0 : i32
    %c0_i32_0 = arith.constant 0 : i32
    %c0_i32_1 = arith.constant 0 : i32
    %c0_i32_2 = arith.constant 0 : i32
    return %c0_i32, %c0_i32_0, %c0_i32_1 : i32, i32, i32
  }
  func.func @transform_20(%arg0: i32) -> (i32, i32, i32) {
    %c0_i32 = arith.constant 0 : i32
    %c0_i32_0 = arith.constant 0 : i32
    %c0_i32_1 = arith.constant 0 : i32
    %c0_i32_2 = arith.constant 0 : i32
    return %c0_i32, %c0_i32_0, %c0_i32_1 : i32, i32, i32
  }
  func.func @transform_21(%arg0: i32) -> (i32, i32, i32) {
    %c0_i32 = arith.constant 0 : i32
    %c0_i32_0 = arith.constant 0 : i32
    %c0_i32_1 = arith.constant 0 : i32
    %c0_i32_2 = arith.constant 0 : i32
    return %c0_i32, %c0_i32_0, %c0_i32_1 : i32, i32, i32
  }
  func.func @transform_22(%arg0: i32) -> (i32, i32, i32) {
    %c0_i32 = arith.constant 0 : i32
    %c0_i32_0 = arith.constant 0 : i32
    %c0_i32_1 = arith.constant 0 : i32
    %c0_i32_2 = arith.constant 0 : i32
    return %c0_i32, %c0_i32_0, %c0_i32_1 : i32, i32, i32
  }
  func.func @transform_23(%arg0: i32) -> (i32, i32, i32) {
    %c0_i32 = arith.constant 0 : i32
    %c0_i32_0 = arith.constant 0 : i32
    %c0_i32_1 = arith.constant 0 : i32
    %c0_i32_2 = arith.constant 0 : i32
    return %c0_i32, %c0_i32_0, %c0_i32_1 : i32, i32, i32
  }
  func.func @transform_24(%arg0: i32) -> (i32, i32, i32) {
    %c0_i32 = arith.constant 0 : i32
    %c0_i32_0 = arith.constant 0 : i32
    %c0_i32_1 = arith.constant 0 : i32
    %c0_i32_2 = arith.constant 0 : i32
    return %c0_i32, %c0_i32_0, %c0_i32_1 : i32, i32, i32
  }
  func.func @transform_25(%arg0: i32) -> (i32, i32, i32) {
    %c0_i32 = arith.constant 0 : i32
    %c0_i32_0 = arith.constant 0 : i32
    %c0_i32_1 = arith.constant 0 : i32
    %c0_i32_2 = arith.constant 0 : i32
    return %c0_i32, %c0_i32_0, %c0_i32_1 : i32, i32, i32
  }
  func.func @transform_26(%arg0: i32) -> (i32, i32, i32) {
    %c0_i32 = arith.constant 0 : i32
    %c0_i32_0 = arith.constant 0 : i32
    %c0_i32_1 = arith.constant 0 : i32
    %c0_i32_2 = arith.constant 0 : i32
    return %c0_i32, %c0_i32_0, %c0_i32_1 : i32, i32, i32
  }
  func.func @transform_27(%arg0: i32) -> (i32, i32, i32) {
    %c0_i32 = arith.constant 0 : i32
    %c0_i32_0 = arith.constant 0 : i32
    %c0_i32_1 = arith.constant 0 : i32
    %c0_i32_2 = arith.constant 0 : i32
    return %c0_i32, %c0_i32_0, %c0_i32_1 : i32, i32, i32
  }
  func.func @transform_28(%arg0: i32) -> (i32, i32, i32) {
    %c0_i32 = arith.constant 0 : i32
    %c0_i32_0 = arith.constant 0 : i32
    %c0_i32_1 = arith.constant 0 : i32
    %c0_i32_2 = arith.constant 0 : i32
    return %c0_i32, %c0_i32_0, %c0_i32_1 : i32, i32, i32
  }
  func.func @transform_29(%arg0: i32) -> (i32, i32, i32) {
    %c0_i32 = arith.constant 0 : i32
    %c0_i32_0 = arith.constant 0 : i32
    %c0_i32_1 = arith.constant 0 : i32
    %c0_i32_2 = arith.constant 0 : i32
    return %c0_i32, %c0_i32_0, %c0_i32_1 : i32, i32, i32
  }
  func.func @transform_30(%arg0: i32) -> (i32, i32, i32) {
    %c0_i32 = arith.constant 0 : i32
    %c0_i32_0 = arith.constant 0 : i32
    %c0_i32_1 = arith.constant 0 : i32
    %c0_i32_2 = arith.constant 0 : i32
    return %c0_i32, %c0_i32_0, %c0_i32_1 : i32, i32, i32
  }
  func.func @transform_31(%arg0: i32) -> (i32, i32, i32) {
    %c0_i32 = arith.constant 0 : i32
    %c0_i32_0 = arith.constant 0 : i32
    %c0_i32_1 = arith.constant 0 : i32
    %c0_i32_2 = arith.constant 0 : i32
    return %c0_i32, %c0_i32_0, %c0_i32_1 : i32, i32, i32
  }
  func.func @transform_32(%arg0: i32) -> (i32, i32, i32) {
    %c0_i32 = arith.constant 0 : i32
    %c0_i32_0 = arith.constant 0 : i32
    %c0_i32_1 = arith.constant 0 : i32
    %c0_i32_2 = arith.constant 0 : i32
    return %c0_i32, %c0_i32_0, %c0_i32_1 : i32, i32, i32
  }
  func.func @transform_33(%arg0: i32) -> (i32, i32, i32) {
    %c0_i32 = arith.constant 0 : i32
    %c0_i32_0 = arith.constant 0 : i32
    %c0_i32_1 = arith.constant 0 : i32
    %c0_i32_2 = arith.constant 0 : i32
    return %c0_i32, %c0_i32_0, %c0_i32_1 : i32, i32, i32
  }
  func.func @transform_34(%arg0: i32) -> (i32, i32, i32) {
    %c0_i32 = arith.constant 0 : i32
    %c0_i32_0 = arith.constant 0 : i32
    %c0_i32_1 = arith.constant 0 : i32
    %c0_i32_2 = arith.constant 0 : i32
    return %c0_i32, %c0_i32_0, %c0_i32_1 : i32, i32, i32
  }
  func.func @transform_35(%arg0: i32) -> (i32, i32, i32) {
    %c0_i32 = arith.constant 0 : i32
    %c0_i32_0 = arith.constant 0 : i32
    %c0_i32_1 = arith.constant 0 : i32
    %c0_i32_2 = arith.constant 0 : i32
    return %c0_i32, %c0_i32_0, %c0_i32_1 : i32, i32, i32
  }
  func.func @transform_36(%arg0: i32) -> (i32, i32, i32) {
    %c0_i32 = arith.constant 0 : i32
    %c0_i32_0 = arith.constant 0 : i32
    %c0_i32_1 = arith.constant 0 : i32
    %c0_i32_2 = arith.constant 0 : i32
    return %c0_i32, %c0_i32_0, %c0_i32_1 : i32, i32, i32
  }
  func.func @transform_37(%arg0: i32) -> (i32, i32, i32) {
    %c0_i32 = arith.constant 0 : i32
    %c0_i32_0 = arith.constant 0 : i32
    %c0_i32_1 = arith.constant 0 : i32
    %c0_i32_2 = arith.constant 0 : i32
    return %c0_i32, %c0_i32_0, %c0_i32_1 : i32, i32, i32
  }
  func.func @transform_38(%arg0: i32) -> (i32, i32, i32) {
    %c0_i32 = arith.constant 0 : i32
    %c0_i32_0 = arith.constant 0 : i32
    %c0_i32_1 = arith.constant 0 : i32
    %c0_i32_2 = arith.constant 0 : i32
    return %c0_i32, %c0_i32_0, %c0_i32_1 : i32, i32, i32
  }
  func.func @transform_39(%arg0: i32) -> (i32, i32, i32) {
    %c0_i32 = arith.constant 0 : i32
    %c0_i32_0 = arith.constant 0 : i32
    %c0_i32_1 = arith.constant 0 : i32
    %c0_i32_2 = arith.constant 0 : i32
    return %c0_i32, %c0_i32_0, %c0_i32_1 : i32, i32, i32
  }
  func.func @transform_40(%arg0: i32) -> (i32, i32, i32) {
    %c0_i32 = arith.constant 0 : i32
    %c0_i32_0 = arith.constant 0 : i32
    %c0_i32_1 = arith.constant 0 : i32
    %c0_i32_2 = arith.constant 0 : i32
    return %c0_i32, %c0_i32_0, %c0_i32_1 : i32, i32, i32
  }
  func.func @transform_41(%arg0: i32) -> (i32, i32, i32) {
    %c0_i32 = arith.constant 0 : i32
    %c0_i32_0 = arith.constant 0 : i32
    %c0_i32_1 = arith.constant 0 : i32
    %c0_i32_2 = arith.constant 0 : i32
    return %c0_i32, %c0_i32_0, %c0_i32_1 : i32, i32, i32
  }
  func.func @transform_42(%arg0: i32) -> (i32, i32) {
    %c0_i32 = arith.constant 0 : i32
    %c0_i32_0 = arith.constant 0 : i32
    %c0_i32_1 = arith.constant 0 : i32
    return %c0_i32, %c0_i32_0 : i32, i32
  }
  func.func @transform_43(%arg0: i32) -> (i32, i32) {
    %c0_i32 = arith.constant 0 : i32
    %c0_i32_0 = arith.constant 0 : i32
    %c0_i32_1 = arith.constant 0 : i32
    return %c0_i32, %c0_i32_0 : i32, i32
  }
  func.func @transform_44(%arg0: i32) -> (i32, i32, i32) {
    %c0_i32 = arith.constant 0 : i32
    %c0_i32_0 = arith.constant 0 : i32
    %c0_i32_1 = arith.constant 0 : i32
    return %arg0, %c0_i32, %c0_i32_0 : i32, i32, i32
  }
}

</mosaic_0001>

<bundles_post_ra>
// kernel: transformer_forward.1
= control target key start
LH: loop header
LB: loop body
LE: loop exit
PB: predicated region body
PF: predicated region fallthrough
CT: control target
= control target key end

     0   :  { %s5197_s6 = smov 1   ;;  %s5198_s10 = smov 2   ;;  %s6196_s0 = inlined_call_operand.smem [shape: u32[45], index: -1, kind: input, shape index: {}] }
   0x1   :  { %s5266_s5 = sld [smem:[%s6196_s0]]   ;;  %s5199_s14 = smov 3  }
   0x2   :  { %s5271_s9 = sld [smem:[%s6196_s0 + %s5197_s6]]   ;;  %s5200_s18 = smov 4  }
   0x3   :  { %s5276_s13 = sld [smem:[%s6196_s0 + %s5198_s10]]   ;;  %s5201_s22 = smov 5  }
   0x4   :  { %s5281_s17 = sld [smem:[%s6196_s0 + %s5199_s14]]   ;;  %s5202_s26 = smov 6  }
   0x5   :  { %s5286_s21 = sld [smem:[%s6196_s0 + %s5200_s18]]   ;;  %s5203_s30 = smov 7  }
   0x6   :  { %s5291_s25 = sld [smem:[%s6196_s0 + %s5201_s22]]   ;;  %s5204_s4 = smov 8  }
   0x7   :  { %6276 = sst [smem:[#allocation8_spill]] %s5266_s5  ;;  %s5205_s10 = smov 9  }
   0x8   :  { %6277 = sst [smem:[#allocation9_spill]] %s5271_s9  ;;  %s5206_s15 = smov 10  }
   0x9   :  { %6278 = sst [smem:[#allocation10_spill]] %s5276_s13  ;;  %s5207_s20 = smov 11  }
   0xa   :  { %6279 = sst [smem:[#allocation11_spill]] %s5281_s17  ;;  %s5209_s1 = smov 13  }
   0xb   :  { %6280 = sst [smem:[#allocation12_spill]] %s5286_s21  ;;  %s5210_s7 = smov 14  }
   0xc   :  { %6281 = sst [smem:[#allocation13_spill]] %s5291_s25  ;;  %s5212_s22 = smov 16  }
   0xd   :  { %s5296_s29 = sld [smem:[%s6196_s0 + %s5202_s26]]   ;;  %s5208_s26 = smov 12  }
   0xe   :  { %s5301_s3 = sld [smem:[%s6196_s0 + %s5203_s30]]   ;;  %s5213_s28 = smov 17  }
   0xf   :  { %s5306_s8 = sld [smem:[%s6196_s0 + %s5204_s4]]  }
  0x10   :  { %s5311_s14 = sld [smem:[%s6196_s0 + %s5205_s10]]  }
  0x11   :  { %s5316_s19 = sld [smem:[%s6196_s0 + %s5206_s15]]   ;;  %s5211_s15 = smov 15  }
  0x12   :  { %s5321_s24 = sld [smem:[%s6196_s0 + %s5207_s20]]  }
  0x13   :  { %6282 = sst [smem:[#allocation14_spill]] %s5296_s29 }
  0x14   :  { %6283 = sst [smem:[#allocation15_spill]] %s5301_s3 }
  0x15   :  { %6284 = sst [smem:[#allocation16_spill]] %s5306_s8 }
  0x16   :  { %6285 = sst [smem:[#allocation17_spill]] %s5311_s14 }
  0x17   :  { %6286 = sst [smem:[#allocation18_spill]] %s5316_s19 }
  0x18   :  { %6287 = sst [smem:[#allocation19_spill]] %s5321_s24 }
  0x19   :  { %s5326_s30 = sld [smem:[%s6196_s0 + %s5208_s26]]  }
  0x1a   :  { %s5331_s6 = sld [smem:[%s6196_s0 + %s5209_s1]]  }
  0x1b   :  { %s5336_s12 = sld [smem:[%s6196_s0 + %s5210_s7]]   ;;  %s5214_s7 = smov 18  }
  0x1c   :  { %s5341_s20 = sld [smem:[%s6196_s0 + %s5211_s15]]   ;;  %s5215_s15 = smov 19  }
  0x1d   :  { %s5346_s27 = sld [smem:[%s6196_s0 + %s5212_s22]]   ;;  %s5216_s22 = smov 20  }
  0x1e   :  { %s5351_s4 = sld [smem:[%s6196_s0 + %s5213_s28]]   ;;  %s5217_s28 = smov 21  }
  0x1f   :  { %6288 = sst [smem:[#allocation20_spill]] %s5326_s30 }
  0x20   :  { %6289 = sst [smem:[#allocation21_spill]] %s5331_s6 }
  0x21   :  { %6290 = sst [smem:[#allocation22_spill]] %s5336_s12 }
  0x22   :  { %6291 = sst [smem:[#allocation23_spill]] %s5341_s20 }
  0x23   :  { %6292 = sst [smem:[#allocation24_spill]] %s5346_s27 }
  0x24   :  { %6293 = sst [smem:[#allocation25_spill]] %s5351_s4 }
  0x25   :  { %s5356_s14 = sld [smem:[%s6196_s0 + %s5214_s7]]   ;;  %s5218_s7 = smov 22  }
  0x26   :  { %s5361_s8 = sld [smem:[%s6196_s0 + %s5215_s15]]   ;;  %s5219_s15 = smov 23  }
  0x27   :  { %s5366_s25 = sld [smem:[%s6196_s0 + %s5216_s22]]   ;;  %s5220_s22 = smov 24  }
  0x28   :  { %s5371_s9 = sld [smem:[%s6196_s0 + %s5217_s28]]   ;;  %s5221_s28 = smov 25  }
  0x29   :  { %s5376_s4 = sld [smem:[%s6196_s0 + %s5218_s7]]   ;;  %s5222_s7 = smov 26  }
  0x2b   :  { %6294 = sst [smem:[#allocation26_spill]] %s5356_s14 }
  0x2c   :  { %6295 = sst [smem:[#allocation27_spill]] %s5361_s8 }
  0x2d   :  { %6296 = sst [smem:[#allocation28_spill]] %s5366_s25 }
  0x2e   :  { %6297 = sst [smem:[#allocation29_spill]] %s5371_s9 }
  0x2f   :  { %6298 = sst [smem:[#allocation30_spill]] %s5376_s4 }
  0x30   :  { %s5381_s8 = sld [smem:[%s6196_s0 + %s5219_s15]]   ;;  %s5223_s15 = smov 27  }
  0x31   :  { %s5386_s25 = sld [smem:[%s6196_s0 + %s5220_s22]]   ;;  %s5224_s22 = smov 28  }
  0x32   :  { %s5391_s9 = sld [smem:[%s6196_s0 + %s5221_s28]]   ;;  %s5225_s28 = smov 29  }
  0x33   :  { %s5396_s4 = sld [smem:[%s6196_s0 + %s5222_s7]]   ;;  %s5226_s7 = smov 30  }
  0x36   :  { %6299 = sst [smem:[#allocation31_spill]] %s5381_s8 }
  0x37   :  { %6300 = sst [smem:[#allocation32_spill]] %s5386_s25 }
  0x38   :  { %6301 = sst [smem:[#allocation33_spill]] %s5391_s9 }
  0x39   :  { %6302 = sst [smem:[#allocation34_spill]] %s5396_s4 }
  0x3a   :  { %s5401_s8 = sld [smem:[%s6196_s0 + %s5223_s15]]   ;;  %s5227_s15 = smov 31  }
  0x3b   :  { %s5406_s25 = sld [smem:[%s6196_s0 + %s5224_s22]]   ;;  %s5228_s22 = smov 32  }
  0x3c   :  { %s5411_s9 = sld [smem:[%s6196_s0 + %s5225_s28]]   ;;  %s5229_s28 = smov 33  }
  0x3d   :  { %s5416_s4 = sld [smem:[%s6196_s0 + %s5226_s7]]   ;;  %s5230_s7 = smov 34  }
  0x40   :  { %6303 = sst [smem:[#allocation35_spill]] %s5401_s8 }
  0x41   :  { %6304 = sst [smem:[#allocation36_spill]] %s5406_s25 }
  0x42   :  { %6305 = sst [smem:[#allocation37_spill]] %s5411_s9 }
  0x43   :  { %6306 = sst [smem:[#allocation38_spill]] %s5416_s4 }
  0x44   :  { %s5421_s8 = sld [smem:[%s6196_s0 + %s5227_s15]]   ;;  %s5231_s15 = smov 35  }
  0x45   :  { %s5426_s25 = sld [smem:[%s6196_s0 + %s5228_s22]]   ;;  %s5232_s22 = smov 36  }
  0x46   :  { %s5431_s9 = sld [smem:[%s6196_s0 + %s5229_s28]]   ;;  %s5233_s28 = smov 37  }
  0x47   :  { %s5436_s4 = sld [smem:[%s6196_s0 + %s5230_s7]]   ;;  %s5234_s7 = smov 38  }
  0x4a   :  { %6307 = sst [smem:[#allocation39_spill]] %s5421_s8 }
  0x4b   :  { %6308 = sst [smem:[#allocation40_spill]] %s5426_s25 }
  0x4c   :  { %6309 = sst [smem:[#allocation41_spill]] %s5431_s9 }
  0x4d   :  { %6310 = sst [smem:[#allocation42_spill]] %s5436_s4 }
  0x4e   :  { %s5441_s8 = sld [smem:[%s6196_s0 + %s5231_s15]]   ;;  %s5235_s15 = smov 39  }
  0x4f   :  { %s5446_s25 = sld [smem:[%s6196_s0 + %s5232_s22]]   ;;  %s5236_s22 = smov 40  }
  0x50   :  { %s5451_s9 = sld [smem:[%s6196_s0 + %s5233_s28]]   ;;  %s5237_s28 = smov 41  }
  0x51   :  { %s5456_s4 = sld [smem:[%s6196_s0 + %s5234_s7]]   ;;  %s5238_s7 = smov 42  }
  0x54   :  { %6311 = sst [smem:[#allocation43_spill]] %s5441_s8 }
  0x55   :  { %6312 = sst [smem:[#allocation44_spill]] %s5446_s25 }
  0x56   :  { %6313 = sst [smem:[#allocation45_spill]] %s5451_s9 }
  0x57   :  { %6314 = sst [smem:[#allocation46_spill]] %s5456_s4 }
  0x58   :  { %s5461_s8 = sld [smem:[%s6196_s0 + %s5235_s15]]   ;;  %s5239_s15 = smov 43  }
  0x59   :  { %s5466_s25 = sld [smem:[%s6196_s0 + %s5236_s22]]   ;;  %s5240_s22 = smov 44  }
  0x5a   :  { %s5471_s9 = sld [smem:[%s6196_s0 + %s5237_s28]]  }
  0x5b   :  { %s5476_s4 = sld [smem:[%s6196_s0 + %s5238_s7]]  }
  0x5e   :  { %6315 = sst [smem:[#allocation47_spill]] %s5461_s8 }
  0x5f   :  { %6316 = sst [smem:[#allocation48_spill]] %s5466_s25 }
  0x60   :  { %s5481_s8 = sld [smem:[%s6196_s0 + %s5239_s15]]  }
  0x61   :  { %6317 = sst [smem:[#allocation49_spill]] %s5476_s4 }
  0x62   :  { %s5486_s25 = sld [smem:[%s6196_s0 + %s5240_s22]]  }
  0x66   :  { %6318 = sst [smem:[#allocation50_spill]] %s5481_s8 }
  0x68   :  { %6319 = sst [smem:[#allocation51_spill]] %s5486_s25 }
  0x69   :  { %94 = vsyncpa [#allocation3], 0 }
  0x6a   :  { %95 = vsyncpa [#allocation4], 0 }
  0x6b   :  { %97 = vsyncpa [#allocation4 + $0x1], 0  ;;  %s5488_s28 = smov 0   ;;  %s5490_s1 = smov 0  }
  0x6c   :  { %s5492_s2 = smov 0   ;;  %s5494_s7 = smov 0  }
  0x6d LB: > { %s6320_s30 = sld [smem:[#allocation20_spill]]  ;;  %s5509_s0 = sadd.s32 4294967295, %s5195_s7   ;;  %s5183_s28 = sphi %s5488_s28, %s6409_s28   ;;  %s5195_s7 = sphi %s5494_s7, %s6408_s7   ;;  %s5191_s2 = sphi %s5492_s2, %s6411_s2   ;;  %s5187_s1 = sphi %s5490_s1, %s6410_s1  }
  0x6e   : > { %s6321_s27 = sld [smem:[#allocation24_spill]]  ;;  %s4393_s10 = sadd.s32 4294967294, %s5195_s7  }
  0x6f   : > { %s6322_s20 = sld [smem:[#allocation23_spill]]  ;;  %s5513_s11 = sadd.s32 1, %s5195_s7  }
  0x70   : > { %s6323_s14 = sld [smem:[#allocation26_spill]]  ;;  %s1054_s15 = sadd.s32 1, %s5191_s2 }
  0x71   : > { %s6324_s12 = sld [smem:[#allocation22_spill]]  ;;  %s1051_s16 = ssub.s32 %s5195_s7, %s5513_s11 }
  0x72   : > { %s6325_s6 = sld [smem:[#allocation21_spill]]  ;;  %p1064_p0 = scmp.ne.s32.totalorder %s5191_s2, %s5187_s1 }
  0x73   : > { %s6326_s24 = sld [smem:[#allocation19_spill]]  ;;  %p1052_p1 = scmp.eq.s32.totalorder %s1051_s16, 0 }
  0x74   : > { %s6327_s19 = sld [smem:[#allocation18_spill]]  ;;  %p1065_p2 = scmp.eq.s32.totalorder %s5509_s0, 1 }
  0x75   : > { %s6328_s8 = sld [smem:[#allocation50_spill]]  ;;  %p1070_p3 = scmp.ne.s32.totalorder %s5187_s1, %s5183_s28 }
  0x76   : > { %6329 = sst [smem:[#allocation52_spill]] %s5183_s28  ;;  %p1071_p4 = scmp.eq.s32.totalorder %s4393_s10, 1 }
  0x77   : > { %6330 = sst [smem:[#allocation53_spill]] %s5187_s1  ;;  %p5526_p5 = por %p1065_p2, %p1064_p0 }
  0x78   : > { %6331 = sst [smem:[#allocation54_spill]] %s5191_s2  ;;  %p5530_p6 = por %p1071_p4, %p1070_p3 }
  0x79   : > { %6332 = sst [smem:[#allocation55_spill]] %s5195_s7  ;;  %p4394_p7 = scmp.ge.s32.totalorder %s5195_s7, 1 }
  0x7a   : > { %6333 = sst [smem:[#allocation56_spill]] %s5509_s0  ;;  %p1078_p8 = scmp.lt.s32.totalorder %s5195_s7, 3 }
  0x7b   : > { %6334 = sst [smem:[#allocation57_spill]] %s5513_s11  ;;  %p4834_p9 = scmp.eq.s32.totalorder %s5509_s0, 0 }
  0x7c   : > { %s5524_s18 = scalar_select %p1052_p1, %s5191_s2, %s1054_s15  }
  0x7d   : > { %s6336_s22 = scalar_select %p5526_p5, 1, 0 }
  0x7e   : > { %6335 = sst [smem:[#allocation58_spill]] %s5524_s18  ;;  %p5537_p10 = pnand %p4394_p7, %p1078_p8 }
  0x7f   : > { %6337 = sst [smem:[#allocation59_spill]] %s6336_s22  ;;  %s1207_s10 = sshll.u32 %s6328_s8, 4  ;;  %s1208_s10 = int_to_ptr.hbm [resolvable:$true] %s1207_s10 }
  0x80   : > { %s6338_s23 = scalar_select %p5530_p6, 1, 0 }
  0x81   : > { %p4826_p11 = pneg %p5537_p10  ;;  %s5241_s15 = smov [#allocation2]  }
  0x82   : > { %6339 = sst [smem:[#allocation60_spill]] %s6338_s23  ;;  %s1209_s16 = sshll.u32 %s5241_s15, 4  ;;  %s1210_s16 = int_to_ptr.vmem [resolvable:$true] %s1209_s16 }
  0x83   : > { %p5546_p12 = pnand %p4834_p9, %p4826_p11  ;;  %s5099_s2 = sshra.s32 %s1208_s10, 4  ;;  %s5100_s2 = int_to_ptr.hbm [resolvable:$true] %s5099_s2 }
  0x84   : > { %s5101_s11 = scalar_lea.hbm %s5100_s2, 1  ;;  %s5106_s23 = scalar_lea.hbm %s6328_s8, 1 }
  0x85   : > { %p5102_p13 = scmp.ne.s32.totalorder %s5100_s2, %s5101_s11  ;;  %p5103_p0 = pneg %p5546_p12 }
  0x86   : > { %p5107_p3 = scmp.lt.s32.totalorder %s5100_s2, %s6328_s8  ;;  %p5108_p4 = scmp.lt.s32.totalorder %s5106_s23, %s5101_s11 }
  0x87   : > { %p5104_p1 = pnand %p5103_p0, %p5102_p13 }
  0x88   : > { %p5109_p7 = por %p5108_p4, %p5107_p3 }
  0x89   : > { %p5105_p2 = pneg %p5104_p1 }
  0x8b   : > { %p5110_p8 = pnand %p5109_p7, %p5105_p2 }
  0x8d   : > { %5113 = shalt.err (!%p5110_p8)
}
  0x8e   : > { %4829 = dma.hbm_to_vmem [thread:$0]  (!%p5546_p12), %s1208_s10, 16, %s1210_s16, [#allocation3]  }
  0x8f   : > { %1248 = sbr.rel (%p5537_p10) target bundleno = 9937 (0x26d1), region = 196 }
  0x94   : > { %5174 = dma.done.wait (%p4834_p9), [#allocation3], 16  }
  0x95   : > { %5176 = vsyncadd (%p4834_p9), [#allocation3], 4294967280  ;;  %s6342_s5 = sld [smem:[#allocation8_spill]]  ;;  %p1364_p11 = scmp.lt.s32.totalorder %s5509_s0, 1  ;;  %vm1401_vm0 = vcmask 261120   ;;  %v5242_v5 = vmov 0  }
  0x96   : > { %s6343_s17 = sld [smem:[#allocation11_spill]]  ;;  %v5243_v8 = vmov 32.0   ;;  %v4767_v20 = vld [vmem:[%s6327_s19 + $0x8] sm:$0xff]  ;;  %v4766_v21 = vld [vmem:[%s6327_s19] sm:$0xff]  ;;  %s6225_s26 = smov 104   ;;  %vm1487_vm6 = vcmask 64512  }
  0x97   : > { %s6344_s21 = sld [smem:[#allocation12_spill]]  ;;  %4977 = vrcp.f32 %v5243_v8  ;;  %1469 = vmatpush.bf16.msra.mxu0 %v4767_v20  ;;  %v4932_v38 = vld [vmem:[%s6326_s24] ss:$0 sm:$0xff]  ;;  %s6250_s10 = smov 120   ;;  %vm1525_vm9 = vcmask 1043456   ;;  %vm1726_vm10 = vcmask 130048  }
  0x98   : > { %s5564_s2 = scalar_select %p1364_p11, %s5509_s0, 1  ;;  %vm1728_vm11 = vcmask 195584   ;;  %vm1870_vm15 = vcmask 523264  }
  0x99   : > { %s6345_s29 = sld [smem:[#allocation14_spill]]  ;;  %s6252_s15 = smov 96  }
  0x9a   : > { %s6224_s11 = sshll.u32 %s5564_s2, 3  ;;  %s6346_s3 = sld [smem:[#allocation15_spill]] }
  0x9b   : > { %s1367_s18 = scalar_lea.vmem %s6342_s5, %s6224_s11  ;;  %1470 = vmatpush.bf16.msra.mxu0 %v4766_v21  ;;  %s6227_s16 = smov 72  }
  0x9c   : > { %s1377_s23 = scalar_lea.vmem %s6343_s17, %s5564_s2  ;;  %v1395_v0 = vld [vmem:[%s1367_s18] sm:$0xff]  ;;  %s6248_s18 = smov 88  }
  0x9d   : > { %v1397_v1 = vld [vmem:[%s6344_s21] sm:$0xff]  ;;  %v1396_v2 = vmul.f32 2.0, %v1395_v0  ;;  %v4978_v9 = vpop.eup %4977  ;;  %s6229_s11 = smov 80   ;;  %s6347_s13 = sld [smem:[#allocation10_spill]] }
  0x9e   : > { %v1381_v3 = vld [vmem:[%s1377_s23] sm:$0x1]  ;;  %v1406_v10 = vmul.f32 32.0, %v4978_v9  ;;  %vm1410_vm2 = vweird.f32 %v4978_v9  ;;  %s6231_s23 = smov 112   ;;  %s6355_s5 = smov 80  }
  0x9f   : > { %vm1382_vm1 = vcmp.gt.f32.partialorder %v1381_v3, 0.0  ;;  %v1398_v4 = vadd.f32 %v1397_v1, %v1396_v2  ;;  %v4930_v31 = vld [vmem:[%s6345_s29] ss:$0 sm:$0xff]  ;;  %s6356_s8 = smov 72   ;;  %s6361_s17 = smov 48  }
  0xa0   : > { %v5574_v6 = vsel %vm1382_vm1, 1, %v5242_v5  ;;  %v1407_v11 = vsub.f32 1.0, %v1406_v10  ;;  %v4931_v34 = vld [vmem:[%s6346_s3] ss:$0 sm:$0xff]  ;;  %s6354_s3 = smov 112   ;;  %s6363_s21 = sld [smem:[#allocation13_spill]] }
  0xa1   : > { %v1402_v7 = vsel %vm1401_vm0, %v1398_v4, 0.0  ;;  %s6365_s29 = smov 24   ;;  %s6366_s28 = smov 16  }
  0xa2   : > { %1403 = vadd.xlane.f32.xlu0 %v1402_v7  ;;  %v1408_v12 = vmul.f32 %v4978_v9, %v1407_v11  ;;  %s6367_s7 = sshll.u32 %s5564_s2, 3  ;;  %s6387_s25 = sld [smem:[#allocation44_spill]] }
  0xa3   : > { %s6388_s0 = sld [smem:[#allocation46_spill]] }
  0xa4   : > { %v1409_v13 = vadd.f32 %v4978_v9, %v1408_v12  ;;  %s6389_s1 = sld [smem:[#allocation42_spill]] }
  0xa5   : > { %s6392_s4 = sld [smem:[#allocation47_spill]] }
  0xa6   : > { %v5577_v14 = vsel %vm1410_vm2, %v4978_v9, %v1409_v13 }
 0x115   : > { %v1404_v15 = vpop.xlane.xlu0 %1403 }
 0x116   : > { %v1412_v16 = vmul.f32 %v5577_v14, %v1404_v15 }
 0x118   : > { %v1413_v17 = vsub.f32 %v1398_v4, %v1412_v16 }
 0x11a   : > { %v1414_v18 = vmul.f32 %v1413_v17, %v1413_v17 }
 0x11c   : > { %v1415_v19 = vsel %vm1401_vm0, %v1414_v18, 0.0 }
 0x11d   : > { %1416 = vadd.xlane.f32.xlu0 %v1415_v19 }
 0x190   : > { %v1417_v22 = vpop.xlane.xlu0 %1416 }
 0x191   : > { %v1418_v23 = vmul.f32 %v1417_v22, %v5577_v14 }
 0x193   : > { %v1419_v24 = vadd.f32 1e-06, %v1418_v23 }
 0x195   : > { %4979 = vrsqrt.f32 %v1419_v24  ;;  %vm1426_vm4 = vweird.f32 %v1419_v24 }
 0x19b   : > { %v4980_v25 = vpop.eup %4979 }
 0x19c   : > { %v1421_v26 = vmul.f32 %v4980_v25, %v1419_v24  ;;  %vm1427_vm3 = vweird.f32 %v4980_v25 }
 0x19d   : > { %vm1428_vm5 = vmor %vm1426_vm4, %vm1427_vm3 }
 0x19e   : > { %v1422_v27 = vmul.f32 %v4980_v25, %v1421_v26 }
 0x1a0   : > { %v1423_v28 = vmul.f32 0.5, %v1422_v27 }
 0x1a2   : > { %v1424_v29 = vsub.f32 1.5, %v1423_v28 }
 0x1a4   : > { %v1425_v30 = vmul.f32 %v4980_v25, %v1424_v29 }
 0x1a6   : > { %v1429_v32 = vsel %vm1428_vm5, %v4980_v25, %v1425_v30 }
 0x1a7   : > { %v1430_v33 = vmul.f32 %v1429_v32, %v1413_v17 }
 0x1a9   : > { %v1434_v35 = vmul.f32 %v4930_v31, %v1430_v33 }
 0x1ab   : > { %v5586_v36 = vadd.f32 %v4931_v34, %v1434_v35 }
 0x1ad   : > { %v1439_v37 = vpack.c.bf16 %v5586_v36, %v5586_v36 }
 0x1af   : > { %4410 = vmatmul.msk.bf16.vlgmr.msra.gmra.mxu0 %vm1401_vm0, %v1439_v37 }
 0x22c   : > { %v1472_v39 = vpop.f32.mrf.mxu0 }
 0x22d   : > { %v1473_v40 = vadd.f32 %v4932_v38, %v1472_v39 }
 0x22f   : > { %v1476_v41 = vpack.c.bf16 %v1473_v40, %v1473_v40 }
 0x231   : > { %v1483_v42 = vunpack.c.l.b16 %v1476_v41 }
 0x233   : > { %v5592_v43 = vpack.c.b16 %v1483_v42, %v1483_v42 }
 0x234   : > { %v1474_v44 = vpop.f32.mrf.mxu0 }
 0x235   : > { %1656 = vrot.lane.b32.xlu0 %v5592_v43, %s6225_s26  ;;  %1542 = vrot.lane.b32.xlu2 %v5592_v43, %s6250_s10  ;;  %s1374_s26 = scalar_lea.vmem %s6347_s13, %s5564_s2  ;;  %s6357_s13 = smov 104  }
 0x236   : > { %1485 = vrot.lane.b32.xlu1 %v5592_v43, %s6252_s15  ;;  %v1379_v56 = vld [vmem:[%s1374_s26] sm:$0x1]  ;;  %s6235_s26 = smov 64   ;;  %s6372_s2 = smov 96  }
 0x237   : > { %vm1380_vm7 = vcmp.gt.f32.partialorder %v1379_v56, 0.0 }
 0x238   : > { %v1383_v57 = vsel %vm1380_vm7, 1, %v5242_v5 }
 0x239   : > { %v1384_v58 = vperm.slane %v1383_v57, 0 }
 0x23b   : > { %vm5619_vm8 = vcmp.eq.s32.totalorder %v1384_v58, 1 }
 0x23d   : > { %1658 = vrot.lane.b32.xlu2 %v5592_v43, %s6227_s16  ;;  %s6245_s16 = smov 56  }
 0x23e   : > { %1544 = vrot.lane.b32.xlu1 %v5592_v43, %s6248_s18 }
 0x245   : > { %1599 = vrot.lane.b32.xlu2 %v5592_v43, %s6231_s23  ;;  %s6233_s23 = smov 48  }
 0x246   : > { %1601 = vrot.lane.b32.xlu1 %v5592_v43, %s6229_s11  ;;  %s6237_s11 = smov 40  }
 0x28f   : > { %v1543_v45 = vpop.permute.xlu2 %1542 }
 0x297   : > { %v1659_v48 = vpop.permute.xlu2 %1658 }
 0x298   : > { %v1664_v51 = vsel %vm1487_vm6, %v1659_v48, 0 }
 0x29f   : > { %v1600_v54 = vpop.permute.xlu2 %1599 }
 0x2a7   : > { %v1657_v55 = vpop.permute.xlu0 %1656 }
 0x2a8   : > { %v1486_v46 = vpop.permute.xlu1 %1485 }
 0x2a9   : > { %v1492_v47 = vsel %vm1487_vm6, %v1486_v46, 0 }
 0x2aa   : > { %1501 = vmatpush.bf16.xpose.msra.mxu1 %v1492_v47 }
 0x2b0   : > { %v1545_v49 = vpop.permute.xlu1 %1544 }
 0x2b1   : > { %4411 = vmatmul.msk.bf16.vlgmr.msra.gmra.mxu1 %vm1487_vm6, %v1476_v41  ;;  %v1550_v50 = vsel %vm1487_vm6, %v1545_v49, 0 }
 0x2b2   : > { %1559 = vmatpush.bf16.xpose.msra.mxu3 %v1550_v50 }
 0x2b8   : > { %v1602_v52 = vpop.permute.xlu1 %1601 }
 0x2b9   : > { %4413 = vmatmul.msk.bf16.vlgmr.msra.gmra.mxu3 %vm1487_vm6, %v1543_v45  ;;  %v1607_v53 = vsel %vm1487_vm6, %v1602_v52, 0 }
 0x2ba   : > { %1673 = vmatpush.bf16.xpose.msrb.mxu3 %v1664_v51  ;;  %1616 = vmatpush.bf16.xpose.msrb.mxu0 %v1607_v53 }
 0x2c1   : > { %4415 = vmatmul.msk.bf16.vlgmr.msrb.gmra.mxu0 %vm1487_vm6, %v1600_v54 }
 0x2c9   : > { %4417 = vmatmul.msk.bf16.vlgmr.msrb.gmra.mxu3 %vm1487_vm6, %v1657_v55 }
 0x32e   : > { %v1503_v60 = vpop.f32.mrf.mxu1 }
 0x32f   : > { %v1507_v61 = vsel %vm5619_vm8, %v1503_v60, -1e+09 }
 0x330   : > { %v1508_v62 = vsel %vm1487_vm6, %v1507_v61, -inf }
 0x331   : > { %1509 = vmax.xlane.f32.xlu1 %v1508_v62 }
 0x336   : > { %v1505_v63 = vpop.f32.mrf.mxu1 }
 0x33c   : > { %v1561_v0 = vpop.f32.mrf.mxu3 }
 0x33d   : > { %v1565_v1 = vsel %vm5619_vm8, %v1561_v0, -1e+09 }
 0x33e   : > { %v1618_v2 = vpop.f32.mrf.mxu0  ;;  %v1566_v3 = vsel %vm1487_vm6, %v1565_v1, -inf }
 0x33f   : > { %1567 = vmax.xlane.f32.xlu2 %v1566_v3  ;;  %v1622_v4 = vsel %vm5619_vm8, %v1618_v2, -1e+09 }
 0x340   : > { %v1623_v8 = vsel %vm1487_vm6, %v1622_v4, -inf }
 0x344   : > { %v1563_v5 = vpop.f32.mrf.mxu3 }
 0x345   : > { %v4768_v5 = vld [vmem:[%s6320_s30] sm:$0xff] }
 0x346   : > { %v1620_v7 = vpop.f32.mrf.mxu0 }
 0x347   : > { %1624 = vmax.xlane.f32.xlu2 %v1623_v8 }
 0x34c   : > { %v1675_v9 = vpop.f32.mrf.mxu3 }
 0x34d   : > { %v1679_v10 = vsel %vm5619_vm8, %v1675_v9, -1e+09 }
 0x34e   : > { %v1680_v11 = vsel %vm1487_vm6, %v1679_v10, -inf }
 0x34f   : > { %1681 = vmax.xlane.f32.xlu0 %v1680_v11 }
 0x354   : > { %v1677_v12 = vpop.f32.mrf.mxu3 }
 0x35f   : > { %1520 = vrot.lane.b32.xlu2 %v5592_v43, %s6235_s26  ;;  %s6241_s26 = smov 24  }
 0x363   : > { %1578 = vrot.lane.b32.xlu0 %v5592_v43, %s6245_s16  ;;  %s6353_s16 = sld [smem:[#allocation29_spill]] }
 0x367   : > { %1692 = vrot.lane.b32.xlu2 %v5592_v43, %s6237_s11  ;;  %s6239_s11 = smov 16  }
 0x36b   : > { %1635 = vrot.lane.b32.xlu0 %v5592_v43, %s6233_s23  ;;  %s6243_s23 = smov 8  }
 0x3a4   : > { %v1510_v13 = vpop.xlane.xlu1 %1509 }
 0x3a5   : > { %v1511_v15 = vsub.f32 %v1507_v61, %v1510_v13 }
 0x3a7   : > { %v1512_v16 = vmul.f32 1.442695, %v1511_v15  ;;  %v4933_v15 = vld [vmem:[%s6325_s6] ss:$0 sm:$0xff] }
 0x3a9   : > { %4981 = vpow2.f32 %v1512_v16 }
 0x3af   : > { %v4982_v17 = vpop.eup %4981 }
 0x3b0   : > { %v1514_v18 = vsel %vm1487_vm6, %v4982_v17, 0.0 }
 0x3b1   : > { %1515 = vadd.xlane.f32.xlu1 %v1514_v18 }
 0x3b2   : > { %v1568_v19 = vpop.xlane.xlu2 %1567 }
 0x3b3   : > { %v1569_v20 = vsub.f32 %v1565_v1, %v1568_v19 }
 0x3b5   : > { %v1570_v21 = vmul.f32 1.442695, %v1569_v20 }
 0x3b7   : > { %4983 = vpow2.f32 %v1570_v21 }
 0x3ba   : > { %v1625_v22 = vpop.xlane.xlu2 %1624 }
 0x3bb   : > { %v1626_v29 = vsub.f32 %v1622_v4, %v1625_v22  ;;  %v4769_v4 = vld [vmem:[%s6320_s30 + $0x8] sm:$0xff] }
 0x3bc   : > { %1755 = vmatpush.bf16.msra.mxu0 %v4769_v4 }
 0x3bd   : > { %v4984_v23 = vpop.eup %4983  ;;  %v1627_v31 = vmul.f32 1.442695, %v1626_v29 }
 0x3be   : > { %v1572_v24 = vsel %vm1487_vm6, %v4984_v23, 0.0 }
 0x3bf   : > { %1573 = vadd.xlane.f32.xlu1 %v1572_v24 }
 0x3c0   : > { %1756 = vmatpush.bf16.msra.mxu0 %v4768_v5 }
 0x3c2   : > { %v1682_v25 = vpop.xlane.xlu0 %1681  ;;  %v1521_v26 = vpop.permute.xlu2 %1520 }
 0x3c3   : > { %v1683_v27 = vsub.f32 %v1679_v10, %v1682_v25  ;;  %v1527_v28 = vsel %vm1525_vm9, %v1521_v26, 0  ;;  %v4771_v26 = vld [vmem:[%s6321_s27 + $0x8] sm:$0xff] }
 0x3c4   : > { %1536 = vmatpush.bf16.msra.mxu2 %v1527_v28  ;;  %v4775_v28 = vld [vmem:[%s6323_s14 + $0x18] sm:$0xff] }
 0x3c5   : > { %v1684_v30 = vmul.f32 1.442695, %v1683_v27  ;;  %v4770_v27 = vld [vmem:[%s6321_s27] sm:$0xff]  ;;  %1878 = vmatpush.bf16.msra.mxu3 %v4775_v28 }
 0x3c7   : > { %4985 = vpow2.f32 %v1684_v30  ;;  %v4774_v30 = vld [vmem:[%s6323_s14 + $0x10] sm:$0xff] }
 0x3c8   : > { %4987 = vpow2.f32 %v1627_v31 }
 0x3c9   : > { %1879 = vmatpush.bf16.msra.mxu3 %v4774_v30 }
 0x3ca   : > { %v1693_v44 = vpop.permute.xlu2 %1692 }
 0x3cb   : > { %v1698_v46 = vsel %vm1525_vm9, %v1693_v44, 0 }
 0x3cd   : > { %v4986_v32 = vpop.eup %4985 }
 0x3ce   : > { %v1686_v33 = vsel %vm1487_vm6, %v4986_v32, 0.0  ;;  %v4988_v34 = vpop.eup %4987 }
 0x3cf   : > { %1687 = vadd.xlane.f32.xlu1 %v1686_v33  ;;  %v1629_v38 = vsel %vm1487_vm6, %v4988_v34, 0.0 }
 0x3d5   : > { %v1579_v35 = vpop.permute.xlu0 %1578 }
 0x3d6   : > { %v1584_v37 = vsel %vm1525_vm9, %v1579_v35, 0 }
 0x3d7   : > { %1593 = vmatpush.bf16.msrb.mxu2 %v1584_v37  ;;  %1630 = vadd.xlane.f32.xlu1 %v1629_v38 }
 0x3dd   : > { %v1636_v39 = vpop.permute.xlu0 %1635 }
 0x3de   : > { %v1641_v40 = vsel %vm1525_vm9, %v1636_v39, 0  ;;  %v4934_v39 = vld [vmem:[%s6324_s12] ss:$0 sm:$0xff] }
 0x3df   : > { %1650 = vmatpush.bf16.msrb.mxu1 %v1641_v40 }
 0x3e3   : > { %1825 = vmatpush.bf16.msra.mxu1 %v4771_v26 }
 0x3e7   : > { %1826 = vmatpush.bf16.msra.mxu1 %v4770_v27 }
 0x424   : > { %v1516_v41 = vpop.xlane.xlu1 %1515 }
 0x425   : > { %4989 = vrcp.f32 %v1516_v41  ;;  %v4935_v41 = vld [vmem:[%s6322_s20] ss:$0 sm:$0xff] }
 0x42b   : > { %v4990_v42 = vpop.eup %4989 }
 0x42c   : > { %v1518_v43 = vmul.f32 %v4990_v42, %v4982_v17 }
 0x42e   : > { %v1519_v45 = vpack.c.bf16 %v1518_v43, %v1518_v43 }
 0x430   : > { %4412 = vmatmul.msk.bf16.vlgmr.msra.gmra.mxu2 %vm1487_vm6, %v1519_v45 }
 0x431   : > { %1707 = vmatpush.bf16.msra.mxu2 %v1698_v46  ;;  %v4773_v46 = vld [vmem:[%s6323_s14 + $0x8] sm:$0xff] }
 0x432   : > { %v1574_v47 = vpop.xlane.xlu1 %1573  ;;  %1880 = vmatpush.bf16.msra.mxu3 %v4773_v46 }
 0x433   : > { %4991 = vrcp.f32 %v1574_v47  ;;  %v4772_v47 = vld [vmem:[%s6323_s14] sm:$0xff] }
 0x436   : > { %1881 = vmatpush.bf16.msra.mxu3 %v4772_v47 }
 0x439   : > { %v4992_v48 = vpop.eup %4991 }
 0x43a   : > { %v1576_v49 = vmul.f32 %v4992_v48, %v4984_v23 }
 0x43c   : > { %v1577_v50 = vpack.c.bf16 %v1576_v49, %v1576_v49 }
 0x440   : > { %4414 = vmatmul.msk.bf16.vlgmr.msrb.gmra.mxu2 %vm1487_vm6, %v1577_v50 }
 0x442   : > { %v1688_v51 = vpop.xlane.xlu1 %1687 }
 0x443   : > { %4993 = vrcp.f32 %v1688_v51 }
 0x449   : > { %v4994_v52 = vpop.eup %4993 }
 0x44a   : > { %v1690_v53 = vmul.f32 %v4994_v52, %v4986_v32  ;;  %v1631_v54 = vpop.xlane.xlu1 %1630 }
 0x44b   : > { %4995 = vrcp.f32 %v1631_v54 }
 0x44c   : > { %v1691_v55 = vpack.c.bf16 %v1690_v53, %v1690_v53 }
 0x450   : > { %4418 = vmatmul.msk.bf16.vlgmr.msra.gmra.mxu2 %vm1487_vm6, %v1691_v55 }
 0x451   : > { %v4996_v56 = vpop.eup %4995 }
 0x452   : > { %v1633_v57 = vmul.f32 %v4996_v56, %v4988_v34 }
 0x454   : > { %v1634_v58 = vpack.c.bf16 %v1633_v57, %v1633_v57 }
 0x456   : > { %4416 = vmatmul.msk.bf16.vlgmr.msrb.gmra.mxu1 %vm1487_vm6, %v1634_v58 }
 0x4b3   : > { %v1538_v60 = vpop.f32.mrf.mxu2 }
 0x4bb   : > { %v1540_v61 = vpop.f32.mrf.mxu2 }
 0x4c3   : > { %v1595_v62 = vpop.f32.mrf.mxu2 }
 0x4c4   : > { %1714 = vrot.lane.b32.xlu1 %v1595_v62, %s6243_s23  ;;  %s6352_s23 = sld [smem:[#allocation28_spill]] }
 0x4cb   : > { %v1597_v63 = vpop.f32.mrf.mxu2 }
 0x4d3   : > { %v1652_v0 = vpop.f32.mrf.mxu1  ;;  %v1709_v1 = vpop.f32.mrf.mxu2 }
 0x4d4   : > { %1722 = vrot.lane.b32.xlu0 %v1709_v1, %s6241_s26  ;;  %1718 = vrot.lane.b32.xlu2 %v1652_v0, %s6239_s11  ;;  %s6350_s11 = sld [smem:[#allocation25_spill]] }
 0x4d5   : > { %s6351_s26 = sld [smem:[#allocation27_spill]] }
 0x4da   : > { %v4936_v48 = vld [vmem:[%s6350_s11] ss:$0 sm:$0xff] }
 0x4db   : > { %v1654_v2 = vpop.f32.mrf.mxu1  ;;  %v1711_v3 = vpop.f32.mrf.mxu2  ;;  %v4937_v54 = vld [vmem:[%s6351_s26] ss:$0 sm:$0xff] }
 0x4dc   : > { %v4777_v2 = vld [vmem:[%s6327_s19 + $0x18] sm:$0xff]  ;;  %v4776_v3 = vld [vmem:[%s6327_s19 + $0x10] sm:$0xff]  ;;  %s6362_s19 = sld [smem:[#allocation9_spill]] }
 0x4dd   : > { %1952 = vmatpush.bf16.msrb.mxu2 %v4777_v2 }
 0x4e1   : > { %1953 = vmatpush.bf16.msrb.mxu2 %v4776_v3 }
 0x4e2   : > { %s1371_s22 = scalar_lea.vmem %s6362_s19, %s6367_s7  ;;  %s6368_s19 = sld [smem:[#allocation30_spill]] }
 0x4e3   : > { %s6370_s7 = sld [smem:[#allocation17_spill]] }
 0x52e   : > { %v1719_v9 = vpop.permute.xlu2 %1718 }
 0x536   : > { %v1715_v7 = vpop.permute.xlu1 %1714 }
 0x537   : > { %v1725_v8 = vsel %vm1487_vm6, %v1538_v60, %v1715_v7 }
 0x538   : > { %v1727_v11 = vsel %vm1726_vm10, %v1725_v8, %v1719_v9 }
 0x546   : > { %v1723_v10 = vpop.permute.xlu0 %1722 }
 0x547   : > { %v1729_v12 = vsel %vm1728_vm11, %v1727_v11, %v1723_v10 }
 0x548   : > { %v1730_v13 = vpack.c.bf16 %v1729_v12, %v1729_v12 }
 0x54a   : > { %4427 = vmatmul.msk.bf16.vlgmr.msra.gmra.mxu0 %vm1401_vm0, %v1730_v13 }
 0x5c7   : > { %v1758_v16 = vpop.f32.mrf.mxu0 }
 0x5c8   : > { %v1759_v17 = vadd.f32 %v4933_v15, %v1758_v16  ;;  %v4938_v15 = vld [vmem:[%s6352_s23] ss:$0 sm:$0xff] }
 0x5ca   : > { %v1762_v18 = vadd.f32 %v1759_v17, %v5586_v36  ;;  %v4939_v17 = vld [vmem:[%s6353_s16] ss:$0 sm:$0xff] }
 0x5cc   : > { %v1765_v19 = vsel %vm1401_vm0, %v1762_v18, 0.0 }
 0x5cd   : > { %1766 = vadd.xlane.f32.xlu2 %v1765_v19 }
 0x5cf   : > { %v1760_v20 = vpop.f32.mrf.mxu0 }
 0x640   : > { %v1767_v21 = vpop.xlane.xlu2 %1766 }
 0x641   : > { %v1768_v22 = vmul.f32 %v1767_v21, %v5577_v14 }
 0x643   : > { %v1769_v23 = vsub.f32 %v1762_v18, %v1768_v22  ;;  %v4940_v22 = vld [vmem:[%s6326_s24 + $0x1] ss:$0 sm:$0xff]  ;;  %s6364_s24 = smov 8  }
 0x645   : > { %v1770_v24 = vmul.f32 %v1769_v23, %v1769_v23 }
 0x647   : > { %v1771_v25 = vsel %vm1401_vm0, %v1770_v24, 0.0 }
 0x648   : > { %1772 = vadd.xlane.f32.xlu0 %v1771_v25 }
 0x6bb   : > { %v1773_v36 = vpop.xlane.xlu0 %1772 }
 0x6bc   : > { %v1774_v29 = vmul.f32 %v1773_v36, %v5577_v14 }
 0x6be   : > { %v1775_v31 = vadd.f32 1e-06, %v1774_v29 }
 0x6c0   : > { %4997 = vrsqrt.f32 %v1775_v31  ;;  %vm1782_vm13 = vweird.f32 %v1775_v31 }
 0x6c6   : > { %v4998_v32 = vpop.eup %4997 }
 0x6c7   : > { %v1777_v33 = vmul.f32 %v4998_v32, %v1775_v31  ;;  %vm1783_vm12 = vweird.f32 %v4998_v32 }
 0x6c8   : > { %vm1784_vm14 = vmor %vm1782_vm13, %vm1783_vm12 }
 0x6c9   : > { %v1778_v34 = vmul.f32 %v4998_v32, %v1777_v33 }
 0x6cb   : > { %v1779_v35 = vmul.f32 0.5, %v1778_v34 }
 0x6cd   : > { %v1780_v37 = vsub.f32 1.5, %v1779_v35 }
 0x6cf   : > { %v1781_v38 = vmul.f32 %v4998_v32, %v1780_v37 }
 0x6d1   : > { %v1785_v40 = vsel %vm1784_vm14, %v4998_v32, %v1781_v38 }
 0x6d2   : > { %v1786_v42 = vmul.f32 %v1785_v40, %v1769_v23 }
 0x6d4   : > { %v1790_v43 = vmul.f32 %v4934_v39, %v1786_v42 }
 0x6d6   : > { %v1794_v44 = vadd.f32 %v4935_v41, %v1790_v43 }
 0x6d8   : > { %v1795_v45 = vpack.c.bf16 %v1794_v44, %v1794_v44 }
 0x6da   : > { %4436 = vmatmul.msk.bf16.vlgmr.msra.gmra.mxu1 %vm1401_vm0, %v1795_v45 }
 0x757   : > { %v1828_v49 = vpop.f32.mrf.mxu1 }
 0x758   : > { %v1829_v50 = vadd.f32 %v4936_v48, %v1828_v49 }
 0x75a   : > { %v1832_v51 = vmax.f32 %v1829_v50, 0.0 }
 0x75c   : > { %v1833_v52 = vpack.c.bf16 %v1832_v51, %v1832_v51 }
 0x75e   : > { %4453 = vmatmul.msk.bf16.vlgmr.msra.gmra.mxu3 %vm1870_vm15, %v1833_v52 }
 0x75f   : > { %v1830_v53 = vpop.f32.mrf.mxu1 }
 0x7e1   : > { %v1883_v55 = vpop.f32.mrf.mxu3 }
 0x7e2   : > { %v1884_v56 = vadd.f32 %v4937_v54, %v1883_v55 }
 0x7e4   : > { %v1887_v57 = vadd.f32 %v1884_v56, %v1794_v44 }
 0x7e6   : > { %v1890_v58 = vsel %vm1401_vm0, %v1887_v57, 0.0 }
 0x7e7   : > { %1891 = vadd.xlane.f32.xlu1 %v1890_v58 }
 0x7e9   : > { %v1885_v60 = vpop.f32.mrf.mxu3 }
 0x85a   : > { %v1892_v61 = vpop.xlane.xlu1 %1891 }
 0x85b   : > { %v1893_v62 = vmul.f32 %v1892_v61, %v5577_v14 }
 0x85d   : > { %v1894_v63 = vsub.f32 %v1887_v57, %v1893_v62 }
 0x85f   : > { %v1895_v0 = vmul.f32 %v1894_v63, %v1894_v63 }
 0x861   : > { %v1896_v1 = vsel %vm1401_vm0, %v1895_v0, 0.0 }
 0x862   : > { %1897 = vadd.xlane.f32.xlu2 %v1896_v1 }
 0x8d5   : > { %v1898_v4 = vpop.xlane.xlu2 %1897 }
 0x8d6   : > { %v1899_v5 = vmul.f32 %v1898_v4, %v5577_v14 }
 0x8d8   : > { %v1900_v7 = vadd.f32 1e-06, %v1899_v5 }
 0x8da   : > { %4999 = vrsqrt.f32 %v1900_v7  ;;  %vm1907_vm2 = vweird.f32 %v1900_v7 }
 0x8e0   : > { %v5000_v8 = vpop.eup %4999 }
 0x8e1   : > { %v1902_v9 = vmul.f32 %v5000_v8, %v1900_v7  ;;  %vm1908_vm1 = vweird.f32 %v5000_v8 }
 0x8e2   : > { %vm1909_vm3 = vmor %vm1907_vm2, %vm1908_vm1 }
 0x8e3   : > { %v1903_v10 = vmul.f32 %v5000_v8, %v1902_v9 }
 0x8e5   : > { %v1904_v11 = vmul.f32 0.5, %v1903_v10 }
 0x8e7   : > { %v1905_v12 = vsub.f32 1.5, %v1904_v11 }
 0x8e9   : > { %v1906_v13 = vmul.f32 %v5000_v8, %v1905_v12 }
 0x8eb   : > { %v1910_v16 = vsel %vm1909_vm3, %v5000_v8, %v1906_v13 }
 0x8ec   : > { %v1911_v18 = vmul.f32 %v1910_v16, %v1894_v63 }
 0x8ee   : > { %v1915_v19 = vmul.f32 %v4938_v15, %v1911_v18 }
 0x8f0   : > { %v5690_v20 = vadd.f32 %v4939_v17, %v1915_v19 }
 0x8f2   : > { %v1920_v21 = vpack.c.bf16 %v5690_v20, %v5690_v20 }
 0x8f4   : > { %4467 = vmatmul.msk.bf16.vlgmr.msrb.gmra.mxu2 %vm1401_vm0, %v1920_v21 }
 0x977   : > { %v1955_v23 = vpop.f32.mrf.mxu2 }
 0x978   : > { %v1956_v24 = vadd.f32 %v4940_v22, %v1955_v23 }
 0x97a   : > { %v1959_v25 = vpack.c.bf16 %v1956_v24, %v1956_v24 }
 0x97c   : > { %v1968_v26 = vunpack.c.l.b16 %v1959_v25 }
 0x97e   : > { %v5696_v27 = vpack.c.b16 %v1968_v26, %v1968_v26 }
 0x97f   : > { %v1957_v28 = vpop.f32.mrf.mxu2 }
 0x980   : > { %1970 = vrot.lane.b32.xlu1 %v5696_v27, %s6252_s15  ;;  %2025 = vrot.lane.b32.xlu2 %v5696_v27, %s6250_s10  ;;  %s6359_s10 = smov 40   ;;  %s6360_s15 = smov 64  }
 0x981   : > { %2027 = vrot.lane.b32.xlu0 %v5696_v27, %s6248_s18  ;;  %s6358_s18 = smov 56  }
 0x988   : > { %2082 = vrot.lane.b32.xlu1 %v5696_v27, %s6354_s3  ;;  %2084 = vrot.lane.b32.xlu2 %v5696_v27, %s6355_s5 }
 0x989   : > { %2141 = vrot.lane.b32.xlu0 %v5696_v27, %s6356_s8 }
 0x991   : > { %2139 = vrot.lane.b32.xlu0 %v5696_v27, %s6357_s13 }
 0x9da   : > { %v2026_v36 = vpop.permute.xlu2 %2025 }
 0x9e2   : > { %v2085_v29 = vpop.permute.xlu2 %2084 }
 0x9e3   : > { %v2090_v33 = vsel %vm1487_vm6, %v2085_v29, 0 }
 0x9f2   : > { %v1971_v30 = vpop.permute.xlu1 %1970 }
 0x9f3   : > { %v1976_v31 = vsel %vm1487_vm6, %v1971_v30, 0  ;;  %v2028_v32 = vpop.permute.xlu0 %2027 }
 0x9f4   : > { %v2033_v34 = vsel %vm1487_vm6, %v2028_v32, 0  ;;  %1985 = vmatpush.bf16.xpose.msrb.mxu0 %v1976_v31 }
 0x9f5   : > { %2042 = vmatpush.bf16.xpose.msrb.mxu3 %v2033_v34 }
 0x9fa   : > { %v2083_v38 = vpop.permute.xlu1 %2082 }
 0x9fb   : > { %v2142_v35 = vpop.permute.xlu0 %2141  ;;  %4473 = vmatmul.msk.bf16.vlgmr.msrb.gmra.mxu0 %vm1487_vm6, %v1959_v25 }
 0x9fc   : > { %2099 = vmatpush.bf16.xpose.msra.mxu0 %v2090_v33  ;;  %v2147_v37 = vsel %vm1487_vm6, %v2142_v35, 0  ;;  %4475 = vmatmul.msk.bf16.vlgmr.msrb.gmra.mxu3 %vm1487_vm6, %v2026_v36 }
 0x9fd   : > { %2156 = vmatpush.bf16.xpose.msra.mxu3 %v2147_v37 }
 0xa03   : > { %v2140_v39 = vpop.permute.xlu0 %2139 }
 0xa0b   : > { %4477 = vmatmul.msk.bf16.vlgmr.msra.gmra.mxu0 %vm1487_vm6, %v2083_v38 }
 0xa0c   : > { %4479 = vmatmul.msk.bf16.vlgmr.msra.gmra.mxu3 %vm1487_vm6, %v2140_v39 }
 0xa78   : > { %v1987_v40 = vpop.f32.mrf.mxu0 }
 0xa79   : > { %v1991_v41 = vsel %vm5619_vm8, %v1987_v40, -1e+09 }
 0xa7a   : > { %v1992_v42 = vsel %vm1487_vm6, %v1991_v41, -inf }
 0xa7b   : > { %1993 = vmax.xlane.f32.xlu2 %v1992_v42 }
 0xa7f   : > { %v2044_v43 = vpop.f32.mrf.mxu3 }
 0xa80   : > { %v2048_v44 = vsel %vm5619_vm8, %v2044_v43, -1e+09  ;;  %v1989_v45 = vpop.f32.mrf.mxu0 }
 0xa81   : > { %v2049_v46 = vsel %vm1487_vm6, %v2048_v44, -inf }
 0xa82   : > { %2050 = vmax.xlane.f32.xlu0 %v2049_v46 }
 0xa87   : > { %v2046_v47 = vpop.f32.mrf.mxu3 }
 0xa88   : > { %v2101_v48 = vpop.f32.mrf.mxu0 }
 0xa89   : > { %v2105_v49 = vsel %vm5619_vm8, %v2101_v48, -1e+09  ;;  %v2409_v48 = vld [vmem:[%s1371_s22] sm:$0xff]  ;;  %s6371_s22 = sld [smem:[#allocation31_spill]] }
 0xa8a   : > { %v2106_v50 = vsel %vm1487_vm6, %v2105_v49, -inf }
 0xa8b   : > { %2107 = vmax.xlane.f32.xlu0 %v2106_v50  ;;  %v2411_v50 = vld [vmem:[%s6363_s21] sm:$0xff]  ;;  %s6369_s21 = sld [smem:[#allocation16_spill]] }
 0xa8f   : > { %v2158_v51 = vpop.f32.mrf.mxu3 }
 0xa90   : > { %v2162_v52 = vsel %vm5619_vm8, %v2158_v51, -1e+09  ;;  %v2103_v53 = vpop.f32.mrf.mxu0 }
 0xa91   : > { %v2163_v54 = vsel %vm1487_vm6, %v2162_v52, -inf  ;;  %v4779_v53 = vld [vmem:[%s6320_s30 + $0x18] sm:$0xff] }
 0xa92   : > { %2164 = vmax.xlane.f32.xlu1 %v2163_v54  ;;  %2236 = vmatpush.bf16.msrb.mxu0 %v4779_v53  ;;  %v4778_v54 = vld [vmem:[%s6320_s30 + $0x10] sm:$0xff]  ;;  %s6386_s30 = sld [smem:[#allocation41_spill]] }
 0xa96   : > { %2237 = vmatpush.bf16.msrb.mxu0 %v4778_v54 }
 0xa97   : > { %v2160_v55 = vpop.f32.mrf.mxu3 }
 0xa9f   : > { %2061 = vrot.lane.b32.xlu0 %v5696_v27, %s6358_s18 }
 0xaa7   : > { %2175 = vrot.lane.b32.xlu0 %v5696_v27, %s6359_s10 }
 0xaee   : > { %v1994_v56 = vpop.xlane.xlu2 %1993 }
 0xaef   : > { %v1995_v57 = vsub.f32 %v1991_v41, %v1994_v56 }
 0xaf1   : > { %v1996_v58 = vmul.f32 1.442695, %v1995_v57 }
 0xaf3   : > { %5001 = vpow2.f32 %v1996_v58 }
 0xaf5   : > { %v2051_v60 = vpop.xlane.xlu0 %2050 }
 0xaf6   : > { %v2052_v61 = vsub.f32 %v2048_v44, %v2051_v60 }
 0xaf8   : > { %v2053_v62 = vmul.f32 1.442695, %v2052_v61 }
 0xaf9   : > { %v5002_v63 = vpop.eup %5001 }
 0xafa   : > { %5003 = vpow2.f32 %v2053_v62  ;;  %v1998_v0 = vsel %vm1487_vm6, %v5002_v63, 0.0 }
 0xafb   : > { %1999 = vadd.xlane.f32.xlu1 %v1998_v0 }
 0xafe   : > { %v2108_v1 = vpop.xlane.xlu0 %2107 }
 0xaff   : > { %v2109_v2 = vsub.f32 %v2105_v49, %v2108_v1  ;;  %v2410_v49 = vmul.f32 2.0, %v2409_v48 }
 0xb00   : > { %v5004_v3 = vpop.eup %5003 }
 0xb01   : > { %v2110_v4 = vmul.f32 1.442695, %v2109_v2  ;;  %v2055_v5 = vsel %vm1487_vm6, %v5004_v3, 0.0  ;;  %v2412_v51 = vadd.f32 %v2411_v50, %v2410_v49  ;;  %v4783_v49 = vld [vmem:[%s6323_s14 + $0x28] sm:$0xff] }
 0xb02   : > { %2056 = vadd.xlane.f32.xlu2 %v2055_v5 }
 0xb03   : > { %5005 = vpow2.f32 %v2110_v4  ;;  %v4941_v4 = vld [vmem:[%s6325_s6 + $0x1] ss:$0 sm:$0xff]  ;;  %s6377_s6 = sld [smem:[#allocation32_spill]] }
 0xb05   : > { %v2165_v7 = vpop.xlane.xlu1 %2164 }
 0xb06   : > { %v2166_v8 = vsub.f32 %v2162_v52, %v2165_v7  ;;  %v2415_v52 = vsel %vm1401_vm0, %v2412_v51, 0.0 }
 0xb08   : > { %v2167_v9 = vmul.f32 1.442695, %v2166_v8 }
 0xb09   : > { %v5006_v10 = vpop.eup %5005 }
 0xb0a   : > { %5007 = vpow2.f32 %v2167_v9  ;;  %v2112_v11 = vsel %vm1487_vm6, %v5006_v10, 0.0 }
 0xb0b   : > { %2113 = vadd.xlane.f32.xlu1 %v2112_v11  ;;  %v4787_v11 = vld [vmem:[%s6368_s19 + $0x8] sm:$0xff] }
 0xb10   : > { %v5008_v12 = vpop.eup %5007 }
 0xb11   : > { %v2062_v13 = vpop.permute.xlu0 %2061  ;;  %v2169_v16 = vsel %vm1487_vm6, %v5008_v12, 0.0 }
 0xb12   : > { %v2067_v15 = vsel %vm1525_vm9, %v2062_v13, 0 }
 0xb13   : > { %2170 = vadd.xlane.f32.xlu1 %v2169_v16  ;;  %2076 = vmatpush.bf16.msra.mxu2 %v2067_v15 }
 0xb19   : > { %v2176_v17 = vpop.permute.xlu0 %2175 }
 0xb1a   : > { %2004 = vrot.lane.b32.xlu2 %v5696_v27, %s6360_s15  ;;  %v2181_v18 = vsel %vm1525_vm9, %v2176_v17, 0 }
 0xb1b   : > { %2190 = vmatpush.bf16.msrb.mxu2 %v2181_v18 }
 0xb2c   : > { %2118 = vrot.lane.b32.xlu1 %v5696_v27, %s6361_s17 }
 0xb6e   : > { %v2000_v19 = vpop.xlane.xlu1 %1999 }
 0xb6f   : > { %5009 = vrcp.f32 %v2000_v19 }
 0xb75   : > { %v2057_v21 = vpop.xlane.xlu2 %2056  ;;  %v5010_v22 = vpop.eup %5009 }
 0xb76   : > { %5011 = vrcp.f32 %v2057_v21  ;;  %v2002_v24 = vmul.f32 %v5010_v22, %v5002_v63 }
 0xb78   : > { %v2003_v30 = vpack.c.bf16 %v2002_v24, %v2002_v24 }
 0xb7c   : > { %v5012_v23 = vpop.eup %5011 }
 0xb7d   : > { %v2059_v25 = vmul.f32 %v5012_v23, %v5004_v3  ;;  %v2005_v26 = vpop.permute.xlu2 %2004  ;;  %v4942_v23 = vld [vmem:[%s6369_s21] ss:$0 sm:$0xff]  ;;  %s6373_s21 = smov 120  }
 0xb7e   : > { %v2010_v28 = vsel %vm1525_vm9, %v2005_v26, 0  ;;  %v2114_v36 = vpop.xlane.xlu1 %2113 }
 0xb7f   : > { %v2060_v29 = vpack.c.bf16 %v2059_v25, %v2059_v25  ;;  %2019 = vmatpush.bf16.msrb.mxu1 %v2010_v28  ;;  %v4943_v25 = vld [vmem:[%s6370_s7] ss:$0 sm:$0xff]  ;;  %s6374_s7 = smov 88  }
 0xb81   : > { %4476 = vmatmul.msk.bf16.vlgmr.msra.gmra.mxu2 %vm1487_vm6, %v2060_v29 }
 0xb82   : > { %4474 = vmatmul.msk.bf16.vlgmr.msrb.gmra.mxu1 %vm1487_vm6, %v2003_v30  ;;  %2475 = vmatpush.bf16.msra.mxu2 %v4787_v11  ;;  %v4947_v11 = vld [vmem:[%s6350_s11 + $0x1] ss:$0 sm:$0xff]  ;;  %s6378_s11 = sld [smem:[#allocation33_spill]] }
 0xb86   : > { %v2171_v27 = vpop.xlane.xlu1 %2170 }
 0xb87   : > { %5013 = vrcp.f32 %v2171_v27 }
 0xb88   : > { %5015 = vrcp.f32 %v2114_v36 }
 0xb8d   : > { %v5014_v31 = vpop.eup %5013 }
 0xb8e   : > { %v2173_v32 = vmul.f32 %v5014_v31, %v5008_v12  ;;  %v5016_v34 = vpop.eup %5015  ;;  %v4786_v12 = vld [vmem:[%s6368_s19] sm:$0xff] }
 0xb8f   : > { %v2116_v35 = vmul.f32 %v5016_v34, %v5006_v10  ;;  %2476 = vmatpush.bf16.msra.mxu2 %v4786_v12  ;;  %v4944_v34 = vld [vmem:[%s6371_s22] ss:$0 sm:$0xff] }
 0xb90   : > { %v2174_v33 = vpack.c.bf16 %v2173_v32, %v2173_v32 }
 0xb91   : > { %v2117_v39 = vpack.c.bf16 %v2116_v35, %v2116_v35 }
 0xb92   : > { %4480 = vmatmul.msk.bf16.vlgmr.msrb.gmra.mxu2 %vm1487_vm6, %v2174_v33 }
 0xb9e   : > { %v2119_v37 = vpop.permute.xlu1 %2118 }
 0xb9f   : > { %v2124_v38 = vsel %vm1525_vm9, %v2119_v37, 0 }
 0xba0   : > { %2133 = vmatpush.bf16.msra.mxu1 %v2124_v38 }
 0xba3   : > { %4478 = vmatmul.msk.bf16.vlgmr.msra.gmra.mxu1 %vm1487_vm6, %v2117_v39 }
 0xbff   : > { %v2021_v40 = vpop.f32.mrf.mxu1 }
 0xc04   : > { %v2078_v41 = vpop.f32.mrf.mxu2 }
 0xc05   : > { %2197 = vrot.lane.b32.xlu2 %v2078_v41, %s6364_s24 }
 0xc07   : > { %v2023_v42 = vpop.f32.mrf.mxu1 }
 0xc08   : > { %v4781_v42 = vld [vmem:[%s6321_s27 + $0x18] sm:$0xff] }
 0xc09   : > { %2310 = vmatpush.bf16.msrb.mxu1 %v4781_v42 }
 0xc0c   : > { %v2080_v43 = vpop.f32.mrf.mxu2 }
 0xc0d   : > { %v4780_v43 = vld [vmem:[%s6321_s27 + $0x10] sm:$0xff]  ;;  %s6385_s27 = sld [smem:[#allocation40_spill]] }
 0xc0e   : > { %2311 = vmatpush.bf16.msrb.mxu1 %v4780_v43 }
 0xc15   : > { %v2192_v44 = vpop.f32.mrf.mxu2 }
 0xc16   : > { %2205 = vrot.lane.b32.xlu2 %v2192_v44, %s6365_s29  ;;  %v4785_v44 = vld [vmem:[%s6323_s14 + $0x38] sm:$0xff] }
 0xc17   : > { %2364 = vmatpush.bf16.msrb.mxu3 %v4785_v44 }
 0xc1d   : > { %v2194_v45 = vpop.f32.mrf.mxu2 }
 0xc20   : > { %v2135_v46 = vpop.f32.mrf.mxu1 }
 0xc21   : > { %2201 = vrot.lane.b32.xlu0 %v2135_v46, %s6366_s28 }
 0xc28   : > { %v2137_v47 = vpop.f32.mrf.mxu1 }
 0xc29   : > { %v4784_v47 = vld [vmem:[%s6323_s14 + $0x30] sm:$0xff] }
 0xc2a   : > { %2365 = vmatpush.bf16.msrb.mxu3 %v4784_v47 }
 0xc2e   : > { %2366 = vmatpush.bf16.msrb.mxu3 %v4783_v49 }
 0xc4b   : > { %2416 = vadd.xlane.f32.xlu0 %v2415_v52 }
 0xc5f   : > { %v2198_v55 = vpop.permute.xlu2 %2197 }
 0xc60   : > { %v2208_v56 = vsel %vm1487_vm6, %v2021_v40, %v2198_v55 }
 0xc70   : > { %v2206_v58 = vpop.permute.xlu2 %2205 }
 0xc93   : > { %v2202_v57 = vpop.permute.xlu0 %2201 }
 0xc94   : > { %v2209_v60 = vsel %vm1726_vm10, %v2208_v56, %v2202_v57  ;;  %v4945_v56 = vld [vmem:[%s6324_s12 + $0x1] ss:$0 sm:$0xff]  ;;  %s6379_s12 = sld [smem:[#allocation38_spill]] }
 0xc95   : > { %v2210_v61 = vsel %vm1728_vm11, %v2209_v60, %v2206_v58  ;;  %v4782_v57 = vld [vmem:[%s6323_s14 + $0x20] sm:$0xff]  ;;  %s6380_s14 = sld [smem:[#allocation39_spill]] }
 0xc96   : > { %v2211_v62 = vpack.c.bf16 %v2210_v61, %v2210_v61  ;;  %v4946_v60 = vld [vmem:[%s6322_s20 + $0x1] ss:$0 sm:$0xff]  ;;  %2367 = vmatpush.bf16.msrb.mxu3 %v4782_v57  ;;  %s6381_s20 = sld [smem:[#allocation36_spill]] }
 0xc98   : > { %4489 = vmatmul.msk.bf16.vlgmr.msrb.gmra.mxu0 %vm1401_vm0, %v2211_v62 }
 0xcbe   : > { %v2417_v63 = vpop.xlane.xlu0 %2416 }
 0xcbf   : > { %v2418_v0 = vmul.f32 %v2417_v63, %v5577_v14 }
 0xcc1   : > { %v2419_v1 = vsub.f32 %v2412_v51, %v2418_v0 }
 0xcc3   : > { %v2420_v2 = vmul.f32 %v2419_v1, %v2419_v1 }
 0xcc5   : > { %v2421_v3 = vsel %vm1401_vm0, %v2420_v2, 0.0 }
 0xcc6   : > { %2422 = vadd.xlane.f32.xlu1 %v2421_v3 }
 0xd15   : > { %v2239_v5 = vpop.f32.mrf.mxu0 }
 0xd16   : > { %v2240_v7 = vadd.f32 %v4941_v4, %v2239_v5 }
 0xd18   : > { %v2243_v8 = vadd.f32 %v2240_v7, %v5690_v20 }
 0xd1a   : > { %v2248_v9 = vsel %vm1401_vm0, %v2243_v8, 0.0 }
 0xd1b   : > { %2249 = vadd.xlane.f32.xlu2 %v2248_v9 }
 0xd1d   : > { %v2241_v10 = vpop.f32.mrf.mxu0 }
 0xd39   : > { %v2423_v13 = vpop.xlane.xlu1 %2422 }
 0xd3a   : > { %v2424_v15 = vmul.f32 %v2423_v13, %v5577_v14 }
 0xd3c   : > { %v2425_v16 = vadd.f32 1e-06, %v2424_v15 }
 0xd3e   : > { %5017 = vrsqrt.f32 %v2425_v16  ;;  %vm2432_vm4 = vweird.f32 %v2425_v16 }
 0xd44   : > { %v5018_v17 = vpop.eup %5017 }
 0xd45   : > { %v2427_v18 = vmul.f32 %v5018_v17, %v2425_v16  ;;  %vm2433_vm5 = vweird.f32 %v5018_v17 }
 0xd46   : > { %vm2434_vm7 = vmor %vm2432_vm4, %vm2433_vm5 }
 0xd47   : > { %v2428_v19 = vmul.f32 %v5018_v17, %v2427_v18 }
 0xd49   : > { %v2429_v21 = vmul.f32 0.5, %v2428_v19 }
 0xd4b   : > { %v2430_v20 = vsub.f32 1.5, %v2429_v21  ;;  %v1386_v21 = vlaneseq }
 0xd4d   : > { %v2431_v22 = vmul.f32 %v5018_v17, %v2430_v20  ;;  %v1391_v20 = vperm.slane %v5574_v6, 0 }
 0xd4f   : > { %v2435_v24 = vsel %vm2434_vm7, %v5018_v17, %v2431_v22  ;;  %v1387_v22 = vshrl.u32 %v1386_v21, 7  ;;  %vm1392_vm1 = vcmp.eq.s32.totalorder %v1391_v20, 1 }
 0xd50   : > { %v2436_v26 = vmul.f32 %v2435_v24, %v2419_v1 }
 0xd52   : > { %v2440_v28 = vmul.f32 %v4942_v23, %v2436_v26  ;;  %v1389_v23 = vand.u32 127, %v1386_v21 }
 0xd54   : > { %v5776_v36 = vadd.f32 %v4943_v25, %v2440_v28  ;;  %vm1393_vm2 = vcmp.le.s32.totalorder %v1389_v23, %v1387_v22 }
 0xd55   : > { %vm5825_vm3 = vmand %vm1392_vm1, %vm1393_vm2 }
 0xd56   : > { %v2445_v29 = vpack.c.bf16 %v5776_v36, %v5776_v36 }
 0xd58   : > { %4542 = vmatmul.msk.bf16.vlgmr.msra.gmra.mxu2 %vm1401_vm0, %v2445_v29 }
 0xd8e   : > { %v2250_v30 = vpop.xlane.xlu2 %2249 }
 0xd8f   : > { %v2251_v27 = vmul.f32 %v2250_v30, %v5577_v14 }
 0xd91   : > { %v2252_v31 = vsub.f32 %v2243_v8, %v2251_v27 }
 0xd93   : > { %v2253_v32 = vmul.f32 %v2252_v31, %v2252_v31 }
 0xd95   : > { %v2254_v33 = vsel %vm1401_vm0, %v2253_v32, 0.0 }
 0xd96   : > { %2255 = vadd.xlane.f32.xlu0 %v2254_v33 }
 0xddb   : > { %v2478_v35 = vpop.f32.mrf.mxu2 }
 0xddc   : > { %v2479_v37 = vadd.f32 %v4944_v34, %v2478_v35 }
 0xdde   : > { %v2482_v38 = vpack.c.bf16 %v2479_v37, %v2479_v37 }
 0xde0   : > { %v2489_v39 = vunpack.c.l.b16 %v2482_v38 }
 0xde2   : > { %v5784_v40 = vpack.c.b16 %v2489_v39, %v2489_v39 }
 0xde3   : > { %v2480_v41 = vpop.f32.mrf.mxu2 }
 0xde4   : > { %2491 = vrot.lane.b32.xlu1 %v5784_v40, %s6372_s2  ;;  %2546 = vrot.lane.b32.xlu0 %v5784_v40, %s6373_s21 }
 0xde5   : > { %2548 = vrot.lane.b32.xlu2 %v5784_v40, %s6374_s7 }
 0xdec   : > { %2603 = vrot.lane.b32.xlu1 %v5784_v40, %s6354_s3  ;;  %2662 = vrot.lane.b32.xlu0 %v5784_v40, %s6356_s8 }
 0xded   : > { %2660 = vrot.lane.b32.xlu2 %v5784_v40, %s6357_s13 }
 0xdf4   : > { %2605 = vrot.lane.b32.xlu0 %v5784_v40, %s6355_s5 }
 0xe09   : > { %v2256_v45 = vpop.xlane.xlu0 %2255 }
 0xe0a   : > { %v2257_v46 = vmul.f32 %v2256_v45, %v5577_v14 }
 0xe0c   : > { %v2258_v48 = vadd.f32 1e-06, %v2257_v46 }
 0xe0e   : > { %5019 = vrsqrt.f32 %v2258_v48  ;;  %vm2265_vm13 = vweird.f32 %v2258_v48 }
 0xe14   : > { %v5020_v50 = vpop.eup %5019 }
 0xe15   : > { %v2260_v51 = vmul.f32 %v5020_v50, %v2258_v48  ;;  %vm2266_vm12 = vweird.f32 %v5020_v50 }
 0xe16   : > { %vm2267_vm14 = vmor %vm2265_vm13, %vm2266_vm12 }
 0xe17   : > { %v2261_v52 = vmul.f32 %v5020_v50, %v2260_v51 }
 0xe19   : > { %v2262_v53 = vmul.f32 0.5, %v2261_v52 }
 0xe1b   : > { %v2263_v54 = vsub.f32 1.5, %v2262_v53 }
 0xe1d   : > { %v2264_v55 = vmul.f32 %v5020_v50, %v2263_v54 }
 0xe1f   : > { %v2268_v58 = vsel %vm2267_vm14, %v5020_v50, %v2264_v55 }
 0xe20   : > { %v2269_v61 = vmul.f32 %v2268_v58, %v2252_v31 }
 0xe22   : > { %v2273_v62 = vmul.f32 %v4945_v56, %v2269_v61 }
 0xe24   : > { %v5809_v63 = vadd.f32 %v4946_v60, %v2273_v62 }
 0xe26   : > { %v2278_v0 = vpack.c.bf16 %v5809_v63, %v5809_v63 }
 0xe28   : > { %4505 = vmatmul.msk.bf16.vlgmr.msrb.gmra.mxu1 %vm1401_vm0, %v2278_v0 }
 0xe3f   : > { %v2549_v1 = vpop.permute.xlu2 %2548 }
 0xe40   : > { %v2554_v2 = vsel %vm1487_vm6, %v2549_v1, 0 }
 0xe41   : > { %2563 = vmatpush.bf16.xpose.msra.mxu3 %v2554_v2 }
 0xe47   : > { %v2661_v19 = vpop.permute.xlu2 %2660 }
 0xe56   : > { %v2492_v3 = vpop.permute.xlu1 %2491  ;;  %v2547_v4 = vpop.permute.xlu0 %2546 }
 0xe57   : > { %v2497_v5 = vsel %vm1487_vm6, %v2492_v3, 0 }
 0xe58   : > { %2506 = vmatpush.bf16.xpose.msra.mxu0 %v2497_v5 }
 0xe5e   : > { %v2663_v7 = vpop.permute.xlu0 %2662  ;;  %v2604_v10 = vpop.permute.xlu1 %2603 }
 0xe5f   : > { %4543 = vmatmul.msk.bf16.vlgmr.msra.gmra.mxu0 %vm1487_vm6, %v2482_v38  ;;  %v2668_v17 = vsel %vm1487_vm6, %v2663_v7, 0 }
 0xe66   : > { %v2606_v8 = vpop.permute.xlu0 %2605 }
 0xe67   : > { %v2611_v9 = vsel %vm1487_vm6, %v2606_v8, 0 }
 0xe68   : > { %2620 = vmatpush.bf16.xpose.msrb.mxu0 %v2611_v9 }
 0xe6f   : > { %4547 = vmatmul.msk.bf16.vlgmr.msrb.gmra.mxu0 %vm1487_vm6, %v2604_v10 }
 0xea5   : > { %v2313_v12 = vpop.f32.mrf.mxu1 }
 0xea6   : > { %v2314_v13 = vadd.f32 %v4947_v11, %v2313_v12 }
 0xea8   : > { %v2317_v15 = vmax.f32 %v2314_v13, 0.0 }
 0xeaa   : > { %v2318_v16 = vpack.c.bf16 %v2317_v15, %v2317_v15 }
 0xeac   : > { %4531 = vmatmul.msk.bf16.vlgmr.msrb.gmra.mxu3 %vm1870_vm15, %v2318_v16 }
 0xead   : > { %2677 = vmatpush.bf16.xpose.msrb.mxu3 %v2668_v17  ;;  %v2315_v18 = vpop.f32.mrf.mxu1 }
 0xebc   : > { %4545 = vmatmul.msk.bf16.vlgmr.msra.gmra.mxu3 %vm1487_vm6, %v2547_v4 }
 0xecc   : > { %4549 = vmatmul.msk.bf16.vlgmr.msrb.gmra.mxu3 %vm1487_vm6, %v2661_v19 }
 0xedc   : > { %v2508_v25 = vpop.f32.mrf.mxu0 }
 0xedd   : > { %v2512_v26 = vsel %vm5825_vm3, %v2508_v25, -1e+09 }
 0xede   : > { %v2513_v28 = vsel %vm1487_vm6, %v2512_v26, -inf }
 0xedf   : > { %2514 = vmax.xlane.f32.xlu0 %v2513_v28 }
 0xee4   : > { %v2510_v29 = vpop.f32.mrf.mxu0 }
 0xeec   : > { %v2622_v30 = vpop.f32.mrf.mxu0 }
 0xeed   : > { %v2626_v35 = vsel %vm5825_vm3, %v2622_v30, -1e+09 }
 0xeee   : > { %v2627_v38 = vsel %vm1487_vm6, %v2626_v35, -inf }
 0xef4   : > { %v2624_v27 = vpop.f32.mrf.mxu0 }
 0xf2f   : > { %v5832_v31 = vpop.f32.mrf.mxu3 }
 0xf37   : > { %v2371_v6 = vpop.f32.mrf.mxu3 }
 0xf3f   : > { %v2565_v32 = vpop.f32.mrf.mxu3 }
 0xf40   : > { %v2569_v33 = vsel %vm5825_vm3, %v2565_v32, -1e+09 }
 0xf41   : > { %v2570_v34 = vsel %vm1487_vm6, %v2569_v33, -inf }
 0xf42   : > { %2571 = vmax.xlane.f32.xlu2 %v2570_v34 }
 0xf47   : > { %v2567_v37 = vpop.f32.mrf.mxu3 }
 0xf48   : > { %v4948_v37 = vld [vmem:[%s6351_s26 + $0x1] ss:$0 sm:$0xff]  ;;  %s6384_s26 = sld [smem:[#allocation37_spill]] }
 0xf4a   : > { %2628 = vmax.xlane.f32.xlu2 %v2627_v38  ;;  %v2370_v38 = vadd.f32 %v4948_v37, %v5832_v31 }
 0xf4f   : > { %v2679_v39 = vpop.f32.mrf.mxu3 }
 0xf50   : > { %v2683_v41 = vsel %vm5825_vm3, %v2679_v39, -1e+09  ;;  %v2373_v39 = vadd.f32 %v2370_v38, %v5809_v63 }
 0xf51   : > { %v2684_v42 = vsel %vm1487_vm6, %v2683_v41, -inf }
 0xf52   : > { %2685 = vmax.xlane.f32.xlu1 %v2684_v42  ;;  %v2515_v43 = vpop.xlane.xlu0 %2514  ;;  %v4789_v42 = vld [vmem:[%s6377_s6 + $0x8] sm:$0xff] }
 0xf53   : > { %v2516_v44 = vsub.f32 %v2512_v26, %v2515_v43  ;;  %2757 = vmatpush.bf16.msra.mxu0 %v4789_v42  ;;  %v4788_v43 = vld [vmem:[%s6377_s6] sm:$0xff] }
 0xf55   : > { %v2517_v45 = vmul.f32 1.442695, %v2516_v44 }
 0xf57   : > { %5021 = vpow2.f32 %v2517_v45  ;;  %v2681_v46 = vpop.f32.mrf.mxu3  ;;  %2758 = vmatpush.bf16.msra.mxu0 %v4788_v43 }
 0xf5d   : > { %v5022_v47 = vpop.eup %5021 }
 0xf5e   : > { %v2519_v48 = vsel %vm1487_vm6, %v5022_v47, 0.0 }
 0xf5f   : > { %2520 = vadd.xlane.f32.xlu0 %v2519_v48 }
 0xf6b   : > { %2582 = vrot.lane.b32.xlu1 %v5784_v40, %s6358_s18 }
 0xf73   : > { %2639 = vrot.lane.b32.xlu1 %v5784_v40, %s6361_s17 }
 0xfb5   : > { %v2572_v49 = vpop.xlane.xlu2 %2571 }
 0xfb6   : > { %v2573_v50 = vsub.f32 %v2569_v33, %v2572_v49 }
 0xfb8   : > { %v2574_v51 = vmul.f32 1.442695, %v2573_v50 }
 0xfba   : > { %5023 = vpow2.f32 %v2574_v51 }
 0xfbd   : > { %v2629_v52 = vpop.xlane.xlu2 %2628 }
 0xfbe   : > { %v2630_v53 = vsub.f32 %v2626_v35, %v2629_v52 }
 0xfc0   : > { %v5024_v54 = vpop.eup %5023  ;;  %v2631_v55 = vmul.f32 1.442695, %v2630_v53 }
 0xfc1   : > { %v2576_v56 = vsel %vm1487_vm6, %v5024_v54, 0.0 }
 0xfc2   : > { %5025 = vpow2.f32 %v2631_v55  ;;  %2577 = vadd.xlane.f32.xlu2 %v2576_v56 }
 0xfc5   : > { %v2686_v57 = vpop.xlane.xlu1 %2685 }
 0xfc6   : > { %v2687_v58 = vsub.f32 %v2683_v41, %v2686_v57  ;;  %v2378_v41 = vsel %vm1401_vm0, %v2373_v39, 0.0 }
 0xfc8   : > { %v5026_v60 = vpop.eup %5025  ;;  %v2688_v61 = vmul.f32 1.442695, %v2687_v58 }
 0xfc9   : > { %v2633_v62 = vsel %vm1487_vm6, %v5026_v60, 0.0 }
 0xfca   : > { %5027 = vpow2.f32 %v2688_v61  ;;  %2634 = vadd.xlane.f32.xlu0 %v2633_v62  ;;  %v4793_v61 = vld [vmem:[%s6379_s12 + $0x8] sm:$0xff]  ;;  %v4792_v62 = vld [vmem:[%s6379_s12] sm:$0xff] }
 0xfcb   : > { %2864 = vmatpush.bf16.msra.mxu3 %v4793_v61 }
 0xfcf   : > { %2865 = vmatpush.bf16.msra.mxu3 %v4792_v62 }
 0xfd0   : > { %v5028_v0 = vpop.eup %5027 }
 0xfd1   : > { %v2690_v1 = vsel %vm1487_vm6, %v5028_v0, 0.0 }
 0xfd2   : > { %2691 = vadd.xlane.f32.xlu0 %v2690_v1  ;;  %v2521_v4 = vpop.xlane.xlu0 %2520 }
 0xfd3   : > { %5029 = vrcp.f32 %v2521_v4 }
 0xfd9   : > { %v5030_v7 = vpop.eup %5029 }
 0xfda   : > { %2525 = vrot.lane.b32.xlu2 %v5784_v40, %s6360_s15  ;;  %v2523_v9 = vmul.f32 %v5030_v7, %v5022_v47 }
 0xfdc   : > { %v2524_v17 = vpack.c.bf16 %v2523_v9, %v2523_v9  ;;  %v4950_v9 = vld [vmem:[%s6352_s23 + $0x1] ss:$0 sm:$0xff]  ;;  %s6383_s23 = sld [smem:[#allocation35_spill]] }
 0xfdd   : > { %v2583_v2 = vpop.permute.xlu1 %2582 }
 0xfde   : > { %v2588_v3 = vsel %vm1525_vm9, %v2583_v2, 0 }
 0xfdf   : > { %2597 = vmatpush.bf16.msrb.mxu2 %v2588_v3 }
 0xfe5   : > { %v2640_v10 = vpop.permute.xlu1 %2639 }
 0xfe6   : > { %2696 = vrot.lane.b32.xlu0 %v5784_v40, %s6359_s10  ;;  %v2645_v15 = vsel %vm1525_vm9, %v2640_v10, 0 }
0x1035   : > { %v2578_v5 = vpop.xlane.xlu2 %2577 }
0x1036   : > { %5031 = vrcp.f32 %v2578_v5 }
0x103c   : > { %v5032_v8 = vpop.eup %5031 }
0x103d   : > { %v2580_v11 = vmul.f32 %v5032_v8, %v5024_v54  ;;  %v2526_v12 = vpop.permute.xlu2 %2525  ;;  %v2635_v18 = vpop.xlane.xlu0 %2634  ;;  %v4949_v54 = vld [vmem:[%s6378_s11] ss:$0 sm:$0xff] }
0x103e   : > { %v2531_v13 = vsel %vm1525_vm9, %v2526_v12, 0  ;;  %5033 = vrcp.f32 %v2635_v18  ;;  %v4951_v12 = vld [vmem:[%s6353_s16 + $0x1] ss:$0 sm:$0xff]  ;;  %s6382_s16 = sld [smem:[#allocation34_spill]] }
0x103f   : > { %v2581_v16 = vpack.c.bf16 %v2580_v11, %v2580_v11  ;;  %2540 = vmatpush.bf16.msra.mxu1 %v2531_v13 }
0x1041   : > { %4546 = vmatmul.msk.bf16.vlgmr.msrb.gmra.mxu2 %vm1487_vm6, %v2581_v16 }
0x1042   : > { %4544 = vmatmul.msk.bf16.vlgmr.msra.gmra.mxu1 %vm1487_vm6, %v2524_v17 }
0x1043   : > { %2654 = vmatpush.bf16.msrb.mxu1 %v2645_v15 }
0x1044   : > { %v5034_v40 = vpop.eup %5033  ;;  %v4953_v43 = vld [vmem:[%s6382_s16] ss:$0 sm:$0xff] }
0x1045   : > { %v2692_v19 = vpop.xlane.xlu0 %2691  ;;  %v2637_v21 = vmul.f32 %v5034_v40, %v5026_v60 }
0x1046   : > { %5035 = vrcp.f32 %v2692_v19 }
0x1047   : > { %v2638_v20 = vpack.c.bf16 %v2637_v21, %v2637_v21 }
0x104c   : > { %v5036_v22 = vpop.eup %5035 }
0x104d   : > { %v2694_v23 = vmul.f32 %v5036_v22, %v5028_v0 }
0x104f   : > { %v2695_v28 = vpack.c.bf16 %v2694_v23, %v2694_v23 }
0x1052   : > { %4548 = vmatmul.msk.bf16.vlgmr.msrb.gmra.mxu1 %vm1487_vm6, %v2638_v20  ;;  %v4952_v20 = vld [vmem:[%s6380_s14] ss:$0 sm:$0xff] }
0x1058   : > { %v2697_v25 = vpop.permute.xlu0 %2696 }
0x1059   : > { %v2702_v26 = vsel %vm1525_vm9, %v2697_v25, 0 }
0x105a   : > { %2711 = vmatpush.bf16.msra.mxu2 %v2702_v26 }
0x105d   : > { %4550 = vmatmul.msk.bf16.vlgmr.msra.gmra.mxu2 %vm1487_vm6, %v2695_v28 }
0x10bf   : > { %v2542_v29 = vpop.f32.mrf.mxu1 }
0x10c4   : > { %v2599_v30 = vpop.f32.mrf.mxu2 }
0x10c5   : > { %2718 = vrot.lane.b32.xlu2 %v2599_v30, %s6364_s24 }
0x10c7   : > { %v2544_v27 = vpop.f32.mrf.mxu1 }
0x10c8   : > { %v4791_v27 = vld [vmem:[%s6381_s20 + $0x8] sm:$0xff] }
0x10c9   : > { %2827 = vmatpush.bf16.msra.mxu1 %v4791_v27 }
0x10cc   : > { %v2601_v6 = vpop.f32.mrf.mxu2 }
0x10cd   : > { %v4790_v6 = vld [vmem:[%s6381_s20] sm:$0xff] }
0x10ce   : > { %2828 = vmatpush.bf16.msra.mxu1 %v4790_v6 }
0x10cf   : > { %v2656_v32 = vpop.f32.mrf.mxu1 }
0x10d0   : > { %2722 = vrot.lane.b32.xlu1 %v2656_v32, %s6366_s28 }
0x10d7   : > { %v2658_v33 = vpop.f32.mrf.mxu1 }
0x10e0   : > { %v2713_v34 = vpop.f32.mrf.mxu2 }
0x10e1   : > { %2726 = vrot.lane.b32.xlu2 %v2713_v34, %s6365_s29 }
0x10e8   : > { %v2715_v35 = vpop.f32.mrf.mxu2 }
0x10fa   : > { %2379 = vadd.xlane.f32.xlu1 %v2378_v41 }
0x111f   : > { %v2719_v44 = vpop.permute.xlu2 %2718 }
0x1120   : > { %v2729_v45 = vsel %vm1487_vm6, %v2542_v29, %v2719_v44 }
0x113b   : > { %v2727_v47 = vpop.permute.xlu2 %2726 }
0x1142   : > { %v2723_v46 = vpop.permute.xlu1 %2722 }
0x1143   : > { %v2730_v48 = vsel %vm1726_vm10, %v2729_v45, %v2723_v46  ;;  %v4954_v45 = vld [vmem:[%s6383_s23] ss:$0 sm:$0xff] }
0x1144   : > { %v2731_v49 = vsel %vm1728_vm11, %v2730_v48, %v2727_v47 }
0x1145   : > { %v2732_v31 = vpack.c.bf16 %v2731_v49, %v2731_v49 }
0x1147   : > { %4559 = vmatmul.msk.bf16.vlgmr.msra.gmra.mxu0 %vm1401_vm0, %v2732_v31 }
0x116d   : > { %v2380_v63 = vpop.xlane.xlu1 %2379 }
0x116e   : > { %v2381_v50 = vmul.f32 %v2380_v63, %v5577_v14 }
0x1170   : > { %v2382_v51 = vsub.f32 %v2373_v39, %v2381_v50 }
0x1172   : > { %v2383_v52 = vmul.f32 %v2382_v51, %v2382_v51 }
0x1174   : > { %v2384_v53 = vsel %vm1401_vm0, %v2383_v52, 0.0 }
0x1175   : > { %2385 = vadd.xlane.f32.xlu2 %v2384_v53 }
0x11c4   : > { %v2760_v55 = vpop.f32.mrf.mxu0 }
0x11c5   : > { %v2761_v56 = vadd.f32 %v4949_v54, %v2760_v55  ;;  %v4955_v54 = vld [vmem:[%s6384_s26] ss:$0 sm:$0xff] }
0x11c7   : > { %v2764_v57 = vadd.f32 %v2761_v56, %v5776_v36 }
0x11c9   : > { %v2767_v58 = vsel %vm1401_vm0, %v2764_v57, 0.0 }
0x11ca   : > { %2768 = vadd.xlane.f32.xlu0 %v2767_v58 }
0x11cc   : > { %v2762_v60 = vpop.f32.mrf.mxu0 }
0x11e8   : > { %v2386_v0 = vpop.xlane.xlu2 %2385 }
0x11e9   : > { %v2387_v1 = vmul.f32 %v2386_v0, %v5577_v14 }
0x11eb   : > { %v2388_v2 = vadd.f32 1e-06, %v2387_v1 }
0x11ed   : > { %5037 = vrsqrt.f32 %v2388_v2  ;;  %vm2395_vm5 = vweird.f32 %v2388_v2 }
0x11f3   : > { %v5038_v3 = vpop.eup %5037 }
0x11f4   : > { %v2390_v4 = vmul.f32 %v5038_v3, %v2388_v2  ;;  %vm2396_vm4 = vweird.f32 %v5038_v3 }
0x11f5   : > { %vm2397_vm7 = vmor %vm2395_vm5, %vm2396_vm4 }
0x11f6   : > { %v2391_v5 = vmul.f32 %v5038_v3, %v2390_v4 }
0x11f8   : > { %v2392_v7 = vmul.f32 0.5, %v2391_v5 }
0x11fa   : > { %v2393_v36 = vsub.f32 1.5, %v2392_v7 }
0x11fc   : > { %v2394_v8 = vmul.f32 %v5038_v3, %v2393_v36 }
0x11fe   : > { %v2398_v10 = vsel %vm2397_vm7, %v5038_v3, %v2394_v8 }
0x11ff   : > { %v2399_v11 = vmul.f32 %v2398_v10, %v2382_v51 }
0x1201   : > { %v2403_v13 = vmul.f32 %v4950_v9, %v2399_v11 }
0x1203   : > { %v2407_v15 = vadd.f32 %v4951_v12, %v2403_v13 }
0x1205   : > { %v5886_v16 = vpack.c.bf16 %v2407_v15, %v2407_v15 }
0x1207   : > { %4577 = vmatmul.msk.bf16.vlgmr.msra.gmra.mxu3 %vm1401_vm0, %v5886_v16 }
0x123d   : > { %v2769_v17 = vpop.xlane.xlu0 %2768 }
0x123e   : > { %v2770_v18 = vmul.f32 %v2769_v17, %v5577_v14 }
0x1240   : > { %v2771_v40 = vsub.f32 %v2764_v57, %v2770_v18 }
0x1242   : > { %v2772_v19 = vmul.f32 %v2771_v40, %v2771_v40 }
0x1244   : > { %v2773_v21 = vsel %vm1401_vm0, %v2772_v19, 0.0 }
0x1245   : > { %2774 = vadd.xlane.f32.xlu1 %v2773_v21 }
0x128a   : > { %v2867_v22 = vpop.f32.mrf.mxu3 }
0x128b   : > { %v2868_v23 = vadd.f32 %v4952_v20, %v2867_v22 }
0x128d   : > { %v2871_v25 = vpack.c.bf16 %v2868_v23, %v2868_v23 }
0x128f   : > { %v2881_v26 = vsel %vm1487_vm6, %v2871_v25, 0  ;;  %v2910_v28 = vunpack.c.l.b16 %v2871_v25 }
0x1290   : > { %2890 = vmatpush.bf16.xpose.msrb.mxu2 %v2881_v26 }
0x1291   : > { %v5894_v29 = vpack.c.b16 %v2910_v28, %v2910_v28 }
0x1292   : > { %v2869_v30 = vpop.f32.mrf.mxu3 }
0x1293   : > { %2995 = vrot.lane.b32.xlu1 %v5894_v29, %s6354_s3  ;;  %2938 = vrot.lane.b32.xlu0 %v5894_v29, %s6373_s21 }
0x129b   : > { %3052 = vrot.lane.b32.xlu0 %v5894_v29, %s6357_s13 }
0x12b8   : > { %v2775_v32 = vpop.xlane.xlu1 %2774 }
0x12b9   : > { %v2776_v33 = vmul.f32 %v2775_v32, %v5577_v14 }
0x12bb   : > { %v2777_v34 = vadd.f32 1e-06, %v2776_v33 }
0x12bd   : > { %5039 = vrsqrt.f32 %v2777_v34  ;;  %vm2784_vm13 = vweird.f32 %v2777_v34 }
0x12c3   : > { %v5040_v35 = vpop.eup %5039 }
0x12c4   : > { %v2779_v37 = vmul.f32 %v5040_v35, %v2777_v34  ;;  %vm2785_vm12 = vweird.f32 %v5040_v35 }
0x12c5   : > { %vm2786_vm14 = vmor %vm2784_vm13, %vm2785_vm12 }
0x12c6   : > { %v2780_v38 = vmul.f32 %v5040_v35, %v2779_v37 }
0x12c8   : > { %v2781_v39 = vmul.f32 0.5, %v2780_v38 }
0x12ca   : > { %v2782_v41 = vsub.f32 1.5, %v2781_v39 }
0x12cc   : > { %v2783_v42 = vmul.f32 %v5040_v35, %v2782_v41 }
0x12ce   : > { %v2787_v44 = vsel %vm2786_vm14, %v5040_v35, %v2783_v42 }
0x12cf   : > { %v2788_v46 = vmul.f32 %v2787_v44, %v2771_v40 }
0x12d1   : > { %v2792_v47 = vmul.f32 %v4953_v43, %v2788_v46 }
0x12d3   : > { %v5907_v48 = vadd.f32 %v4954_v45, %v2792_v47 }
0x12d5   : > { %v2797_v49 = vpack.c.bf16 %v5907_v48, %v5907_v48 }
0x12d7   : > { %4568 = vmatmul.msk.bf16.vlgmr.msra.gmra.mxu1 %vm1401_vm0, %v2797_v49 }
0x1305   : > { %v2996_v31 = vpop.permute.xlu1 %2995  ;;  %v2939_v63 = vpop.permute.xlu0 %2938 }
0x1306   : > { %v3001_v50 = vsel %vm1487_vm6, %v2996_v31, 0  ;;  %v2944_v51 = vsel %vm1487_vm6, %v2939_v63, 0 }
0x1307   : > { %2953 = vmatpush.bf16.xpose.msrb.mxu1 %v2944_v51  ;;  %3010 = vmatpush.bf16.xpose.msra.mxu2 %v3001_v50 }
0x130d   : > { %v3053_v52 = vpop.permute.xlu0 %3052 }
0x130e   : > { %v3058_v53 = vsel %vm1487_vm6, %v3053_v52, 0 }
0x130f   : > { %3067 = vmatpush.bf16.xpose.msra.mxu1 %v3058_v53 }
0x1354   : > { %v2830_v55 = vpop.f32.mrf.mxu1 }
0x1355   : > { %v2831_v56 = vadd.f32 %v4955_v54, %v2830_v55 }
0x1357   : > { %v2834_v57 = vpack.c.bf16 %v2831_v56, %v2831_v56 }
0x1359   : > { %v2934_v58 = vunpack.c.l.b16 %v2834_v57  ;;  %4578 = vmatmul.msk.bf16.vlgmr.msrb.gmra.mxu2 %vm1487_vm6, %v2834_v57 }
0x135b   : > { %v2935_v60 = vpack.c.b16 %v2934_v58, %v2934_v58 }
0x135c   : > { %v2832_v61 = vpop.f32.mrf.mxu1 }
0x135d   : > { %2936 = vrot.lane.b32.xlu2 %v2935_v60, %s6373_s21  ;;  %3050 = vrot.lane.b32.xlu0 %v2935_v60, %s6357_s13 }
0x1365   : > { %2993 = vrot.lane.b32.xlu2 %v2935_v60, %s6354_s3 }
0x13b7   : > { %v2937_v62 = vpop.permute.xlu2 %2936 }
0x13b8   : > { %4580 = vmatmul.msk.bf16.vlgmr.msrb.gmra.mxu1 %vm1487_vm6, %v2937_v62 }
0x13bf   : > { %v2994_v0 = vpop.permute.xlu2 %2993 }
0x13c0   : > { %4582 = vmatmul.msk.bf16.vlgmr.msra.gmra.mxu2 %vm1487_vm6, %v2994_v0 }
0x13cf   : > { %v3051_v1 = vpop.permute.xlu0 %3050 }
0x13d0   : > { %4584 = vmatmul.msk.bf16.vlgmr.msra.gmra.mxu1 %vm1487_vm6, %v3051_v1 }
0x13dc   : > { %v2892_v2 = vpop.f32.mrf.mxu2 }
0x13dd   : > { %v2896_v3 = vsel %vm5619_vm8, %v2892_v2, -1e+09 }
0x13de   : > { %v2897_v4 = vsel %vm1487_vm6, %v2896_v3, -inf }
0x13df   : > { %2898 = vmax.xlane.f32.xlu2 %v2897_v4 }
0x13e4   : > { %v2894_v5 = vpop.f32.mrf.mxu2 }
0x1435   : > { %v2955_v7 = vpop.f32.mrf.mxu1 }
0x1436   : > { %v2959_v36 = vsel %vm5619_vm8, %v2955_v7, -1e+09 }
0x1437   : > { %v2960_v8 = vsel %vm1487_vm6, %v2959_v36, -inf }
0x1438   : > { %2961 = vmax.xlane.f32.xlu1 %v2960_v8 }
0x143d   : > { %v2957_v9 = vpop.f32.mrf.mxu1 }
0x1443   : > { %v3012_v10 = vpop.f32.mrf.mxu2 }
0x1444   : > { %v3016_v11 = vsel %vm5619_vm8, %v3012_v10, -1e+09 }
0x1445   : > { %v3017_v12 = vsel %vm1487_vm6, %v3016_v11, -inf }
0x1446   : > { %3018 = vmax.xlane.f32.xlu1 %v3017_v12  ;;  %v4794_v12 = vld [vmem:[%s6385_s27] sm:$0xff] }
0x144b   : > { %v3014_v13 = vpop.f32.mrf.mxu2 }
0x144d   : > { %v3069_v15 = vpop.f32.mrf.mxu1 }
0x144e   : > { %v3073_v17 = vsel %vm5619_vm8, %v3069_v15, -1e+09 }
0x144f   : > { %v3074_v18 = vsel %vm1487_vm6, %v3073_v17, -inf }
0x1450   : > { %3075 = vmax.xlane.f32.xlu0 %v3074_v18 }
0x1452   : > { %v2899_v40 = vpop.xlane.xlu2 %2898 }
0x1453   : > { %v2900_v19 = vsub.f32 %v2896_v3, %v2899_v40 }
0x1455   : > { %v2901_v21 = vmul.f32 1.442695, %v2900_v19  ;;  %v3071_v20 = vpop.f32.mrf.mxu1 }
0x1456   : > { %v4956_v20 = vld [vmem:[%s6386_s30] ss:$0 sm:$0xff]  ;;  %s6390_s30 = sld [smem:[#allocation43_spill]] }
0x1457   : > { %5041 = vpow2.f32 %v2901_v21 }
0x145d   : > { %v5042_v22 = vpop.eup %5041 }
0x145e   : > { %v2903_v23 = vsel %vm1487_vm6, %v5042_v22, 0.0 }
0x145f   : > { %2904 = vadd.xlane.f32.xlu0 %v2903_v23  ;;  %2972 = vrot.lane.b32.xlu1 %v5894_v29, %s6374_s7 }
0x1467   : > { %3029 = vrot.lane.b32.xlu1 %v5894_v29, %s6355_s5 }
0x14ab   : > { %v2962_v25 = vpop.xlane.xlu1 %2961 }
0x14ac   : > { %v2963_v26 = vsub.f32 %v2959_v36, %v2962_v25 }
0x14ae   : > { %v2964_v28 = vmul.f32 1.442695, %v2963_v26 }
0x14b0   : > { %5043 = vpow2.f32 %v2964_v28 }
0x14b6   : > { %v5044_v30 = vpop.eup %5043 }
0x14b7   : > { %v2966_v27 = vsel %vm1487_vm6, %v5044_v30, 0.0 }
0x14b8   : > { %2967 = vadd.xlane.f32.xlu2 %v2966_v27 }
0x14b9   : > { %v3019_v6 = vpop.xlane.xlu1 %3018 }
0x14ba   : > { %v3020_v32 = vsub.f32 %v3016_v11, %v3019_v6  ;;  %v4795_v11 = vld [vmem:[%s6385_s27 + $0x8] sm:$0xff] }
0x14bb   : > { %3147 = vmatpush.bf16.msrb.mxu2 %v4795_v11  ;;  %v4802_v11 = vld [vmem:[%s6368_s19 + $0x10] sm:$0xff] }
0x14bc   : > { %v3021_v33 = vmul.f32 1.442695, %v3020_v32 }
0x14be   : > { %5045 = vpow2.f32 %v3021_v33 }
0x14bf   : > { %3148 = vmatpush.bf16.msrb.mxu2 %v4794_v12 }
0x14c3   : > { %v3076_v34 = vpop.xlane.xlu0 %3075 }
0x14c4   : > { %v5046_v35 = vpop.eup %5045  ;;  %v3077_v37 = vsub.f32 %v3073_v17, %v3076_v34  ;;  %v4797_v34 = vld [vmem:[%s6387_s25 + $0x8] sm:$0xff] }
0x14c5   : > { %v3023_v38 = vsel %vm1487_vm6, %v5046_v35, 0.0 }
0x14c6   : > { %v3078_v39 = vmul.f32 1.442695, %v3077_v37  ;;  %3024 = vadd.xlane.f32.xlu0 %v3023_v38  ;;  %v4801_v37 = vld [vmem:[%s6388_s0 + $0x18] sm:$0xff] }
0x14c7   : > { %3269 = vmatpush.bf16.msrb.mxu1 %v4801_v37 }
0x14c8   : > { %5047 = vpow2.f32 %v3078_v39  ;;  %v4800_v39 = vld [vmem:[%s6388_s0 + $0x10] sm:$0xff] }
0x14cb   : > { %3270 = vmatpush.bf16.msrb.mxu1 %v4800_v39 }
0x14ce   : > { %v5048_v41 = vpop.eup %5047 }
0x14cf   : > { %v3080_v42 = vsel %vm1487_vm6, %v5048_v41, 0.0 }
0x14d0   : > { %2912 = vrot.lane.b32.xlu2 %v5894_v29, %s6372_s2  ;;  %3081 = vadd.xlane.f32.xlu0 %v3080_v42 }
0x14d1   : > { %v2973_v43 = vpop.permute.xlu1 %2972 }
0x14d2   : > { %v2978_v44 = vsel %vm1525_vm9, %v2973_v43, 0  ;;  %v2905_v45 = vpop.xlane.xlu0 %2904 }
0x14d3   : > { %2987 = vmatpush.bf16.msrb.mxu3 %v2978_v44  ;;  %5049 = vrcp.f32 %v2905_v45 }
0x14d9   : > { %v5050_v47 = vpop.eup %5049  ;;  %v3030_v63 = vpop.permute.xlu1 %3029 }
0x14da   : > { %v2907_v31 = vmul.f32 %v5050_v47, %v5042_v22  ;;  %v3035_v53 = vsel %vm1525_vm9, %v3030_v63, 0  ;;  %v4958_v63 = vld [vmem:[%s6390_s30] ss:$0 sm:$0xff] }
0x14dc   : > { %v2908_v55 = vpack.c.bf16 %v2907_v31, %v2907_v31 }
0x14e4   : > { %3086 = vrot.lane.b32.xlu0 %v5894_v29, %s6356_s8 }
0x152b   : > { %v2968_v46 = vpop.xlane.xlu2 %2967 }
0x152c   : > { %5051 = vrcp.f32 %v2968_v46 }
0x1532   : > { %v5052_v49 = vpop.eup %5051 }
0x1533   : > { %v2970_v50 = vmul.f32 %v5052_v49, %v5044_v30  ;;  %v2913_v51 = vpop.permute.xlu2 %2912  ;;  %v4957_v49 = vld [vmem:[%s6389_s1] ss:$0 sm:$0xff]  ;;  %s6393_s1 = sld [smem:[#allocation48_spill]] }
0x1534   : > { %v2918_v52 = vsel %vm1525_vm9, %v2913_v51, 0 }
0x1535   : > { %v2971_v54 = vpack.c.bf16 %v2970_v50, %v2970_v50  ;;  %2927 = vmatpush.bf16.msrb.mxu0 %v2918_v52 }
0x1537   : > { %4581 = vmatmul.msk.bf16.vlgmr.msrb.gmra.mxu3 %vm1487_vm6, %v2971_v54  ;;  %v4799_v54 = vld [vmem:[%s6388_s0 + $0x8] sm:$0xff] }
0x1538   : > { %4579 = vmatmul.msk.bf16.vlgmr.msrb.gmra.mxu0 %vm1487_vm6, %v2908_v55  ;;  %3271 = vmatpush.bf16.msrb.mxu1 %v4799_v54  ;;  %v4798_v55 = vld [vmem:[%s6388_s0] sm:$0xff] }
0x1539   : > { %3044 = vmatpush.bf16.msra.mxu0 %v3035_v53  ;;  %v3025_v29 = vpop.xlane.xlu0 %3024 }
0x153a   : > { %5053 = vrcp.f32 %v3025_v29 }
0x153c   : > { %3272 = vmatpush.bf16.msrb.mxu1 %v4798_v55 }
0x153d   : > { %3217 = vmatpush.bf16.msrb.mxu0 %v4797_v34 }
0x1540   : > { %v5054_v56 = vpop.eup %5053 }
0x1541   : > { %v3027_v57 = vmul.f32 %v5054_v56, %v5046_v35  ;;  %v4796_v35 = vld [vmem:[%s6387_s25] sm:$0xff]  ;;  %s6391_s25 = sld [smem:[#allocation45_spill]] }
0x1542   : > { %3218 = vmatpush.bf16.msrb.mxu0 %v4796_v35 }
0x1543   : > { %v3028_v58 = vpack.c.bf16 %v3027_v57, %v3027_v57  ;;  %v3082_v60 = vpop.xlane.xlu0 %3081 }
0x1544   : > { %5055 = vrcp.f32 %v3082_v60 }
0x1547   : > { %v4959_v29 = vld [vmem:[%s6391_s25] ss:$0 sm:$0xff]  ;;  %s6394_s25 = smov %s6393_s1 }
0x1548   : > { %4583 = vmatmul.msk.bf16.vlgmr.msra.gmra.mxu0 %vm1487_vm6, %v3028_v58 }
0x154a   : > { %v5056_v61 = vpop.eup %5055 }
0x154b   : > { %v3084_v62 = vmul.f32 %v5056_v61, %v5048_v41 }
0x154d   : > { %v3085_v2 = vpack.c.bf16 %v3084_v62, %v3084_v62  ;;  %v4960_v62 = vld [vmem:[%s6392_s4] ss:$0 sm:$0xff] }
0x1556   : > { %v3087_v0 = vpop.permute.xlu0 %3086 }
0x1557   : > { %v3092_v1 = vsel %vm1525_vm9, %v3087_v0, 0 }
0x1558   : > { %3101 = vmatpush.bf16.msra.mxu3 %v3092_v1 }
0x155b   : > { %4585 = vmatmul.msk.bf16.vlgmr.msra.gmra.mxu3 %vm1487_vm6, %v3085_v2 }
0x15b5   : > { %v2929_v3 = vpop.f32.mrf.mxu0 }
0x15ba   : > { %v2989_v4 = vpop.f32.mrf.mxu3 }
0x15bb   : > { %3108 = vrot.lane.b32.xlu2 %v2989_v4, %s6364_s24 }
0x15bd   : > { %v2931_v5 = vpop.f32.mrf.mxu0 }
0x15c2   : > { %v2991_v7 = vpop.f32.mrf.mxu3 }
0x15c5   : > { %v3046_v36 = vpop.f32.mrf.mxu0 }
0x15c6   : > { %3112 = vrot.lane.b32.xlu1 %v3046_v36, %s6366_s28 }
0x15cd   : > { %v3048_v8 = vpop.f32.mrf.mxu0 }
0x15de   : > { %v3103_v9 = vpop.f32.mrf.mxu3 }
0x15df   : > { %3116 = vrot.lane.b32.xlu2 %v3103_v9, %s6365_s29 }
0x15e6   : > { %v3105_v10 = vpop.f32.mrf.mxu3 }
0x15e7   : > { %v4803_v10 = vld [vmem:[%s6368_s19 + $0x18] sm:$0xff] }
0x15e8   : > { %3343 = vmatpush.bf16.msrb.mxu3 %v4803_v10 }
0x15ec   : > { %3344 = vmatpush.bf16.msrb.mxu3 %v4802_v11 }
0x1615   : > { %v3109_v13 = vpop.permute.xlu2 %3108 }
0x1616   : > { %v3119_v15 = vsel %vm1487_vm6, %v2929_v3, %v3109_v13 }
0x1638   : > { %v3113_v17 = vpop.permute.xlu1 %3112 }
0x1639   : > { %v3120_v18 = vsel %vm1726_vm10, %v3119_v15, %v3113_v17  ;;  %v3117_v40 = vpop.permute.xlu2 %3116 }
0x163a   : > { %v3121_v19 = vsel %vm1728_vm11, %v3120_v18, %v3117_v40 }
0x163b   : > { %v3122_v21 = vpack.c.bf16 %v3121_v19, %v3121_v19 }
0x163d   : > { %4594 = vmatmul.msk.bf16.vlgmr.msrb.gmra.mxu2 %vm1401_vm0, %v3122_v21 }
0x16c0   : > { %v3150_v22 = vpop.f32.mrf.mxu2 }
0x16c1   : > { %v3151_v23 = vadd.f32 %v4956_v20, %v3150_v22  ;;  %v4961_v22 = vld [vmem:[%s6393_s1] ss:$0 sm:$0xff] }
0x16c3   : > { %v3154_v25 = vadd.f32 %v3151_v23, %v5907_v48 }
0x16c5   : > { %v3157_v26 = vsel %vm1401_vm0, %v3154_v25, 0.0 }
0x16c6   : > { %3158 = vadd.xlane.f32.xlu1 %v3157_v26 }
0x16c8   : > { %v3152_v28 = vpop.f32.mrf.mxu2 }
0x1739   : > { %v3159_v30 = vpop.xlane.xlu1 %3158 }
0x173a   : > { %v3160_v27 = vmul.f32 %v3159_v30, %v5577_v14 }
0x173c   : > { %v3161_v6 = vsub.f32 %v3154_v25, %v3160_v27  ;;  %v4962_v25 = vld [vmem:[%s5471_s9] ss:$0 sm:$0xff] }
0x173e   : > { %v3162_v32 = vmul.f32 %v3161_v6, %v3161_v6 }
0x1740   : > { %v3163_v33 = vsel %vm1401_vm0, %v3162_v32, 0.0 }
0x1741   : > { %3164 = vadd.xlane.f32.xlu0 %v3163_v33 }
0x17b4   : > { %v3165_v48 = vpop.xlane.xlu0 %3164 }
0x17b5   : > { %v3166_v38 = vmul.f32 %v3165_v48, %v5577_v14 }
0x17b7   : > { %v3167_v41 = vadd.f32 1e-06, %v3166_v38 }
0x17b9   : > { %5057 = vrsqrt.f32 %v3167_v41  ;;  %vm3174_vm2 = vweird.f32 %v3167_v41 }
0x17bf   : > { %v5058_v42 = vpop.eup %5057 }
0x17c0   : > { %v3169_v43 = vmul.f32 %v5058_v42, %v3167_v41  ;;  %vm3175_vm1 = vweird.f32 %v5058_v42 }
0x17c1   : > { %vm3176_vm4 = vmor %vm3174_vm2, %vm3175_vm1 }
0x17c2   : > { %v3170_v44 = vmul.f32 %v5058_v42, %v3169_v43  ;;  %v4809_v43 = vld [vmem:[%s6379_s12 + $0x18] sm:$0xff] }
0x17c4   : > { %v3171_v45 = vmul.f32 0.5, %v3170_v44 }
0x17c6   : > { %v3172_v46 = vsub.f32 1.5, %v3171_v45 }
0x17c8   : > { %v3173_v47 = vmul.f32 %v5058_v42, %v3172_v46 }
0x17ca   : > { %v3177_v31 = vsel %vm3176_vm4, %v5058_v42, %v3173_v47  ;;  %v4808_v47 = vld [vmem:[%s6379_s12 + $0x10] sm:$0xff] }
0x17cb   : > { %v3178_v50 = vmul.f32 %v3177_v31, %v3161_v6  ;;  %v4963_v6 = vld [vmem:[%s6371_s22 + $0x1] ss:$0 sm:$0xff] }
0x17cd   : > { %v3182_v51 = vmul.f32 %v4957_v49, %v3178_v50 }
0x17cf   : > { %v3186_v52 = vadd.f32 %v4958_v63, %v3182_v51 }
0x17d1   : > { %v3187_v53 = vpack.c.bf16 %v3186_v52, %v3186_v52 }
0x17d3   : > { %4603 = vmatmul.msk.bf16.vlgmr.msrb.gmra.mxu0 %vm1401_vm0, %v3187_v53 }
0x1850   : > { %v3220_v56 = vpop.f32.mrf.mxu0 }
0x1851   : > { %v3221_v57 = vadd.f32 %v4959_v29, %v3220_v56 }
0x1853   : > { %v3224_v58 = vmax.f32 %v3221_v57, 0.0 }
0x1855   : > { %v3225_v60 = vpack.c.bf16 %v3224_v58, %v3224_v58 }
0x1857   : > { %4620 = vmatmul.msk.bf16.vlgmr.msrb.gmra.mxu1 %vm1870_vm15, %v3225_v60 }
0x1858   : > { %v3222_v61 = vpop.f32.mrf.mxu0 }
0x18d4   : > { %v3274_v0 = vpop.f32.mrf.mxu1 }
0x18d5   : > { %v3275_v1 = vadd.f32 %v4960_v62, %v3274_v0 }
0x18d7   : > { %v3278_v2 = vadd.f32 %v3275_v1, %v3186_v52 }
0x18d9   : > { %v3281_v3 = vsel %vm1401_vm0, %v3278_v2, 0.0 }
0x18da   : > { %3282 = vadd.xlane.f32.xlu2 %v3281_v3 }
0x18dc   : > { %v3276_v4 = vpop.f32.mrf.mxu1 }
0x194d   : > { %v3283_v5 = vpop.xlane.xlu2 %3282 }
0x194e   : > { %v3284_v7 = vmul.f32 %v3283_v5, %v5577_v14 }
0x1950   : > { %v3285_v36 = vsub.f32 %v3278_v2, %v3284_v7 }
0x1952   : > { %v3286_v8 = vmul.f32 %v3285_v36, %v3285_v36 }
0x1954   : > { %v3287_v9 = vsel %vm1401_vm0, %v3286_v8, 0.0 }
0x1955   : > { %3288 = vadd.xlane.f32.xlu1 %v3287_v9 }
0x19c8   : > { %v3289_v12 = vpop.xlane.xlu1 %3288 }
0x19c9   : > { %v3290_v13 = vmul.f32 %v3289_v12, %v5577_v14 }
0x19cb   : > { %v3291_v15 = vadd.f32 1e-06, %v3290_v13 }
0x19cd   : > { %5059 = vrsqrt.f32 %v3291_v15  ;;  %vm3298_vm7 = vweird.f32 %v3291_v15 }
0x19d3   : > { %v5060_v17 = vpop.eup %5059 }
0x19d4   : > { %v3293_v18 = vmul.f32 %v5060_v17, %v3291_v15  ;;  %vm3299_vm5 = vweird.f32 %v5060_v17 }
0x19d5   : > { %vm3300_vm12 = vmor %vm3298_vm7, %vm3299_vm5 }
0x19d6   : > { %v3294_v40 = vmul.f32 %v5060_v17, %v3293_v18 }
0x19d8   : > { %v3295_v19 = vmul.f32 0.5, %v3294_v40 }
0x19da   : > { %v3296_v21 = vsub.f32 1.5, %v3295_v19 }
0x19dc   : > { %v3297_v20 = vmul.f32 %v5060_v17, %v3296_v21 }
0x19de   : > { %v3301_v23 = vsel %vm3300_vm12, %v5060_v17, %v3297_v20 }
0x19df   : > { %v3302_v26 = vmul.f32 %v3301_v23, %v3285_v36 }
0x19e1   : > { %v3306_v28 = vmul.f32 %v4961_v22, %v3302_v26 }
0x19e3   : > { %v5990_v30 = vadd.f32 %v4962_v25, %v3306_v28 }
0x19e5   : > { %v3311_v27 = vpack.c.bf16 %v5990_v30, %v5990_v30 }
0x19e7   : > { %4634 = vmatmul.msk.bf16.vlgmr.msrb.gmra.mxu3 %vm1401_vm0, %v3311_v27 }
0x1a6a   : > { %v3346_v32 = vpop.f32.mrf.mxu3 }
0x1a6b   : > { %v3347_v33 = vadd.f32 %v4963_v6, %v3346_v32  ;;  %v4964_v32 = vld [vmem:[%s6380_s14 + $0x1] ss:$0 sm:$0xff] }
0x1a6d   : > { %v3350_v34 = vpack.c.bf16 %v3347_v33, %v3347_v33 }
0x1a6f   : > { %v3359_v35 = vunpack.c.l.b16 %v3350_v34 }
0x1a71   : > { %v5996_v37 = vpack.c.b16 %v3359_v35, %v3359_v35 }
0x1a72   : > { %v3348_v48 = vpop.f32.mrf.mxu3 }
0x1a73   : > { %3416 = vrot.lane.b32.xlu1 %v5996_v37, %s6373_s21  ;;  %3418 = vrot.lane.b32.xlu2 %v5996_v37, %s6374_s7 }
0x1a74   : > { %3361 = vrot.lane.b32.xlu0 %v5996_v37, %s6372_s2 }
0x1a7b   : > { %3530 = vrot.lane.b32.xlu1 %v5996_v37, %s6357_s13  ;;  %3532 = vrot.lane.b32.xlu2 %v5996_v37, %s6356_s8 }
0x1a7c   : > { %3475 = vrot.lane.b32.xlu0 %v5996_v37, %s6355_s5 }
0x1a84   : > { %3473 = vrot.lane.b32.xlu0 %v5996_v37, %s6354_s3 }
0x1acd   : > { %v3419_v38 = vpop.permute.xlu2 %3418 }
0x1ace   : > { %v3424_v39 = vsel %vm1487_vm6, %v3419_v38, 0 }
0x1acf   : > { %3433 = vmatpush.bf16.xpose.msra.mxu1 %v3424_v39 }
0x1ad5   : > { %v3533_v41 = vpop.permute.xlu2 %3532 }
0x1ad6   : > { %v3538_v42 = vsel %vm1487_vm6, %v3533_v41, 0 }
0x1ad7   : > { %3547 = vmatpush.bf16.xpose.msrb.mxu1 %v3538_v42 }
0x1ae5   : > { %v3417_v44 = vpop.permute.xlu1 %3416 }
0x1ae6   : > { %v3362_v45 = vpop.permute.xlu0 %3361  ;;  %4642 = vmatmul.msk.bf16.vlgmr.msra.gmra.mxu1 %vm1487_vm6, %v3417_v44 }
0x1ae7   : > { %v3367_v46 = vsel %vm1487_vm6, %v3362_v45, 0  ;;  %3737 = vmatpush.bf16.msra.mxu1 %v4809_v43 }
0x1ae8   : > { %3376 = vmatpush.bf16.xpose.msra.mxu2 %v3367_v46 }
0x1aeb   : > { %3738 = vmatpush.bf16.msra.mxu1 %v4808_v47 }
0x1aed   : > { %v3531_v63 = vpop.permute.xlu1 %3530 }
0x1aee   : > { %v3476_v49 = vpop.permute.xlu0 %3475 }
0x1aef   : > { %v3481_v31 = vsel %vm1487_vm6, %v3476_v49, 0  ;;  %4640 = vmatmul.msk.bf16.vlgmr.msra.gmra.mxu2 %vm1487_vm6, %v3350_v34  ;;  %v4807_v49 = vld [vmem:[%s6381_s20 + $0x18] sm:$0xff] }
0x1af0   : > { %3490 = vmatpush.bf16.xpose.msrb.mxu2 %v3481_v31 }
0x1af6   : > { %4646 = vmatmul.msk.bf16.vlgmr.msrb.gmra.mxu1 %vm1487_vm6, %v3531_v63  ;;  %v3474_v50 = vpop.permute.xlu0 %3473  ;;  %v4806_v63 = vld [vmem:[%s6381_s20 + $0x10] sm:$0xff] }
0x1aff   : > { %4644 = vmatmul.msk.bf16.vlgmr.msrb.gmra.mxu2 %vm1487_vm6, %v3474_v50 }
0x1b06   : > { %4686 = vmatmul.msk.bf16.vlgmr.msra.gmra.mxu1 %vm1401_vm0, %v5886_v16 }
0x1b63   : > { %v3435_v51 = vpop.f32.mrf.mxu1 }
0x1b64   : > { %v3439_v52 = vsel %vm5825_vm3, %v3435_v51, -1e+09 }
0x1b65   : > { %v3440_v53 = vsel %vm1487_vm6, %v3439_v52, -inf }
0x1b66   : > { %3441 = vmax.xlane.f32.xlu2 %v3440_v53 }
0x1b6b   : > { %v3437_v54 = vpop.f32.mrf.mxu1 }
0x1b72   : > { %v3378_v55 = vpop.f32.mrf.mxu2 }
0x1b73   : > { %v3382_v29 = vsel %vm5825_vm3, %v3378_v55, -1e+09  ;;  %v3549_v56 = vpop.f32.mrf.mxu1 }
0x1b74   : > { %v3553_v57 = vsel %vm5825_vm3, %v3549_v56, -1e+09  ;;  %v3383_v58 = vsel %vm1487_vm6, %v3382_v29, -inf }
0x1b75   : > { %3384 = vmax.xlane.f32.xlu0 %v3383_v58  ;;  %v3554_v16 = vsel %vm1487_vm6, %v3553_v57, -inf }
0x1b76   : > { %3555 = vmax.xlane.f32.xlu1 %v3554_v16 }
0x1b7a   : > { %v3380_v60 = vpop.f32.mrf.mxu2 }
0x1b7b   : > { %v3551_v61 = vpop.f32.mrf.mxu1 }
0x1b82   : > { %v3492_v62 = vpop.f32.mrf.mxu2 }
0x1b83   : > { %v3496_v0 = vsel %vm5825_vm3, %v3492_v62, -1e+09  ;;  %v3740_v1 = vpop.f32.mrf.mxu1 }
0x1b84   : > { %v3497_v2 = vsel %vm1487_vm6, %v3496_v0, -inf  ;;  %v3741_v33 = vadd.f32 %v4964_v32, %v3740_v1 }
0x1b85   : > { %3498 = vmax.xlane.f32.xlu2 %v3497_v2 }
0x1b86   : > { %v3744_v34 = vpack.c.bf16 %v3741_v33, %v3741_v33 }
0x1b88   : > { %v3785_v35 = vunpack.c.l.b16 %v3744_v34  ;;  %v3756_v56 = vsel %vm1487_vm6, %v3744_v34, 0 }
0x1b89   : > { %3395 = vrot.lane.b32.xlu0 %v5996_v37, %s6360_s15 }
0x1b8a   : > { %v3494_v3 = vpop.f32.mrf.mxu2  ;;  %v6051_v48 = vpack.c.b16 %v3785_v35, %v3785_v35 }
0x1b8b   : > { %v3742_v4 = vpop.f32.mrf.mxu1 }
0x1b8f   : > { %3452 = vrot.lane.b32.xlu1 %v5996_v37, %s6358_s18 }
0x1bd9   : > { %v3442_v5 = vpop.xlane.xlu2 %3441 }
0x1bda   : > { %v3443_v7 = vsub.f32 %v3439_v52, %v3442_v5 }
0x1bdc   : > { %v3444_v36 = vmul.f32 1.442695, %v3443_v7 }
0x1bde   : > { %5061 = vpow2.f32 %v3444_v36 }
0x1be4   : > { %v5062_v8 = vpop.eup %5061 }
0x1be5   : > { %v3446_v24 = vsel %vm1487_vm6, %v5062_v8, 0.0 }
0x1be6   : > { %3447 = vadd.xlane.f32.xlu0 %v3446_v24  ;;  %v4804_v24 = vld [vmem:[%s6377_s6 + $0x10] sm:$0xff] }
0x1be8   : > { %v3385_v9 = vpop.xlane.xlu0 %3384 }
0x1be9   : > { %v3386_v10 = vsub.f32 %v3382_v29, %v3385_v9  ;;  %v3556_v11 = vpop.xlane.xlu1 %3555 }
0x1bea   : > { %v3557_v13 = vsub.f32 %v3553_v57, %v3556_v11 }
0x1beb   : > { %v3387_v12 = vmul.f32 1.442695, %v3386_v10 }
0x1bec   : > { %v3558_v15 = vmul.f32 1.442695, %v3557_v13 }
0x1bed   : > { %5063 = vpow2.f32 %v3387_v12 }
0x1bee   : > { %5065 = vpow2.f32 %v3558_v15 }
0x1bf3   : > { %v5064_v17 = vpop.eup %5063 }
0x1bf4   : > { %v3389_v18 = vsel %vm1487_vm6, %v5064_v17, 0.0  ;;  %v5066_v19 = vpop.eup %5065 }
0x1bf5   : > { %3390 = vadd.xlane.f32.xlu2 %v3389_v18  ;;  %v3560_v25 = vsel %vm1487_vm6, %v5066_v19, 0.0  ;;  %v4965_v18 = vld [vmem:[%s6378_s11 + $0x1] ss:$0 sm:$0xff] }
0x1bf8   : > { %v3499_v40 = vpop.xlane.xlu2 %3498 }
0x1bf9   : > { %v3500_v21 = vsub.f32 %v3496_v0, %v3499_v40 }
0x1bfa   : > { %3509 = vrot.lane.b32.xlu0 %v5996_v37, %s6361_s17  ;;  %s6397_s17 = sld [smem:[#allocation42_spill]] }
0x1bfb   : > { %v3501_v20 = vmul.f32 1.442695, %v3500_v21  ;;  %v3396_v22 = vpop.permute.xlu0 %3395 }
0x1bfc   : > { %v3401_v23 = vsel %vm1525_vm9, %v3396_v22, 0 }
0x1bfd   : > { %5067 = vpow2.f32 %v3501_v20  ;;  %3561 = vadd.xlane.f32.xlu2 %v3560_v25  ;;  %3410 = vmatpush.bf16.msra.mxu0 %v3401_v23 }
0x1c01   : > { %v3453_v26 = vpop.permute.xlu1 %3452 }
0x1c02   : > { %v3458_v28 = vsel %vm1525_vm9, %v3453_v26, 0 }
0x1c03   : > { %v5068_v27 = vpop.eup %5067  ;;  %3467 = vmatpush.bf16.msra.mxu3 %v3458_v28 }
0x1c04   : > { %v3503_v6 = vsel %vm1487_vm6, %v5068_v27, 0.0 }
0x1c05   : > { %3504 = vadd.xlane.f32.xlu2 %v3503_v6 }
0x1c1d   : > { %3566 = vrot.lane.b32.xlu2 %v5996_v37, %s6359_s10 }
0x1c25   : > { %3813 = vrot.lane.b32.xlu2 %v6051_v48, %s6373_s21 }
0x1c2d   : > { %3870 = vrot.lane.b32.xlu2 %v6051_v48, %s6354_s3 }
0x1c59   : > { %v3448_v38 = vpop.xlane.xlu0 %3447 }
0x1c5a   : > { %5069 = vrcp.f32 %v3448_v38 }
0x1c60   : > { %v5070_v39 = vpop.eup %5069 }
0x1c61   : > { %v3450_v41 = vmul.f32 %v5070_v39, %v5062_v8  ;;  %v4805_v8 = vld [vmem:[%s6377_s6 + $0x18] sm:$0xff] }
0x1c62   : > { %3627 = vmatpush.bf16.msra.mxu2 %v4805_v8 }
0x1c63   : > { %v3451_v42 = vpack.c.bf16 %v3450_v41, %v3450_v41 }
0x1c65   : > { %4643 = vmatmul.msk.bf16.vlgmr.msra.gmra.mxu3 %vm1487_vm6, %v3451_v42  ;;  %v4966_v42 = vld [vmem:[%s6382_s16 + $0x1] ss:$0 sm:$0xff] }
0x1c66   : > { %3628 = vmatpush.bf16.msra.mxu2 %v4804_v24 }
0x1c68   : > { %v3391_v43 = vpop.xlane.xlu2 %3390 }
0x1c69   : > { %5071 = vrcp.f32 %v3391_v43 }
0x1c6c   : > { %v3510_v37 = vpop.permute.xlu0 %3509 }
0x1c6d   : > { %v3515_v44 = vsel %vm1525_vm9, %v3510_v37, 0  ;;  %v4967_v37 = vld [vmem:[%s6383_s23 + $0x1] ss:$0 sm:$0xff] }
0x1c6e   : > { %3524 = vmatpush.bf16.msrb.mxu0 %v3515_v44 }
0x1c6f   : > { %v5072_v45 = vpop.eup %5071 }
0x1c70   : > { %v3393_v46 = vmul.f32 %v5072_v45, %v5064_v17  ;;  %v3562_v47 = vpop.xlane.xlu2 %3561 }
0x1c71   : > { %5073 = vrcp.f32 %v3562_v47 }
0x1c72   : > { %v3394_v31 = vpack.c.bf16 %v3393_v46, %v3393_v46 }
0x1c74   : > { %4641 = vmatmul.msk.bf16.vlgmr.msra.gmra.mxu0 %vm1487_vm6, %v3394_v31 }
0x1c75   : > { %3701 = vmatpush.bf16.msra.mxu0 %v4807_v49  ;;  %v4968_v49 = vld [vmem:[%s6384_s26 + $0x1] ss:$0 sm:$0xff] }
0x1c77   : > { %v5074_v51 = vpop.eup %5073 }
0x1c78   : > { %v3505_v50 = vpop.xlane.xlu2 %3504  ;;  %v3564_v53 = vmul.f32 %v5074_v51, %v5066_v19 }
0x1c79   : > { %5075 = vrcp.f32 %v3505_v50  ;;  %3702 = vmatpush.bf16.msra.mxu0 %v4806_v63 }
0x1c7a   : > { %v3565_v58 = vpack.c.bf16 %v3564_v53, %v3564_v53 }
0x1c7f   : > { %v5076_v52 = vpop.eup %5075 }
0x1c80   : > { %v3507_v54 = vmul.f32 %v5076_v52, %v5068_v27  ;;  %v3567_v55 = vpop.permute.xlu2 %3566 }
0x1c81   : > { %v3572_v29 = vsel %vm1525_vm9, %v3567_v55, 0 }
0x1c82   : > { %v3508_v57 = vpack.c.bf16 %v3507_v54, %v3507_v54  ;;  %3581 = vmatpush.bf16.msrb.mxu3 %v3572_v29 }
0x1c84   : > { %4645 = vmatmul.msk.bf16.vlgmr.msrb.gmra.mxu0 %vm1487_vm6, %v3508_v57 }
0x1c85   : > { %4647 = vmatmul.msk.bf16.vlgmr.msrb.gmra.mxu3 %vm1487_vm6, %v3565_v58 }
0x1c86   : > { %3765 = vmatpush.bf16.xpose.msra.mxu3 %v3756_v56 }
0x1c88   : > { %v3814_v16 = vpop.permute.xlu2 %3813 }
0x1c89   : > { %v3819_v60 = vsel %vm1487_vm6, %v3814_v16, 0 }
0x1c8a   : > { %3828 = vmatpush.bf16.xpose.msrb.mxu0 %v3819_v60 }
0x1c90   : > { %v3871_v61 = vpop.permute.xlu2 %3870 }
0x1c91   : > { %v3876_v62 = vsel %vm1487_vm6, %v3871_v61, 0 }
0x1c92   : > { %3885 = vmatpush.bf16.xpose.msrb.mxu3 %v3876_v62 }
0x1ce8   : > { %v3469_v0 = vpop.f32.mrf.mxu3 }
0x1ce9   : > { %3588 = vrot.lane.b32.xlu1 %v3469_v0, %s6364_s24 }
0x1cf0   : > { %v3471_v1 = vpop.f32.mrf.mxu3 }
0x1cf1   : > { %v3412_v2 = vpop.f32.mrf.mxu0 }
0x1cf9   : > { %v3414_v3 = vpop.f32.mrf.mxu0 }
0x1d01   : > { %v3526_v4 = vpop.f32.mrf.mxu0 }
0x1d02   : > { %3592 = vrot.lane.b32.xlu0 %v3526_v4, %s6366_s28 }
0x1d08   : > { %v3583_v5 = vpop.f32.mrf.mxu3 }
0x1d09   : > { %3596 = vrot.lane.b32.xlu1 %v3583_v5, %s6365_s29  ;;  %v3528_v7 = vpop.f32.mrf.mxu0 }
0x1d10   : > { %v3585_v36 = vpop.f32.mrf.mxu3 }
0x1d5b   : > { %v3589_v9 = vpop.permute.xlu1 %3588 }
0x1d5c   : > { %v3599_v11 = vsel %vm1487_vm6, %v3412_v2, %v3589_v9 }
0x1d74   : > { %v3593_v10 = vpop.permute.xlu0 %3592 }
0x1d75   : > { %v3600_v12 = vsel %vm1726_vm10, %v3599_v11, %v3593_v10 }
0x1d7b   : > { %v3597_v13 = vpop.permute.xlu1 %3596 }
0x1d7c   : > { %v3601_v15 = vsel %vm1728_vm11, %v3600_v12, %v3597_v13 }
0x1d7d   : > { %v3602_v17 = vpack.c.bf16 %v3601_v15, %v3601_v15 }
0x1d7f   : > { %4656 = vmatmul.msk.bf16.vlgmr.msra.gmra.mxu2 %vm1401_vm0, %v3602_v17 }
0x1e02   : > { %v3630_v40 = vpop.f32.mrf.mxu2 }
0x1e03   : > { %v3631_v19 = vadd.f32 %v4965_v18, %v3630_v40 }
0x1e05   : > { %v3634_v21 = vadd.f32 %v3631_v19, %v5990_v30 }
0x1e07   : > { %v3639_v20 = vsel %vm1401_vm0, %v3634_v21, 0.0 }
0x1e08   : > { %3640 = vadd.xlane.f32.xlu0 %v3639_v20 }
0x1e0a   : > { %v3632_v22 = vpop.f32.mrf.mxu2 }
0x1e7b   : > { %v3641_v23 = vpop.xlane.xlu0 %3640 }
0x1e7c   : > { %v3642_v25 = vmul.f32 %v3641_v23, %v5577_v14 }
0x1e7e   : > { %v3643_v26 = vsub.f32 %v3634_v21, %v3642_v25 }
0x1e80   : > { %v3644_v28 = vmul.f32 %v3643_v26, %v3643_v26 }
0x1e82   : > { %v3645_v27 = vsel %vm1401_vm0, %v3644_v28, 0.0 }
0x1e83   : > { %3646 = vadd.xlane.f32.xlu1 %v3645_v27 }
0x1ef6   : > { %v3647_v6 = vpop.xlane.xlu1 %3646 }
0x1ef7   : > { %v3648_v32 = vmul.f32 %v3647_v6, %v5577_v14 }
0x1ef9   : > { %v3649_v33 = vadd.f32 1e-06, %v3648_v32 }
0x1efb   : > { %5077 = vrsqrt.f32 %v3649_v33  ;;  %vm3656_vm13 = vweird.f32 %v3649_v33 }
0x1f01   : > { %v5078_v30 = vpop.eup %5077 }
0x1f02   : > { %v3651_v34 = vmul.f32 %v5078_v30, %v3649_v33  ;;  %vm3657_vm3 = vweird.f32 %v5078_v30 }
0x1f03   : > { %vm3658_vm14 = vmor %vm3656_vm13, %vm3657_vm3 }
0x1f04   : > { %v3652_v35 = vmul.f32 %v5078_v30, %v3651_v34 }
0x1f06   : > { %v3653_v38 = vmul.f32 0.5, %v3652_v35 }
0x1f08   : > { %v3654_v39 = vsub.f32 1.5, %v3653_v38 }
0x1f0a   : > { %v3655_v41 = vmul.f32 %v5078_v30, %v3654_v39 }
0x1f0c   : > { %v3659_v43 = vsel %vm3658_vm14, %v5078_v30, %v3655_v41 }
0x1f0d   : > { %v3660_v44 = vmul.f32 %v3659_v43, %v3643_v26 }
0x1f0f   : > { %v3664_v45 = vmul.f32 %v4966_v42, %v3660_v44 }
0x1f11   : > { %v6085_v46 = vadd.f32 %v4967_v37, %v3664_v45 }
0x1f13   : > { %v3669_v47 = vpack.c.bf16 %v6085_v46, %v6085_v46 }
0x1f15   : > { %4672 = vmatmul.msk.bf16.vlgmr.msra.gmra.mxu0 %vm1401_vm0, %v3669_v47 }
0x1f92   : > { %v3704_v31 = vpop.f32.mrf.mxu0 }
0x1f93   : > { %v3705_v63 = vadd.f32 %v4968_v49, %v3704_v31 }
0x1f95   : > { %v3708_v50 = vpack.c.bf16 %v3705_v63, %v3705_v63 }
0x1f97   : > { %v3809_v51 = vunpack.c.l.b16 %v3708_v50  ;;  %4692 = vmatmul.msk.bf16.vlgmr.msra.gmra.mxu3 %vm1487_vm6, %v3708_v50 }
0x1f99   : > { %v3810_v52 = vpack.c.b16 %v3809_v51, %v3809_v51 }
0x1f9a   : > { %v3706_v53 = vpop.f32.mrf.mxu0 }
0x1f9b   : > { %3925 = vrot.lane.b32.xlu0 %v3810_v52, %s6357_s13  ;;  %3811 = vrot.lane.b32.xlu2 %v3810_v52, %s6373_s21 }
0x1fa3   : > { %3868 = vrot.lane.b32.xlu2 %v3810_v52, %s6354_s3  ;;  %s6399_s3 = sld [smem:[#allocation49_spill]] }
0x1fab   : > { %3927 = vrot.lane.b32.xlu2 %v6051_v48, %s6357_s13  ;;  %s6396_s13 = sld [smem:[#allocation44_spill]] }
0x1ff5   : > { %v3812_v54 = vpop.permute.xlu2 %3811 }
0x1ff6   : > { %4694 = vmatmul.msk.bf16.vlgmr.msrb.gmra.mxu0 %vm1487_vm6, %v3812_v54 }
0x1ffd   : > { %v3869_v55 = vpop.permute.xlu2 %3868 }
0x1ffe   : > { %4696 = vmatmul.msk.bf16.vlgmr.msrb.gmra.mxu3 %vm1487_vm6, %v3869_v55 }
0x2005   : > { %v3928_v29 = vpop.permute.xlu2 %3927 }
0x2006   : > { %v3933_v56 = vsel %vm1487_vm6, %v3928_v29, 0 }
0x2007   : > { %3942 = vmatpush.bf16.xpose.msra.mxu0 %v3933_v56 }
0x200d   : > { %v3926_v57 = vpop.permute.xlu0 %3925 }
0x200e   : > { %4698 = vmatmul.msk.bf16.vlgmr.msra.gmra.mxu0 %vm1487_vm6, %v3926_v57 }
0x201a   : > { %v3767_v58 = vpop.f32.mrf.mxu3 }
0x201b   : > { %v3771_v16 = vsel %vm5619_vm8, %v3767_v58, -1e+09 }
0x201c   : > { %v3772_v60 = vsel %vm1487_vm6, %v3771_v16, -inf }
0x201d   : > { %3773 = vmax.xlane.f32.xlu1 %v3772_v60 }
0x2022   : > { %v3769_v61 = vpop.f32.mrf.mxu3 }
0x2073   : > { %v3830_v62 = vpop.f32.mrf.mxu0 }
0x2074   : > { %v3834_v0 = vsel %vm5619_vm8, %v3830_v62, -1e+09 }
0x2075   : > { %v3835_v1 = vsel %vm1487_vm6, %v3834_v0, -inf }
0x2076   : > { %3836 = vmax.xlane.f32.xlu2 %v3835_v1  ;;  %v4811_v1 = vld [vmem:[%s6385_s27 + $0x18] sm:$0xff] }
0x2077   : > { %4022 = vmatpush.bf16.msra.mxu3 %v4811_v1 }
0x207b   : > { %v3832_v2 = vpop.f32.mrf.mxu0 }
0x207c   : > { %v4810_v2 = vld [vmem:[%s6385_s27 + $0x10] sm:$0xff] }
0x207d   : > { %4023 = vmatpush.bf16.msra.mxu3 %v4810_v2 }
0x2081   : > { %v3887_v3 = vpop.f32.mrf.mxu3 }
0x2082   : > { %v3891_v4 = vsel %vm5619_vm8, %v3887_v3, -1e+09 }
0x2083   : > { %v3892_v5 = vsel %vm1487_vm6, %v3891_v4, -inf }
0x2084   : > { %3893 = vmax.xlane.f32.xlu1 %v3892_v5 }
0x2089   : > { %v3889_v7 = vpop.f32.mrf.mxu3 }
0x208b   : > { %v3944_v36 = vpop.f32.mrf.mxu0 }
0x208c   : > { %v3948_v8 = vsel %vm5619_vm8, %v3944_v36, -1e+09 }
0x208d   : > { %v3949_v24 = vsel %vm1487_vm6, %v3948_v8, -inf }
0x208e   : > { %3847 = vrot.lane.b32.xlu2 %v6051_v48, %s6374_s7  ;;  %3950 = vmax.xlane.f32.xlu1 %v3949_v24 }
0x2090   : > { %v3774_v9 = vpop.xlane.xlu1 %3773 }
0x2091   : > { %v3775_v10 = vsub.f32 %v3771_v16, %v3774_v9 }
0x2093   : > { %v3776_v11 = vmul.f32 1.442695, %v3775_v10  ;;  %v3946_v12 = vpop.f32.mrf.mxu0 }
0x2095   : > { %5079 = vpow2.f32 %v3776_v11 }
0x2096   : > { %3961 = vrot.lane.b32.xlu2 %v6051_v48, %s6356_s8  ;;  %s6400_s8 = sld [smem:[#allocation53_spill]] }
0x209b   : > { %v5080_v13 = vpop.eup %5079 }
0x209c   : > { %v3778_v15 = vsel %vm1487_vm6, %v5080_v13, 0.0  ;;  %s1361_s15 = sand.u32 1, %s6400_s8  }
0x209d   : > { %3779 = vadd.xlane.f32.xlu0 %v3778_v15 }
0x20e9   : > { %v3837_v59 = vpop.xlane.xlu2 %3836 }
0x20ea   : > { %v3838_v17 = vsub.f32 %v3834_v0, %v3837_v59 }
0x20ec   : > { %v3839_v18 = vmul.f32 1.442695, %v3838_v17 }
0x20ee   : > { %5081 = vpow2.f32 %v3839_v18 }
0x20f1   : > { %v3848_v40 = vpop.permute.xlu2 %3847 }
0x20f2   : > { %v3853_v19 = vsel %vm1525_vm9, %v3848_v40, 0 }
0x20f3   : > { %3862 = vmatpush.bf16.msrb.mxu1 %v3853_v19 }
0x20f4   : > { %v5082_v21 = vpop.eup %5081 }
0x20f5   : > { %v3841_v20 = vsel %vm1487_vm6, %v5082_v21, 0.0 }
0x20f6   : > { %3842 = vadd.xlane.f32.xlu1 %v3841_v20  ;;  %v4812_v20 = vld [vmem:[%s6396_s13 + $0x10] sm:$0xff] }
0x20f7   : > { %v3894_v22 = vpop.xlane.xlu1 %3893 }
0x20f8   : > { %v3895_v33 = vsub.f32 %v3891_v4, %v3894_v22  ;;  %v4817_v22 = vld [vmem:[%s6388_s0 + $0x38] sm:$0xff] }
0x20f9   : > { %v3962_v23 = vpop.permute.xlu2 %3961  ;;  %4150 = vmatpush.bf16.msrb.mxu0 %v4817_v22 }
0x20fa   : > { %v3967_v25 = vsel %vm1525_vm9, %v3962_v23, 0  ;;  %v3896_v30 = vmul.f32 1.442695, %v3895_v33 }
0x20fb   : > { %3976 = vmatpush.bf16.msra.mxu1 %v3967_v25  ;;  %v4816_v25 = vld [vmem:[%s6388_s0 + $0x30] sm:$0xff] }
0x20fd   : > { %4151 = vmatpush.bf16.msrb.mxu0 %v4816_v25 }
0x2101   : > { %v3951_v26 = vpop.xlane.xlu1 %3950 }
0x2102   : > { %v3952_v28 = vsub.f32 %v3948_v8, %v3951_v26 }
0x2104   : > { %v3953_v27 = vmul.f32 1.442695, %v3952_v28 }
0x2106   : > { %5083 = vpow2.f32 %v3953_v27 }
0x2107   : > { %5085 = vpow2.f32 %v3896_v30 }
0x210c   : > { %v5084_v6 = vpop.eup %5083 }
0x210d   : > { %v3955_v32 = vsel %vm1487_vm6, %v5084_v6, 0.0  ;;  %v5086_v34 = vpop.eup %5085 }
0x210e   : > { %3956 = vadd.xlane.f32.xlu0 %v3955_v32  ;;  %v3898_v35 = vsel %vm1487_vm6, %v5086_v34, 0.0 }
0x210f   : > { %3787 = vrot.lane.b32.xlu1 %v6051_v48, %s6372_s2  ;;  %s4399_s2 = sshll.u32 %s1361_s15, 3 }
0x2110   : > { %v3780_v43 = vpop.xlane.xlu0 %3779  ;;  %s1363_s1 = scalar_lea.vmem [#allocation5], %s4399_s2 }
0x2122   : > { %3904 = vrot.lane.b32.xlu0 %v6051_v48, %s6355_s5  ;;  %s6395_s5 = sld [smem:[#allocation41_spill]] }
0x2128   : > { %v4969_v9 = vld [vmem:[%s6395_s5 + $0x1] ss:$0 sm:$0xff]  ;;  %s4245_s5 = sshll.u32 %s1363_s1, 4  ;;  %s4246_s5 = int_to_ptr.vmem [resolvable:$true] %s4245_s5 }
0x2139   : > { %3899 = vadd.xlane.f32.xlu1 %v3898_v35 }
0x2169   : > { %v3843_v38 = vpop.xlane.xlu1 %3842 }
0x216a   : > { %5087 = vrcp.f32 %v3843_v38  ;;  %v4971_v38 = vld [vmem:[%s6390_s30 + $0x1] ss:$0 sm:$0xff] }
0x216b   : > { %5089 = vrcp.f32 %v3780_v43 }
0x2170   : > { %v5088_v39 = vpop.eup %5087 }
0x2171   : > { %v3845_v41 = vmul.f32 %v5088_v39, %v5082_v21  ;;  %v5090_v37 = vpop.eup %5089  ;;  %v4813_v21 = vld [vmem:[%s6396_s13 + $0x18] sm:$0xff] }
0x2172   : > { %v3782_v44 = vmul.f32 %v5090_v37, %v5080_v13  ;;  %v4815_v37 = vld [vmem:[%s6388_s0 + $0x28] sm:$0xff] }
0x2173   : > { %v3846_v42 = vpack.c.bf16 %v3845_v41, %v3845_v41  ;;  %4152 = vmatpush.bf16.msrb.mxu0 %v4815_v37 }
0x2174   : > { %v3783_v49 = vpack.c.bf16 %v3782_v44, %v3782_v44  ;;  %v4814_v44 = vld [vmem:[%s6388_s0 + $0x20] sm:$0xff] }
0x2175   : > { %4695 = vmatmul.msk.bf16.vlgmr.msrb.gmra.mxu1 %vm1487_vm6, %v3846_v42 }
0x2177   : > { %4153 = vmatpush.bf16.msrb.mxu0 %v4814_v44 }
0x2181   : > { %v3957_v45 = vpop.xlane.xlu0 %3956  ;;  %v3788_v48 = vpop.permute.xlu1 %3787 }
0x2182   : > { %5091 = vrcp.f32 %v3957_v45  ;;  %v3793_v47 = vsel %vm1525_vm9, %v3788_v48, 0 }
0x2183   : > { %3802 = vmatpush.bf16.msrb.mxu2 %v3793_v47 }
0x2186   : > { %4693 = vmatmul.msk.bf16.vlgmr.msrb.gmra.mxu2 %vm1487_vm6, %v3783_v49 }
0x2188   : > { %v5092_v31 = vpop.eup %5091 }
0x2189   : > { %v3959_v63 = vmul.f32 %v5092_v31, %v5084_v6 }
0x218b   : > { %v3960_v50 = vpack.c.bf16 %v3959_v63, %v3959_v63 }
0x218d   : > { %4699 = vmatmul.msk.bf16.vlgmr.msra.gmra.mxu1 %vm1487_vm6, %v3960_v50  ;;  %v4973_v50 = vld [vmem:[%s6392_s4 + $0x1] ss:$0 sm:$0xff] }
0x2194   : > { %v3905_v51 = vpop.permute.xlu0 %3904 }
0x2195   : > { %v3910_v52 = vsel %vm1525_vm9, %v3905_v51, 0 }
0x2196   : > { %3919 = vmatpush.bf16.msra.mxu2 %v3910_v52 }
0x219a   : > { %4096 = vmatpush.bf16.msrb.mxu2 %v4813_v21 }
0x219e   : > { %4097 = vmatpush.bf16.msrb.mxu2 %v4812_v20 }
0x21ac   : > { %v3900_v53 = vpop.xlane.xlu1 %3899 }
0x21ad   : > { %5093 = vrcp.f32 %v3900_v53 }
0x21b3   : > { %v5094_v54 = vpop.eup %5093 }
0x21b4   : > { %v3902_v55 = vmul.f32 %v5094_v54, %v5086_v34  ;;  %v4970_v34 = vld [vmem:[%s6397_s17 + $0x1] ss:$0 sm:$0xff] }
0x21b6   : > { %v3903_v29 = vpack.c.bf16 %v3902_v55, %v3902_v55 }
0x21b8   : > { %4697 = vmatmul.msk.bf16.vlgmr.msra.gmra.mxu2 %vm1487_vm6, %v3903_v29 }
0x21f2   : > { %v3864_v56 = vpop.f32.mrf.mxu1 }
0x21f3   : > { %3983 = vrot.lane.b32.xlu2 %v3864_v56, %s6364_s24  ;;  %s6401_s24 = sld [smem:[#allocation56_spill]] }
0x21f9   : > { %s4763_s18 = sshll.u32 %s6401_s24, 3 }
0x21fa   : > { %v3866_v57 = vpop.f32.mrf.mxu1 }
0x2209   : > { %v3804_v58 = vpop.f32.mrf.mxu2 }
0x220a   : > { %v3978_v16 = vpop.f32.mrf.mxu1 }
0x220b   : > { %3991 = vrot.lane.b32.xlu0 %v3978_v16, %s6365_s29  ;;  %s6398_s29 = sld [smem:[#allocation45_spill]] }
0x2211   : > { %v3806_v60 = vpop.f32.mrf.mxu2  ;;  %v4972_v45 = vld [vmem:[%s6398_s29 + $0x1] ss:$0 sm:$0xff]  ;;  %s4233_s29 = scalar_lea.sflag [#allocation4], %s1361_s15 }
0x2212   : > { %v3980_v61 = vpop.f32.mrf.mxu1  ;;  %v4819_v60 = vld [vmem:[%s6399_s3 + $0x8] sm:$0xff] }
0x2213   : > { %4224 = vmatpush.bf16.msrb.mxu1 %v4819_v60  ;;  %v4818_v61 = vld [vmem:[%s6399_s3] sm:$0xff] }
0x2217   : > { %4225 = vmatpush.bf16.msrb.mxu1 %v4818_v61 }
0x223b   : > { %v3921_v62 = vpop.f32.mrf.mxu2 }
0x223c   : > { %3987 = vrot.lane.b32.xlu2 %v3921_v62, %s6366_s28  ;;  %s6402_s28 = sld [smem:[#allocation51_spill]] }
0x2242   : > { %s6403_s10 = smov %s6402_s28  ;;  %s4243_s7 = scalar_lea.hbm %s6402_s28, %s4763_s18 }
0x2243   : > { %v3923_v0 = vpop.f32.mrf.mxu2  ;;  %s4247_s17 = sshll.u32 %s4243_s7, 4  ;;  %s5149_s24 = scalar_lea.hbm %s6403_s10, 16  ;;  %s4248_s17 = int_to_ptr.hbm [resolvable:$true] %s4247_s17 }
0x2244   : > { %s5143_s0 = sshra.s32 %s4248_s17, 4  ;;  %s5144_s0 = int_to_ptr.hbm [resolvable:$true] %s5143_s0 }
0x2245   : > { %s5145_s8 = scalar_lea.hbm %s5144_s0, 8  ;;  %p5150_p13 = scmp.lt.s32.totalorder %s5144_s0, %s6403_s10 }
0x2246   : > { %p5146_p9 = scmp.ne.s32.totalorder %s5144_s0, %s5145_s8  ;;  %p5151_p0 = scmp.lt.s32.totalorder %s5149_s24, %s5145_s8 }
0x2248   : > { %p5147_p10 = pnand %p5146_p9, %p5526_p5  ;;  %p5152_p1 = por %p5151_p0, %p5150_p13 }
0x224a   : > { %p5148_p12 = pneg %p5147_p10 }
0x224c   : > { %p5153_p2 = pnand %p5152_p1, %p5148_p12 }
0x224d   : > { %v3984_v3 = vpop.permute.xlu2 %3983 }
0x224e   : > { %v3994_v4 = vsel %vm1487_vm6, %v3804_v58, %v3984_v3 }
0x227d   : > { %v3992_v7 = vpop.permute.xlu0 %3991 }
0x2296   : > { %v3988_v5 = vpop.permute.xlu2 %3987 }
0x2297   : > { %v3995_v36 = vsel %vm1726_vm10, %v3994_v4, %v3988_v5 }
0x2298   : > { %v3996_v8 = vsel %vm1728_vm11, %v3995_v36, %v3992_v7 }
0x2299   : > { %v3997_v24 = vpack.c.bf16 %v3996_v8, %v3996_v8  ;;  %v4974_v8 = vld [vmem:[%s6394_s25 + $0x1] ss:$0 sm:$0xff] }
0x229b   : > { %4708 = vmatmul.msk.bf16.vlgmr.msra.gmra.mxu3 %vm1401_vm0, %v3997_v24 }
0x231e   : > { %v4025_v10 = vpop.f32.mrf.mxu3 }
0x231f   : > { %v4026_v11 = vadd.f32 %v4969_v9, %v4025_v10  ;;  %v4975_v9 = vld [vmem:[%s5471_s9 + $0x1] ss:$0 sm:$0xff] }
0x2321   : > { %v4029_v12 = vadd.f32 %v4026_v11, %v6085_v46 }
0x2323   : > { %v4034_v13 = vsel %vm1401_vm0, %v4029_v12, 0.0 }
0x2324   : > { %4035 = vadd.xlane.f32.xlu2 %v4034_v13  ;;  %v4976_v13 = vld [vmem:[#allocation2] ss:$0 sm:$0xff] }
0x2326   : > { %v4027_v15 = vpop.f32.mrf.mxu3 }
0x2397   : > { %v4036_v59 = vpop.xlane.xlu2 %4035 }
0x2398   : > { %v4037_v17 = vmul.f32 %v4036_v59, %v5577_v14 }
0x239a   : > { %v4038_v18 = vsub.f32 %v4029_v12, %v4037_v17 }
0x239c   : > { %v4039_v40 = vmul.f32 %v4038_v18, %v4038_v18 }
0x239e   : > { %v4040_v19 = vsel %vm1401_vm0, %v4039_v40, 0.0 }
0x239f   : > { %4041 = vadd.xlane.f32.xlu0 %v4040_v19 }
0x2412   : > { %v4042_v46 = vpop.xlane.xlu0 %4041 }
0x2413   : > { %v4043_v23 = vmul.f32 %v4042_v46, %v5577_v14 }
0x2415   : > { %v4044_v26 = vadd.f32 1e-06, %v4043_v23 }
0x2417   : > { %5095 = vrsqrt.f32 %v4044_v26  ;;  %vm4051_vm8 = vweird.f32 %v4044_v26 }
0x241d   : > { %v5096_v28 = vpop.eup %5095 }
0x241e   : > { %v4046_v27 = vmul.f32 %v5096_v28, %v4044_v26  ;;  %vm4052_vm6 = vweird.f32 %v5096_v28 }
0x241f   : > { %vm4053_vm9 = vmor %vm4051_vm8, %vm4052_vm6 }
0x2420   : > { %v4047_v6 = vmul.f32 %v5096_v28, %v4046_v27 }
0x2422   : > { %v4048_v32 = vmul.f32 0.5, %v4047_v6 }
0x2424   : > { %v4049_v33 = vsub.f32 1.5, %v4048_v32 }
0x2426   : > { %v4050_v30 = vmul.f32 %v5096_v28, %v4049_v33 }
0x2428   : > { %v4054_v35 = vsel %vm4053_vm9, %v5096_v28, %v4050_v30 }
0x2429   : > { %v4055_v39 = vmul.f32 %v4054_v35, %v4038_v18 }
0x242b   : > { %v4059_v41 = vmul.f32 %v4970_v34, %v4055_v39 }
0x242d   : > { %v4063_v42 = vadd.f32 %v4971_v38, %v4059_v41 }
0x242f   : > { %v4064_v43 = vpack.c.bf16 %v4063_v42, %v4063_v42 }
0x2431   : > { %4724 = vmatmul.msk.bf16.vlgmr.msrb.gmra.mxu2 %vm1401_vm0, %v4064_v43 }
0x24b4   : > { %v4099_v48 = vpop.f32.mrf.mxu2 }
0x24b5   : > { %v4100_v47 = vadd.f32 %v4972_v45, %v4099_v48 }
0x24b7   : > { %v4103_v49 = vmax.f32 %v4100_v47, 0.0 }
0x24b9   : > { %v4104_v31 = vpack.c.bf16 %v4103_v49, %v4103_v49 }
0x24bb   : > { %4750 = vmatmul.msk.bf16.vlgmr.msrb.gmra.mxu0 %vm1870_vm15, %v4104_v31 }
0x24bc   : > { %v4101_v63 = vpop.f32.mrf.mxu2 }
0x2538   : > { %v4155_v51 = vpop.f32.mrf.mxu0 }
0x2539   : > { %v4156_v52 = vadd.f32 %v4973_v50, %v4155_v51 }
0x253b   : > { %v4159_v53 = vadd.f32 %v4156_v52, %v4063_v42 }
0x253d   : > { %v4164_v54 = vsel %vm1401_vm0, %v4159_v53, 0.0 }
0x253e   : > { %4165 = vadd.xlane.f32.xlu1 %v4164_v54 }
0x2540   : > { %v4157_v55 = vpop.f32.mrf.mxu0 }
0x25b1   : > { %v4166_v29 = vpop.xlane.xlu1 %4165 }
0x25b2   : > { %v4167_v56 = vmul.f32 %v4166_v29, %v5577_v14 }
0x25b4   : > { %v4168_v57 = vsub.f32 %v4159_v53, %v4167_v56 }
0x25b6   : > { %v4169_v58 = vmul.f32 %v4168_v57, %v4168_v57 }
0x25b8   : > { %v4170_v16 = vsel %vm1401_vm0, %v4169_v58, 0.0 }
0x25b9   : > { %4171 = vadd.xlane.f32.xlu1 %v4170_v16 }
0x262c   : > { %v4172_v62 = vpop.xlane.xlu1 %4171 }
0x262d   : > { %v4173_v0 = vmul.f32 %v4172_v62, %v5577_v14 }
0x262f   : > { %v4174_v1 = vadd.f32 1e-06, %v4173_v0 }
0x2631   : > { %5097 = vrsqrt.f32 %v4174_v1  ;;  %vm4181_vm15 = vweird.f32 %v4174_v1 }
0x2637   : > { %v5098_v2 = vpop.eup %5097 }
0x2638   : > { %v4176_v3 = vmul.f32 %v5098_v2, %v4174_v1  ;;  %vm4182_vm11 = vweird.f32 %v5098_v2 }
0x2639   : > { %vm4183_vm1 = vmor %vm4181_vm15, %vm4182_vm11 }
0x263a   : > { %v4177_v4 = vmul.f32 %v5098_v2, %v4176_v3 }
0x263c   : > { %v4178_v5 = vmul.f32 0.5, %v4177_v4 }
0x263e   : > { %v4179_v7 = vsub.f32 1.5, %v4178_v5 }
0x2640   : > { %v4180_v36 = vmul.f32 %v5098_v2, %v4179_v7 }
0x2642   : > { %v4184_v24 = vsel %vm4183_vm1, %v5098_v2, %v4180_v36 }
0x2643   : > { %v4185_v10 = vmul.f32 %v4184_v24, %v4168_v57 }
0x2645   : > { %v4189_v11 = vmul.f32 %v4974_v8, %v4185_v10 }
0x2647   : > { %v4193_v14 = vadd.f32 %v4975_v9, %v4189_v11 }
0x2649   : > { %v4194_v12 = vpack.c.bf16 %v4193_v14, %v4193_v14 }
0x264b   : > { %4761 = vmatmul.msk.bf16.vlgmr.msrb.gmra.mxu1 %vm1401_vm0, %v4194_v12 }
0x26c8   : > { %v4227_v15 = vpop.f32.mrf.mxu1 }
0x26c9   : > { %v4228_v59 = vadd.f32 %v4976_v13, %v4227_v15 }
0x26cb   : > { %4231 = vst.msk [vmem:[%s1363_s1] sm:$0xff] %vm1726_vm10, %v4228_v59 }
0x26cc   : > { %5156 = shalt.err (!%p5153_p2)
}
0x26cd   : > { %4824 = dma.vmem_to_hbm [thread:$0]  (%p5526_p5), %s4246_s5, 128, %s4248_s17, %s4233_s29  }
0x26d0   : > { %v4229_v17 = vpop.f32.mrf.mxu1 }
0x26d1 PF: > { %s6405_s28 = sld [smem:[#allocation55_spill]] }
0x26d2   : > { %s6406_s15 = sld [smem:[#allocation52_spill]] }
0x26d7   : > { %p4836_p3 = scmp.ge.s32.totalorder %s6405_s28, 2 }
0x26d8   : > { %s4259_s2 = sand.u32 1, %s6406_s15  }
0x26d9   : > { %p4831_p4 = pnand %p4836_p3, %p5530_p6  ;;  %s4260_s7 = scalar_lea.sflag [#allocation4], %s4259_s2 }
0x26db   : > { %p4832_p7 = pneg %p4831_p4 }
0x26dd   : > { %5178 = dma.done.wait (%p4832_p7), %s4260_s7, 128  }
0x26de   : > { %5180 = vsyncadd (%p4832_p7), %s4260_s7, 4294967168  ;;  %s6408_s7 = sld [smem:[#allocation57_spill]] }
0x26df   : > { %s6409_s28 = sld [smem:[#allocation53_spill]] }
0x26e0   : > { %s6410_s1 = sld [smem:[#allocation54_spill]] }
0x26e1   : > { %s6411_s2 = sld [smem:[#allocation58_spill]] }
0x26e4   : > { %p100_p8 = scmp.ge.s32.totalorder %s6408_s7, 4  }
0x26e6   :  { %102 = sbr.rel (!%p100_p8) target bundleno = 109 (0x6d), region = 321 }
0x26eb   :  { %4266 = vsyncpa [#allocation3], 1 }
0x26ec   :  { %4268 = vsyncpa [#allocation3 + $0x1], 1 }
0x26ed   :  { %4269 = vsyncpa [#allocation4], 1 }
0x26ee   :  { %4271 = vsyncpa [#allocation4 + $0x1], 1 }

</bundles_post_ra>
